<compile_context>
chip_gen: v5e
topology: v5e:2x2
jax: 0.10.0
libtpu: 0.0.40
codegen_flags: <defaults>
</compile_context>

<pallas_src>
import math

import jax
import jax.numpy as jnp
from jax.experimental import pallas as pl
from jax.experimental.pallas import tpu as pltpu


def _leaky_relu(x, slope=0.2):
    return jnp.where(x > 0, x, slope * x)


def disc_kernel(img_ref, cls_ref, w1i_ref, w2_ref, b2_ref, w3_ref, b3_ref,
                out_ref):
    # img_ref : (TB, img_dim) bf16    cls_ref : (TB, 512) f32 (= emb@W1e + b1)
    # w1i_ref : (img_dim, 512) bf16   w2_ref  : (512, 256) bf16
    # b2_ref  : (1, 256) f32          w3_ref  : (1, 256) f32
    # b3_ref  : (1, 1) f32 in SMEM    out_ref : (TB, 1) f32
    img = img_ref[...]

    # Layer 1: image part of the first Linear on the MXU (bf16 in, f32 acc),
    # plus the precomputed per-class bias row (exactly emb@W1_emb + b1).
    h1 = jnp.dot(img, w1i_ref[...], preferred_element_type=jnp.float32)
    h1 = h1 + cls_ref[...]
    h1 = _leaky_relu(h1, 0.2)

    # Layer 2: 512 -> 256 on the MXU (bf16 operands, f32 accumulation).
    h2 = jnp.dot(h1.astype(jnp.bfloat16), w2_ref[...],
                 preferred_element_type=jnp.float32) + b2_ref[...]
    h2 = _leaky_relu(h2, 0.2)

    # Layer 3: 256 -> 1 as a VPU multiply + lane reduction (avoids an N=1
    # MXU matmul), scalar bias from SMEM, then sigmoid.
    h3 = jnp.sum(h2 * w3_ref[...], axis=-1, keepdims=True) + b3_ref[0, 0]
    out_ref[...] = 1.0 / (1.0 + jnp.exp(-h3))


def init_params(key, img_dim, num_classes=10, embedding_size=10):
    """PyTorch-style init (Embedding ~ N(0,1), Linear ~ U(-1/sqrt(fan_in), ...))."""
    ks = jax.random.split(key, 7)
    in1 = img_dim + embedding_size

    def lin(kw, kb, fan_in, fan_out):
        bound = 1.0 / math.sqrt(fan_in)
        w = jax.random.uniform(kw, (fan_in, fan_out), jnp.float32, -bound, bound)
        b = jax.random.uniform(kb, (1, fan_out), jnp.float32, -bound, bound)
        return w, b

    emb = jax.random.normal(ks[0], (num_classes, embedding_size), jnp.float32)
    w1, b1 = lin(ks[1], ks[2], in1, 512)
    w2, b2 = lin(ks[3], ks[4], 512, 256)
    w3, b3 = lin(ks[5], ks[6], 256, 1)
    return {
        "emb": emb,
        "w1i": w1[:img_dim],      # image part of the first Linear
        "w1e": w1[img_dim:],      # embedding part of the first Linear
        "b1": b1,
        "w2": w2, "b2": b2,
        "w3": w3, "b3": b3,
    }


def discriminator_forward(images, labels, params, *, tb=128):
    B = images.shape[0]
    img_dim = params["w1i"].shape[0]
    img_flat = images.reshape(B, -1).astype(jnp.float32)

    # Fold Embedding + the embedding slice of Linear1 + b1 into a per-class
    # table, gathered per label (glue in the wrapper, exact in f32).
    cls_table = params["emb"] @ params["w1e"] + params["b1"]   # (num_classes, 512)
    cls_bias = cls_table[labels]                               # (B, 512) f32

    # Pad the batch to a multiple of the batch tile (sublane/MXU hygiene).
    b_pad = pl.cdiv(B, tb) * tb
    if b_pad != B:
        img_flat = jnp.pad(img_flat, ((0, b_pad - B), (0, 0)))
        cls_bias = jnp.pad(cls_bias, ((0, b_pad - B), (0, 0)))

    # bf16 MXU operands (f32 accumulation inside the kernel).
    img_bf16 = img_flat.astype(jnp.bfloat16)
    w1i = params["w1i"].astype(jnp.bfloat16)
    w2 = params["w2"].astype(jnp.bfloat16)
    b2 = params["b2"]                                   # (1, 256) f32
    w3 = params["w3"].reshape(1, -1)                    # (1, 256) f32
    b3 = params["b3"].reshape(1, 1)                     # (1, 1)   f32 -> SMEM

    grid = (b_pad // tb,)
    in_specs = [
        pl.BlockSpec((tb, img_dim), lambda i: (i, 0)),          # image tile
        pl.BlockSpec((tb, 512), lambda i: (i, 0)),              # class bias tile
        pl.BlockSpec((img_dim, 512), lambda i: (0, 0)),         # W1_img (resident)
        pl.BlockSpec((512, 256), lambda i: (0, 0)),             # W2 (resident)
        pl.BlockSpec((1, 256), lambda i: (0, 0)),               # b2 (resident)
        pl.BlockSpec((1, 256), lambda i: (0, 0)),               # w3 row (resident)
        pl.BlockSpec((1, 1), lambda i: (0, 0),
                     memory_space=pltpu.MemorySpace.SMEM),      # b3 scalar
    ]
    out_spec = pl.BlockSpec((tb, 1), lambda i: (i, 0))

    out = pl.pallas_call(
        disc_kernel,
        out_shape=jax.ShapeDtypeStruct((b_pad, 1), jnp.float32),
        grid=grid,
        in_specs=in_specs,
        out_specs=out_spec,
        compiler_params=pltpu.CompilerParams(
            dimension_semantics=("parallel",),
            vmem_limit_bytes=32 * 1024 * 1024,
        ),
    )(img_bf16, cls_bias, w1i, w2, b2, w3, b3)
    return out[:B]


def _reference_forward(images, labels, params):
    """Pure-f32 JAX reference matching the PyTorch module exactly."""
    B = images.shape[0]
    img_flat = images.reshape(B, -1).astype(jnp.float32)
    emb = params["emb"][labels]
    x = jnp.concatenate([img_flat, emb], axis=1)
    w1 = jnp.concatenate([params["w1i"], params["w1e"]], axis=0)
    h1 = _leaky_relu(x @ w1 + params["b1"], 0.2)
    h2 = _leaky_relu(h1 @ params["w2"] + params["b2"], 0.2)
    h3 = h2 @ params["w3"] + params["b3"]
    return jax.nn.sigmoid(h3)


if __name__ == "__main__":
    # Small shapes consistent with the module: channels=1, img_size=16 -> img_dim=256.
    B, C, H, W = 2, 1, 16, 16
    num_classes, embedding_size = 10, 10
    img_dim = C * H * W

    key = jax.random.PRNGKey(0)
    k_img, k_lab, k_par = jax.random.split(key, 3)

    images = jax.random.normal(k_img, (B, C, H, W), jnp.float32)   # NCHW
    labels = jax.random.randint(k_lab, (B,), 0, num_classes)
    params = init_params(k_par, img_dim, num_classes, embedding_size)

    out = discriminator_forward(images, labels, params)
    out = jax.block_until_ready(out)

    ref = _reference_forward(images, labels, params)
    assert out.shape == (B, 1)
    # bf16 MXU operands vs f32 reference -> loosened tolerance.
    assert jnp.allclose(out, ref, atol=2e-2, rtol=2e-2), (out, ref)

    print("KERNEL_OK")
</pallas_src>

<mosaic_0001>
module attributes {stable_mosaic.version = 11 : i64} {
  func.func @disc_kernel(%arg0: i32, %arg1: memref<128x256xbf16, #tpu.memory_space<vmem>>, %arg2: memref<128x512xf32, #tpu.memory_space<vmem>>, %arg3: memref<256x512xbf16, #tpu.memory_space<vmem>>, %arg4: memref<512x256xbf16, #tpu.memory_space<vmem>>, %arg5: memref<1x256xf32, #tpu.memory_space<vmem>>, %arg6: memref<1x256xf32, #tpu.memory_space<vmem>>, %arg7: memref<1x1xf32, #tpu.memory_space<smem>>, %arg8: memref<128x1xf32, #tpu.memory_space<vmem>>) attributes {dimension_semantics = [#tpu.dimension_semantics<parallel>], iteration_bounds = array<i64: 1>, scalar_prefetch = 0 : i64, scratch_operands = 0 : i64, tpu.core_type = #tpu.core_type<tc>, window_params = [{transform_indices = @transform_0, window_bounds = array<i64: 128, 256>}, {transform_indices = @transform_1, window_bounds = array<i64: 128, 512>}, {pipeline_mode = #tpu.pipeline_mode<synchronous>, transform_indices = @transform_2, window_bounds = array<i64: 256, 512>}, {pipeline_mode = #tpu.pipeline_mode<synchronous>, transform_indices = @transform_3, window_bounds = array<i64: 512, 256>}, {pipeline_mode = #tpu.pipeline_mode<synchronous>, transform_indices = @transform_4, window_bounds = array<i64: 1, 256>}, {pipeline_mode = #tpu.pipeline_mode<synchronous>, transform_indices = @transform_5, window_bounds = array<i64: 1, 256>}, {transform_indices = @transform_6, window_bounds = array<i64: 1, 1>}, {transform_indices = @transform_7, window_bounds = array<i64: 128, 1>}]} {
    %c0 = arith.constant 0 : index
    %c0_0 = arith.constant 0 : index
    %0 = vector.load %arg1[%c0, %c0_0] : memref<128x256xbf16, #tpu.memory_space<vmem>>, vector<128x256xbf16>
    %c0_1 = arith.constant 0 : index
    %c0_2 = arith.constant 0 : index
    %1 = vector.load %arg3[%c0_1, %c0_2] : memref<256x512xbf16, #tpu.memory_space<vmem>>, vector<256x512xbf16>
    %cst = arith.constant dense<0.000000e+00> : vector<128x512xf32>
    %2 = tpu.matmul %0, %1, %cst {dimension_numbers = #tpu.dot_dimension_numbers<[1], [0], [0], [1], [0, 0, 1, 1], [], []>} : vector<128x256xbf16>, vector<256x512xbf16>, vector<128x512xf32> -> vector<128x512xf32>
    %c0_3 = arith.constant 0 : index
    %c0_4 = arith.constant 0 : index
    %3 = vector.load %arg2[%c0_3, %c0_4] : memref<128x512xf32, #tpu.memory_space<vmem>>, vector<128x512xf32>
    %4 = arith.addf %2, %3 : vector<128x512xf32>
    %cst_5 = arith.constant 0.000000e+00 : f32
    %5 = vector.broadcast %cst_5 : f32 to vector<128x512xf32>
    %6 = arith.cmpf ogt, %4, %5 : vector<128x512xf32>
    %cst_6 = arith.constant 2.000000e-01 : f32
    %7 = vector.broadcast %cst_6 : f32 to vector<128x512xf32>
    %8 = arith.mulf %7, %4 : vector<128x512xf32>
    %9 = arith.select %6, %4, %8 : vector<128x512xi1>, vector<128x512xf32>
    %10 = arith.truncf %9 : vector<128x512xf32> to vector<128x512xbf16>
    %c0_7 = arith.constant 0 : index
    %c0_8 = arith.constant 0 : index
    %11 = vector.load %arg4[%c0_7, %c0_8] : memref<512x256xbf16, #tpu.memory_space<vmem>>, vector<512x256xbf16>
    %cst_9 = arith.constant dense<0.000000e+00> : vector<128x256xf32>
    %12 = tpu.matmul %10, %11, %cst_9 {dimension_numbers = #tpu.dot_dimension_numbers<[1], [0], [0], [1], [0, 0, 1, 1], [], []>} : vector<128x512xbf16>, vector<512x256xbf16>, vector<128x256xf32> -> vector<128x256xf32>
    %c0_10 = arith.constant 0 : index
    %c0_11 = arith.constant 0 : index
    %13 = vector.load %arg5[%c0_10, %c0_11] : memref<1x256xf32, #tpu.memory_space<vmem>>, vector<1x256xf32>
    %14 = vector.broadcast %13 : vector<1x256xf32> to vector<128x256xf32>
    %15 = arith.addf %12, %14 : vector<128x256xf32>
    %cst_12 = arith.constant 0.000000e+00 : f32
    %16 = vector.broadcast %cst_12 : f32 to vector<128x256xf32>
    %17 = arith.cmpf ogt, %15, %16 : vector<128x256xf32>
    %cst_13 = arith.constant 2.000000e-01 : f32
    %18 = vector.broadcast %cst_13 : f32 to vector<128x256xf32>
    %19 = arith.mulf %18, %15 : vector<128x256xf32>
    %20 = arith.select %17, %15, %19 : vector<128x256xi1>, vector<128x256xf32>
    %c0_14 = arith.constant 0 : index
    %c0_15 = arith.constant 0 : index
    %21 = vector.load %arg6[%c0_14, %c0_15] : memref<1x256xf32, #tpu.memory_space<vmem>>, vector<1x256xf32>
    %22 = vector.broadcast %21 : vector<1x256xf32> to vector<128x256xf32>
    %23 = arith.mulf %20, %22 : vector<128x256xf32>
    %cst_16 = arith.constant dense<0.000000e+00> : vector<128xf32>
    %24 = vector.multi_reduction <add>, %23, %cst_16 [1] : vector<128x256xf32> to vector<128xf32>
    %25 = vector.shape_cast %24 : vector<128xf32> to vector<128x1xf32>
    %c0_17 = arith.constant 0 : index
    %c0_18 = arith.constant 0 : index
    %26 = memref.load %arg7[%c0_17, %c0_18] : memref<1x1xf32, #tpu.memory_space<smem>>
    %27 = vector.broadcast %26 : f32 to vector<128x1xf32>
    %28 = arith.addf %25, %27 : vector<128x1xf32>
    %cst_19 = arith.constant 0.000000e+00 : f32
    %29 = vector.broadcast %cst_19 : f32 to vector<128x1xf32>
    %30 = arith.subf %29, %28 : vector<128x1xf32>
    %31 = math.exp %30 : vector<128x1xf32>
    %cst_20 = arith.constant 1.000000e+00 : f32
    %32 = vector.broadcast %cst_20 : f32 to vector<128x1xf32>
    %33 = arith.addf %32, %31 : vector<128x1xf32>
    %cst_21 = arith.constant 1.000000e+00 : f32
    %34 = vector.broadcast %cst_21 : f32 to vector<128x1xf32>
    %35 = arith.divf %34, %33 : vector<128x1xf32>
    %c0_22 = arith.constant 0 : index
    %c0_23 = arith.constant 0 : index
    %36 = vector.load %arg8[%c0_22, %c0_23] : memref<128x1xf32, #tpu.memory_space<vmem>>, vector<128x1xf32>
    tpu.vector_store %arg8[%c0_22, %c0_23], %35 {strides = array<i32>} : memref<128x1xf32, #tpu.memory_space<vmem>>, vector<128x1xf32>,
    return
  }
  func.func @transform_0(%arg0: i32) -> (i32, i32) {
    %c0_i32 = arith.constant 0 : i32
    %c0_i32_0 = arith.constant 0 : i32
    return %arg0, %c0_i32 : i32, i32
  }
  func.func @transform_1(%arg0: i32) -> (i32, i32) {
    %c0_i32 = arith.constant 0 : i32
    %c0_i32_0 = arith.constant 0 : i32
    return %arg0, %c0_i32 : i32, i32
  }
  func.func @transform_2(%arg0: i32) -> (i32, i32) {
    %c0_i32 = arith.constant 0 : i32
    %c0_i32_0 = arith.constant 0 : i32
    %c0_i32_1 = arith.constant 0 : i32
    return %c0_i32, %c0_i32_0 : i32, i32
  }
  func.func @transform_3(%arg0: i32) -> (i32, i32) {
    %c0_i32 = arith.constant 0 : i32
    %c0_i32_0 = arith.constant 0 : i32
    %c0_i32_1 = arith.constant 0 : i32
    return %c0_i32, %c0_i32_0 : i32, i32
  }
  func.func @transform_4(%arg0: i32) -> (i32, i32) {
    %c0_i32 = arith.constant 0 : i32
    %c0_i32_0 = arith.constant 0 : i32
    %c0_i32_1 = arith.constant 0 : i32
    return %c0_i32, %c0_i32_0 : i32, i32
  }
  func.func @transform_5(%arg0: i32) -> (i32, i32) {
    %c0_i32 = arith.constant 0 : i32
    %c0_i32_0 = arith.constant 0 : i32
    %c0_i32_1 = arith.constant 0 : i32
    return %c0_i32, %c0_i32_0 : i32, i32
  }
  func.func @transform_6(%arg0: i32) -> (i32, i32) {
    %c0_i32 = arith.constant 0 : i32
    %c0_i32_0 = arith.constant 0 : i32
    %c0_i32_1 = arith.constant 0 : i32
    return %c0_i32, %c0_i32_0 : i32, i32
  }
  func.func @transform_7(%arg0: i32) -> (i32, i32) {
    %c0_i32 = arith.constant 0 : i32
    %c0_i32_0 = arith.constant 0 : i32
    return %arg0, %c0_i32 : i32, i32
  }
}

</mosaic_0001>

<bundles_post_ra>
// kernel: tpu_custom_call.1
= control target key start
LH: loop header
LB: loop body
LE: loop exit
PB: predicated region body
PF: predicated region fallthrough
CT: control target
= control target key end

     0   :  { %13 = vsyncpa [#allocation4], 0  ;;  %s4047_s0 = inlined_call_operand.hbm [shape: bf16[128,256], index: 0, kind: input, shape index: {}]   ;;  %s4048_s1 = inlined_call_operand.hbm [shape: f32[128,512], index: 1, kind: input, shape index: {}]   ;;  %s4049_s2 = inlined_call_operand.hbm [shape: bf16[256,512], index: 2, kind: input, shape index: {}]   ;;  %s4050_s3 = inlined_call_operand.hbm [shape: bf16[512,256], index: 3, kind: input, shape index: {}]   ;;  %s4051_s4 = inlined_call_operand.vmem [shape: f32[1,256], index: 4, kind: input, shape index: {}]   ;;  %s4052_s5 = inlined_call_operand.vmem [shape: f32[1,256], index: 5, kind: input, shape index: {}]   ;;  %s4053_s6 = inlined_call_operand.<no memory space> [shape: f32[1,1], index: 6, kind: input, shape index: {}]   ;;  %s4054_s7 = inlined_call_operand.vmem [shape: f32[128,1], index: 7, kind: output, shape index: {}]  }
   0x1   :  { %14 = vsyncpa [#allocation6], 0  ;;  %s33_s26 = sshll.u32 %s4048_s1, 4  ;;  %s34_s26 = int_to_ptr.hbm [resolvable:$true] %s33_s26 }
   0x2   :  { %15 = vsyncpa [#allocation9], 0  ;;  %s3456_s27 = smov [#allocation5]   ;;  %s20_s8 = sshll.u32 %s4047_s0, 4  ;;  %s21_s8 = int_to_ptr.hbm [resolvable:$true] %s20_s8 }
   0x3   :  { %s35_s28 = sshll.u32 %s3456_s27, 4  ;;  %s3457_s9 = smov 512   ;;  %s36_s28 = int_to_ptr.vmem [resolvable:$true] %s35_s28 }
   0x4   :  { %s3458_s10 = smov 32   ;;  %s3459_s11 = smov [#allocation3]  }
   0x5   :  { %41 = dma.hbm_to_vmem [thread:$0]  %s34_s26, 8192, %s36_s28, [#allocation6], %s3457_s9, %s3457_s9, %s3458_s10  }
   0x6   :  { %s22_s12 = sshll.u32 %s3459_s11, 4  ;;  %s3460_s13 = smov 128   ;;  %s23_s12 = int_to_ptr.vmem [resolvable:$true] %s22_s12 }
   0x7   :  { %s3461_s14 = smov 8   ;;  %s46_s16 = sshll.u32 %s4049_s2, 4  ;;  %s47_s16 = int_to_ptr.hbm [resolvable:$true] %s46_s16 }
   0x8   :  { %28 = dma.hbm_to_vmem [thread:$0]  %s21_s8, 2048, %s23_s12, [#allocation4], %s3460_s13, %s3460_s13, %s3461_s14  }
   0x9   :  { %s3462_s17 = smov [#allocation7]   ;;  %s59_s20 = sshll.u32 %s4050_s3, 4  ;;  %s60_s20 = int_to_ptr.hbm [resolvable:$true] %s59_s20 }
   0xa   :  { %s48_s18 = sshll.u32 %s3462_s17, 4  ;;  %s3463_s21 = smov 256   ;;  %s49_s18 = int_to_ptr.vmem [resolvable:$true] %s48_s18 }
   0xb   :  { %s3464_s22 = smov 16   ;;  %s3465_s23 = smov [#allocation8]  }
   0xc   :  { %54 = dma.hbm_to_vmem [thread:$0]  %s47_s16, 8192, %s49_s18, [#allocation6], %s3463_s21, %s3463_s21, %s3464_s22  }
   0xd   :  { %s61_s24 = sshll.u32 %s3465_s23, 4  ;;  %s62_s24 = int_to_ptr.vmem [resolvable:$true] %s61_s24 }
   0xe   :  { %67 = dma.hbm_to_vmem [thread:$0]  %s60_s20, 8192, %s62_s24, [#allocation9], %s3460_s13, %s3460_s13, %s3461_s14  }
   0xf   :  { %3450 = dma.done.wait [#allocation4], 2048  }
  0x10   :  { %3451 = vsyncadd [#allocation4], 4294965248 }
  0x11   :  { %3452 = dma.done.wait [#allocation6], 16384  }
  0x12   :  { %3453 = vsyncadd [#allocation6], 4294950912 }
  0x13   :  { %3454 = dma.done.wait [#allocation9], 8192  }
  0x14   :  { %3455 = vsyncadd [#allocation9], 4294959104  ;;  %v2738_v0 = vld [vmem:[#allocation7 + $0xe0] sm:$0xf]  ;;  %v3182_v1 = vld [vmem:[#allocation7 + $0xec] sm:$0xf0] }
  0x15   :  { %v2866_v2 = vld [vmem:[#allocation7 + $0x1e0] sm:$0xf]  ;;  %v2739_v3 = vor.u32 %v3182_v1, %v2738_v0  ;;  %v3214_v4 = vld [vmem:[#allocation7 + $0x1ec] sm:$0xf0]  ;;  %v3180_v5 = vld [vmem:[#allocation7 + $0xe4] sm:$0xf] }
  0x16   :  { %v2740_v6 = vld [vmem:[#allocation7 + $0xf0] sm:$0xf0]  ;;  %v2867_v7 = vor.u32 %v3214_v4, %v2866_v2  ;;  %v3212_v9 = vld [vmem:[#allocation7 + $0x1e4] sm:$0xf]  ;;  %v2722_v11 = vld [vmem:[#allocation7 + $0xc0] sm:$0xf] }
  0x17   :  { %v2743_v8 = vor.u32 %v3180_v5, %v2740_v6  ;;  %v2868_v10 = vld [vmem:[#allocation7 + $0x1f0] sm:$0xf0]  ;;  %634 = vmatpush.bf16.msra.mxu0 %v2739_v3  ;;  %v3178_v13 = vld [vmem:[#allocation7 + $0xcc] sm:$0xf0]  ;;  %v2850_v14 = vld [vmem:[#allocation7 + $0x1c0] sm:$0xf] }
  0x18   :  { %v2871_v12 = vor.u32 %v3212_v9, %v2868_v10  ;;  %v3210_v15 = vld [vmem:[#allocation7 + $0x1cc] sm:$0xf0]  ;;  %683 = vmatpush.bf16.msra.mxu1 %v2867_v7  ;;  %v2723_v16 = vor.u32 %v3178_v13, %v2722_v11  ;;  %v3176_v18 = vld [vmem:[#allocation7 + $0xc4] sm:$0xf]  ;;  %v2724_v19 = vld [vmem:[#allocation7 + $0xd0] sm:$0xf0] }
  0x19   :  { %732 = vmatpush.bf16.msra.mxu2 %v2743_v8  ;;  %v2851_v17 = vor.u32 %v3210_v15, %v2850_v14  ;;  %v3208_v20 = vld [vmem:[#allocation7 + $0x1c4] sm:$0xf]  ;;  %v2727_v21 = vor.u32 %v3176_v18, %v2724_v19  ;;  %v2852_v22 = vld [vmem:[#allocation7 + $0x1d0] sm:$0xf0]  ;;  %v2706_v23 = vld [vmem:[#allocation7 + $0xa0] sm:$0xf] }
  0x1a   :  { %781 = vmatpush.bf16.msra.mxu3 %v2871_v12  ;;  %v3174_v24 = vld [vmem:[#allocation7 + $0xac] sm:$0xf0]  ;;  %v2855_v25 = vor.u32 %v3208_v20, %v2852_v22  ;;  %v2834_v26 = vld [vmem:[#allocation7 + $0x1a0] sm:$0xf]  ;;  %v3172_v28 = vld [vmem:[#allocation7 + $0xa4] sm:$0xf] }
  0x1b   :  { %v3206_v27 = vld [vmem:[#allocation7 + $0x1ac] sm:$0xf0]  ;;  %635 = vmatpush.bf16.msra.mxu0 %v2723_v16  ;;  %v2707_v29 = vor.u32 %v3174_v24, %v2706_v23  ;;  %v2708_v30 = vld [vmem:[#allocation7 + $0xb0] sm:$0xf0]  ;;  %v3204_v31 = vld [vmem:[#allocation7 + $0x1a4] sm:$0xf] }
  0x1c   :  { %v2836_v32 = vld [vmem:[#allocation7 + $0x1b0] sm:$0xf0]  ;;  %684 = vmatpush.bf16.msra.mxu1 %v2851_v17  ;;  %v2835_v33 = vor.u32 %v3206_v27, %v2834_v26  ;;  %v2711_v34 = vor.u32 %v3172_v28, %v2708_v30  ;;  %v2690_v35 = vld [vmem:[#allocation7 + $0x80] sm:$0xf]  ;;  %v3170_v36 = vld [vmem:[#allocation7 + $0x8c] sm:$0xf0] }
  0x1d   :  { %733 = vmatpush.bf16.msra.mxu2 %v2727_v21  ;;  %v2818_v37 = vld [vmem:[#allocation7 + $0x180] sm:$0xf]  ;;  %v2839_v38 = vor.u32 %v3204_v31, %v2836_v32  ;;  %v3202_v39 = vld [vmem:[#allocation7 + $0x18c] sm:$0xf0]  ;;  %v3168_v40 = vld [vmem:[#allocation7 + $0x84] sm:$0xf]  ;;  %v2691_v44 = vor.u32 %v3170_v36, %v2690_v35 }
  0x1e   :  { %782 = vmatpush.bf16.msra.mxu3 %v2855_v25  ;;  %v2692_v41 = vld [vmem:[#allocation7 + $0x90] sm:$0xf0]  ;;  %v3200_v42 = vld [vmem:[#allocation7 + $0x184] sm:$0xf]  ;;  %v2819_v45 = vor.u32 %v3202_v39, %v2818_v37  ;;  %v2674_v47 = vld [vmem:[#allocation7 + $0x60] sm:$0xf] }
  0x1f   :  { %v2820_v43 = vld [vmem:[#allocation7 + $0x190] sm:$0xf0]  ;;  %636 = vmatpush.bf16.msra.mxu0 %v2707_v29  ;;  %v2695_v46 = vor.u32 %v3168_v40, %v2692_v41  ;;  %v3166_v48 = vld [vmem:[#allocation7 + $0x6c] sm:$0xf0]  ;;  %v2802_v49 = vld [vmem:[#allocation7 + $0x160] sm:$0xf] }
  0x20   :  { %685 = vmatpush.bf16.msra.mxu1 %v2835_v33  ;;  %v2823_v50 = vor.u32 %v3200_v42, %v2820_v43  ;;  %v3198_v51 = vld [vmem:[#allocation7 + $0x16c] sm:$0xf0]  ;;  %v3164_v52 = vld [vmem:[#allocation7 + $0x64] sm:$0xf]  ;;  %v2676_v53 = vld [vmem:[#allocation7 + $0x70] sm:$0xf0]  ;;  %v2675_v56 = vor.u32 %v3166_v48, %v2674_v47 }
  0x21   :  { %734 = vmatpush.bf16.msra.mxu2 %v2711_v34  ;;  %v3196_v54 = vld [vmem:[#allocation7 + $0x164] sm:$0xf]  ;;  %v2804_v55 = vld [vmem:[#allocation7 + $0x170] sm:$0xf0]  ;;  %v2803_v57 = vor.u32 %v3198_v51, %v2802_v49  ;;  %v2679_v58 = vor.u32 %v3164_v52, %v2676_v53  ;;  %v2658_v59 = vld [vmem:[#allocation7 + $0x40] sm:$0xf] }
  0x22   :  { %783 = vmatpush.bf16.msra.mxu3 %v2839_v38  ;;  %v3162_v60 = vld [vmem:[#allocation7 + $0x4c] sm:$0xf0]  ;;  %v2786_v61 = vld [vmem:[#allocation7 + $0x140] sm:$0xf]  ;;  %v2807_v62 = vor.u32 %v3196_v54, %v2804_v55  ;;  %v3160_v0 = vld [vmem:[#allocation7 + $0x44] sm:$0xf] }
  0x23   :  { %637 = vmatpush.bf16.msra.mxu0 %v2691_v44  ;;  %v3194_v63 = vld [vmem:[#allocation7 + $0x14c] sm:$0xf0]  ;;  %v2660_v1 = vld [vmem:[#allocation7 + $0x50] sm:$0xf0]  ;;  %v3192_v2 = vld [vmem:[#allocation7 + $0x144] sm:$0xf]  ;;  %v2659_v4 = vor.u32 %v3162_v60, %v2658_v59 }
  0x24   :  { %686 = vmatpush.bf16.msra.mxu1 %v2819_v45  ;;  %v2788_v3 = vld [vmem:[#allocation7 + $0x150] sm:$0xf0]  ;;  %v2787_v5 = vor.u32 %v3194_v63, %v2786_v61  ;;  %v2663_v6 = vor.u32 %v3160_v0, %v2660_v1  ;;  %v2642_v7 = vld [vmem:[#allocation7 + $0x20] sm:$0xf]  ;;  %v3158_v8 = vld [vmem:[#allocation7 + $0x2c] sm:$0xf0] }
  0x25   :  { %735 = vmatpush.bf16.msra.mxu2 %v2695_v46  ;;  %v2770_v9 = vld [vmem:[#allocation7 + $0x120] sm:$0xf]  ;;  %v2791_v10 = vor.u32 %v3192_v2, %v2788_v3  ;;  %v3190_v11 = vld [vmem:[#allocation7 + $0x12c] sm:$0xf0]  ;;  %v3156_v12 = vld [vmem:[#allocation7 + $0x24] sm:$0xf]  ;;  %v2643_v16 = vor.u32 %v3158_v8, %v2642_v7 }
  0x26   :  { %784 = vmatpush.bf16.msra.mxu3 %v2823_v50  ;;  %v2644_v13 = vld [vmem:[#allocation7 + $0x30] sm:$0xf0]  ;;  %v3188_v14 = vld [vmem:[#allocation7 + $0x124] sm:$0xf]  ;;  %v2626_v17 = vld [vmem:[#allocation7] sm:$0xf]  ;;  %v2771_v19 = vor.u32 %v3190_v11, %v2770_v9 }
  0x27   :  { %638 = vmatpush.bf16.msra.mxu0 %v2675_v56  ;;  %v2772_v15 = vld [vmem:[#allocation7 + $0x130] sm:$0xf0]  ;;  %v3154_v18 = vld [vmem:[#allocation7 + $0xc] sm:$0xf0]  ;;  %v2647_v20 = vor.u32 %v3156_v12, %v2644_v13  ;;  %v2754_v21 = vld [vmem:[#allocation7 + $0x100] sm:$0xf] }
  0x28   :  { %687 = vmatpush.bf16.msra.mxu1 %v2803_v57  ;;  %v3186_v22 = vld [vmem:[#allocation7 + $0x10c] sm:$0xf0]  ;;  %v3152_v23 = vld [vmem:[#allocation7 + $0x4] sm:$0xf]  ;;  %v2775_v24 = vor.u32 %v3188_v14, %v2772_v15  ;;  %v2628_v25 = vld [vmem:[#allocation7 + $0x10] sm:$0xf0]  ;;  %v2627_v31 = vor.u32 %v3154_v18, %v2626_v17 }
  0x29   :  { %736 = vmatpush.bf16.msra.mxu2 %v2679_v58  ;;  %v3184_v26 = vld [vmem:[#allocation7 + $0x104] sm:$0xf]  ;;  %v2756_v27 = vld [vmem:[#allocation7 + $0x110] sm:$0xf0]  ;;  %v2562_v28 = vld [vmem:[#allocation3] sm:$0xf]  ;;  %v2755_v35 = vor.u32 %v3186_v22, %v2754_v21  ;;  %v2631_v36 = vor.u32 %v3152_v23, %v2628_v25 }
  0x2a   :  { %785 = vmatpush.bf16.msra.mxu3 %v2807_v62  ;;  %v3181_v29 = vld [vmem:[#allocation7 + $0xec] sm:$0xf]  ;;  %v2748_v30 = vld [vmem:[#allocation7 + $0xf8] sm:$0xf0]  ;;  %v3137_v32 = vld [vmem:[#allocation3 + $0x4] sm:$0xf0]  ;;  %v2759_v39 = vor.u32 %v3184_v26, %v2756_v27 }
  0x2b   :  { %639 = vmatpush.bf16.msra.mxu0 %v2659_v4  ;;  %v3213_v33 = vld [vmem:[#allocation7 + $0x1ec] sm:$0xf]  ;;  %v2876_v34 = vld [vmem:[#allocation7 + $0x1f8] sm:$0xf0]  ;;  %v3136_v37 = vld [vmem:[#allocation3 + $0x4] sm:$0xf]  ;;  %v2751_v40 = vor.u32 %v3181_v29, %v2748_v30  ;;  %v3518_v44 = vor.u32 %v3137_v32, %v2562_v28 }
  0x2c   :  { %688 = vmatpush.bf16.msra.mxu1 %v2787_v5  ;;  %v2564_v38 = vld [vmem:[#allocation3 + $0x8] sm:$0xf0]  ;;  %v2746_v41 = vld [vmem:[#allocation7 + $0xe8] sm:$0xf]  ;;  %v3183_v42 = vld [vmem:[#allocation7 + $0xf4] sm:$0xf0]  ;;  %v2879_v45 = vor.u32 %v3213_v33, %v2876_v34 }
  0x2d   :  { %737 = vmatpush.bf16.msra.mxu2 %v2663_v6  ;;  %v2874_v43 = vld [vmem:[#allocation7 + $0x1e8] sm:$0xf]  ;;  %v3215_v46 = vld [vmem:[#allocation7 + $0x1f4] sm:$0xf0]  ;;  %v3177_v47 = vld [vmem:[#allocation7 + $0xcc] sm:$0xf]  ;;  %v3520_v49 = vor.u32 %v3136_v37, %v2564_v38  ;;  %v2747_v52 = vor.u32 %v3183_v42, %v2746_v41 }
  0x2e   :  { %786 = vmatpush.bf16.msra.mxu3 %v2791_v10  ;;  %v2732_v48 = vld [vmem:[#allocation7 + $0xd8] sm:$0xf0]  ;;  %v3209_v50 = vld [vmem:[#allocation7 + $0x1cc] sm:$0xf]  ;;  %v2875_v53 = vor.u32 %v3215_v46, %v2874_v43  ;;  %v2730_v55 = vld [vmem:[#allocation7 + $0xc8] sm:$0xf] }
  0x2f   :  { %640 = vmatpush.bf16.msra.mxu0 %v2643_v16  ;;  %v2860_v51 = vld [vmem:[#allocation7 + $0x1d8] sm:$0xf0]  ;;  %v2735_v54 = vor.u32 %v3177_v47, %v2732_v48  ;;  %v3179_v56 = vld [vmem:[#allocation7 + $0xd4] sm:$0xf0]  ;;  %v2858_v58 = vld [vmem:[#allocation7 + $0x1c8] sm:$0xf] }
  0x30   :  { %689 = vmatpush.bf16.msra.mxu1 %v2771_v19  ;;  %v2863_v57 = vor.u32 %v3209_v50, %v2860_v51  ;;  %v3211_v59 = vld [vmem:[#allocation7 + $0x1d4] sm:$0xf0]  ;;  %v2731_v60 = vor.u32 %v3179_v56, %v2730_v55  ;;  %v3173_v61 = vld [vmem:[#allocation7 + $0xac] sm:$0xf]  ;;  %v2716_v62 = vld [vmem:[#allocation7 + $0xb8] sm:$0xf0] }
  0x31   :  { %738 = vmatpush.bf16.msra.mxu2 %v2647_v20  ;;  %v3205_v63 = vld [vmem:[#allocation7 + $0x1ac] sm:$0xf]  ;;  %v2859_v0 = vor.u32 %v3211_v59, %v2858_v58  ;;  %v2719_v1 = vor.u32 %v3173_v61, %v2716_v62  ;;  %v2844_v2 = vld [vmem:[#allocation7 + $0x1b8] sm:$0xf0]  ;;  %v2714_v3 = vld [vmem:[#allocation7 + $0xa8] sm:$0xf] }
  0x32   :  { %787 = vmatpush.bf16.msra.mxu3 %v2775_v24  ;;  %v3175_v4 = vld [vmem:[#allocation7 + $0xb4] sm:$0xf0]  ;;  %v2847_v5 = vor.u32 %v3205_v63, %v2844_v2  ;;  %v2842_v6 = vld [vmem:[#allocation7 + $0x1a8] sm:$0xf]  ;;  %v2570_v10 = vld [vmem:[#allocation3 + $0x10] sm:$0xf] }
  0x33   :  { %641 = vmatpush.bf16.msra.mxu0 %v2627_v31  ;;  %v3207_v7 = vld [vmem:[#allocation7 + $0x1b4] sm:$0xf0]  ;;  %v2715_v8 = vor.u32 %v3175_v4, %v2714_v3  ;;  %v3138_v12 = vld [vmem:[#allocation3 + $0x14] sm:$0xf]  ;;  %v2572_v13 = vld [vmem:[#allocation3 + $0x18] sm:$0xf0] }
  0x34   :  { %690 = vmatpush.bf16.msra.mxu1 %v2755_v35  ;;  %v2843_v9 = vor.u32 %v3207_v7, %v2842_v6  ;;  %v3139_v11 = vld [vmem:[#allocation3 + $0x14] sm:$0xf0]  ;;  %v3528_v15 = vor.u32 %v3138_v12, %v2572_v13  ;;  %v3169_v16 = vld [vmem:[#allocation7 + $0x8c] sm:$0xf]  ;;  %v2700_v17 = vld [vmem:[#allocation7 + $0x98] sm:$0xf0] }
  0x35   :  { %739 = vmatpush.bf16.msra.mxu2 %v2631_v36  ;;  %v3526_v14 = vor.u32 %v3139_v11, %v2570_v10  ;;  %v3201_v18 = vld [vmem:[#allocation7 + $0x18c] sm:$0xf]  ;;  %v2703_v19 = vor.u32 %v3169_v16, %v2700_v17  ;;  %v2828_v20 = vld [vmem:[#allocation7 + $0x198] sm:$0xf0]  ;;  %v2698_v21 = vld [vmem:[#allocation7 + $0x88] sm:$0xf] }
  0x36   :  { %788 = vmatpush.bf16.msra.mxu3 %v2759_v39  ;;  %642 = vmatmul.bf16.vlgmr.msra.gmra.mxu0 %v3518_v44  ;;  %v3171_v22 = vld [vmem:[#allocation7 + $0x94] sm:$0xf0]  ;;  %v2831_v23 = vor.u32 %v3201_v18, %v2828_v20  ;;  %v2826_v25 = vld [vmem:[#allocation7 + $0x188] sm:$0xf]  ;;  %v2578_v28 = vld [vmem:[#allocation3 + $0x20] sm:$0xf] }
  0x37   :  { %691 = vmatmul.bf16.vlgmr.msra.gmra.mxu1 %v3520_v49  ;;  %830 = vmatpush.bf16.msrb.mxu0 %v2747_v52  ;;  %v2699_v24 = vor.u32 %v3171_v22, %v2698_v21  ;;  %v3203_v26 = vld [vmem:[#allocation7 + $0x194] sm:$0xf0]  ;;  %v3141_v29 = vld [vmem:[#allocation3 + $0x24] sm:$0xf0]  ;;  %v3140_v30 = vld [vmem:[#allocation3 + $0x24] sm:$0xf] }
  0x38   :  { %740 = vmatmul.bf16.vlgmr.msra.gmra.mxu2 %v3518_v44  ;;  %879 = vmatpush.bf16.msrb.mxu1 %v2875_v53  ;;  %v2827_v27 = vor.u32 %v3203_v26, %v2826_v25  ;;  %v2580_v31 = vld [vmem:[#allocation3 + $0x28] sm:$0xf0]  ;;  %v3534_v32 = vor.u32 %v3141_v29, %v2578_v28  ;;  %v2684_v35 = vld [vmem:[#allocation7 + $0x78] sm:$0xf0]  ;;  %v2682_v39 = vld [vmem:[#allocation7 + $0x68] sm:$0xf] }
  0x39   :  { %928 = vmatpush.bf16.msrb.mxu2 %v2751_v40  ;;  %789 = vmatmul.bf16.vlgmr.msra.gmra.mxu3 %v3520_v49  ;;  %v3536_v33 = vor.u32 %v3140_v30, %v2580_v31  ;;  %v3165_v34 = vld [vmem:[#allocation7 + $0x6c] sm:$0xf]  ;;  %v2812_v38 = vld [vmem:[#allocation7 + $0x178] sm:$0xf0]  ;;  %v3167_v40 = vld [vmem:[#allocation7 + $0x74] sm:$0xf0] }
  0x3a   :  { %977 = vmatpush.bf16.msrb.mxu3 %v2879_v45  ;;  %v3197_v36 = vld [vmem:[#allocation7 + $0x16c] sm:$0xf]  ;;  %v2687_v37 = vor.u32 %v3165_v34, %v2684_v35  ;;  %v2683_v42 = vor.u32 %v3167_v40, %v2682_v39  ;;  %v2810_v43 = vld [vmem:[#allocation7 + $0x168] sm:$0xf]  ;;  %v3199_v45 = vld [vmem:[#allocation7 + $0x174] sm:$0xf0] }
  0x3b   :  { %831 = vmatpush.bf16.msrb.mxu0 %v2731_v60  ;;  %v2815_v41 = vor.u32 %v3197_v36, %v2812_v38  ;;  %v2811_v46 = vor.u32 %v3199_v45, %v2810_v43  ;;  %v2586_v47 = vld [vmem:[#allocation3 + $0x30] sm:$0xf]  ;;  %v3143_v48 = vld [vmem:[#allocation3 + $0x34] sm:$0xf0]  ;;  %v3142_v50 = vld [vmem:[#allocation3 + $0x34] sm:$0xf] }
  0x3c   :  { %880 = vmatpush.bf16.msrb.mxu1 %v2859_v0  ;;  %v2588_v51 = vld [vmem:[#allocation3 + $0x38] sm:$0xf0]  ;;  %v3542_v52 = vor.u32 %v3143_v48, %v2586_v47  ;;  %v3193_v56 = vld [vmem:[#allocation7 + $0x14c] sm:$0xf]  ;;  %v2666_v59 = vld [vmem:[#allocation7 + $0x48] sm:$0xf] }
  0x3d   :  { %929 = vmatpush.bf16.msrb.mxu2 %v2735_v54  ;;  %v3544_v53 = vor.u32 %v3142_v50, %v2588_v51  ;;  %v3161_v54 = vld [vmem:[#allocation7 + $0x4c] sm:$0xf]  ;;  %v2668_v55 = vld [vmem:[#allocation7 + $0x58] sm:$0xf0]  ;;  %v3163_v60 = vld [vmem:[#allocation7 + $0x54] sm:$0xf0] }
  0x3e   :  { %978 = vmatpush.bf16.msrb.mxu3 %v2863_v57  ;;  %v2671_v57 = vor.u32 %v3161_v54, %v2668_v55  ;;  %v2796_v58 = vld [vmem:[#allocation7 + $0x158] sm:$0xf0]  ;;  %v2667_v62 = vor.u32 %v3163_v60, %v2666_v59  ;;  %v2794_v63 = vld [vmem:[#allocation7 + $0x148] sm:$0xf]  ;;  %v3195_v0 = vld [vmem:[#allocation7 + $0x154] sm:$0xf0] }
  0x3f   :  { %832 = vmatpush.bf16.msrb.mxu0 %v2715_v8  ;;  %v2799_v61 = vor.u32 %v3193_v56, %v2796_v58  ;;  %v2594_v2 = vld [vmem:[#allocation3 + $0x40] sm:$0xf]  ;;  %v3145_v3 = vld [vmem:[#allocation3 + $0x44] sm:$0xf0]  ;;  %v3144_v4 = vld [vmem:[#allocation3 + $0x44] sm:$0xf] }
  0x40   :  { %881 = vmatpush.bf16.msrb.mxu1 %v2843_v9  ;;  %v3550_v6 = vor.u32 %v3145_v3, %v2594_v2  ;;  %v3157_v8 = vld [vmem:[#allocation7 + $0x2c] sm:$0xf]  ;;  %v2652_v9 = vld [vmem:[#allocation7 + $0x38] sm:$0xf0]  ;;  %v2650_v13 = vld [vmem:[#allocation7 + $0x28] sm:$0xf] }
  0x41   :  { %930 = vmatpush.bf16.msrb.mxu2 %v2719_v1  ;;  %v2795_v1 = vor.u32 %v3195_v0, %v2794_v63  ;;  %v3189_v10 = vld [vmem:[#allocation7 + $0x12c] sm:$0xf]  ;;  %v2655_v11 = vor.u32 %v3157_v8, %v2652_v9  ;;  %v2780_v12 = vld [vmem:[#allocation7 + $0x138] sm:$0xf0]  ;;  %v3159_v16 = vld [vmem:[#allocation7 + $0x34] sm:$0xf0] }
  0x42   :  { %979 = vmatpush.bf16.msrb.mxu3 %v2847_v5  ;;  %v2596_v5 = vld [vmem:[#allocation3 + $0x48] sm:$0xf0]  ;;  %v2783_v17 = vor.u32 %v3189_v10, %v2780_v12  ;;  %v2651_v18 = vor.u32 %v3159_v16, %v2650_v13  ;;  %v3191_v20 = vld [vmem:[#allocation7 + $0x134] sm:$0xf0]  ;;  %v2602_v22 = vld [vmem:[#allocation3 + $0x50] sm:$0xf] }
  0x43   :  { %833 = vmatpush.bf16.msrb.mxu0 %v2699_v24  ;;  %v3552_v7 = vor.u32 %v3144_v4, %v2596_v5  ;;  %v3146_v24 = vld [vmem:[#allocation3 + $0x54] sm:$0xf]  ;;  %v2604_v25 = vld [vmem:[#allocation3 + $0x58] sm:$0xf0]  ;;  %v3153_v28 = vld [vmem:[#allocation7 + $0xc] sm:$0xf] }
  0x44   :  { %882 = vmatpush.bf16.msrb.mxu1 %v2827_v27  ;;  %v3560_v27 = vor.u32 %v3146_v24, %v2604_v25  ;;  %v2636_v29 = vld [vmem:[#allocation7 + $0x18] sm:$0xf0]  ;;  %v3185_v30 = vld [vmem:[#allocation7 + $0x10c] sm:$0xf]  ;;  %v2634_v35 = vld [vmem:[#allocation7 + $0x8] sm:$0xf] }
  0x45   :  { %931 = vmatpush.bf16.msrb.mxu2 %v2703_v19  ;;  %v2778_v19 = vld [vmem:[#allocation7 + $0x128] sm:$0xf]  ;;  %v2639_v31 = vor.u32 %v3153_v28, %v2636_v29  ;;  %v2764_v34 = vld [vmem:[#allocation7 + $0x118] sm:$0xf0]  ;;  %v3155_v36 = vld [vmem:[#allocation7 + $0x14] sm:$0xf0] }
  0x46   :  { %647 = vmatmul.bf16.gmra.mxu0 %v3526_v14  ;;  %980 = vmatpush.bf16.msrb.mxu3 %v2831_v23  ;;  %v2779_v21 = vor.u32 %v3191_v20, %v2778_v19  ;;  %v3147_v23 = vld [vmem:[#allocation3 + $0x54] sm:$0xf0]  ;;  %v2635_v38 = vor.u32 %v3155_v36, %v2634_v35  ;;  %v2762_v39 = vld [vmem:[#allocation7 + $0x108] sm:$0xf]  ;;  %v3148_v45 = vld [vmem:[#allocation3 + $0x64] sm:$0xf] }
  0x47   :  { %696 = vmatmul.bf16.gmra.mxu1 %v3528_v15  ;;  %834 = vmatpush.bf16.msrb.mxu0 %v2683_v42  ;;  %v3558_v26 = vor.u32 %v3147_v23, %v2602_v22  ;;  %v3187_v40 = vld [vmem:[#allocation7 + $0x114] sm:$0xf0]  ;;  %v2610_v42 = vld [vmem:[#allocation3 + $0x60] sm:$0xf]  ;;  %v3149_v43 = vld [vmem:[#allocation3 + $0x64] sm:$0xf0] }
  0x48   :  { %745 = vmatmul.bf16.gmra.mxu2 %v3526_v14  ;;  %883 = vmatpush.bf16.msrb.mxu1 %v2811_v46  ;;  %v2612_v46 = vld [vmem:[#allocation3 + $0x68] sm:$0xf0]  ;;  %v3566_v47 = vor.u32 %v3149_v43, %v2610_v42  ;;  %v2618_v50 = vld [vmem:[#allocation3 + $0x70] sm:$0xf]  ;;  %v3151_v51 = vld [vmem:[#allocation3 + $0x74] sm:$0xf0] }
  0x49   :  { %794 = vmatmul.bf16.gmra.mxu3 %v3528_v15  ;;  %932 = vmatpush.bf16.msrb.mxu2 %v2687_v37  ;;  %v2767_v37 = vor.u32 %v3185_v30, %v2764_v34  ;;  %v3568_v48 = vor.u32 %v3148_v45, %v2612_v46  ;;  %v3150_v54 = vld [vmem:[#allocation3 + $0x74] sm:$0xf]  ;;  %v2620_v55 = vld [vmem:[#allocation3 + $0x78] sm:$0xf0]  ;;  %v3574_v56 = vor.u32 %v3151_v51, %v2618_v50  ;;  %v170_v58 = vld [vmem:[#allocation5] sm:$0xff] }
  0x4a   :  { %981 = vmatpush.bf16.msrb.mxu3 %v2815_v41  ;;  %v2763_v41 = vor.u32 %v3187_v40, %v2762_v39  ;;  %v3066_v59 = vld [vmem:[#allocation8 + $0x170] sm:$0xf]  ;;  %v3263_v60 = vld [vmem:[#allocation8 + $0x174] sm:$0xf0]  ;;  %v171_v13 = vld [vmem:[#allocation5 + $0x8] sm:$0xff] }
  0x4b   :  { %835 = vmatpush.bf16.msrb.mxu0 %v2667_v62  ;;  %v2938_v62 = vld [vmem:[#allocation8 + $0x70] sm:$0xf]  ;;  %v3231_v63 = vld [vmem:[#allocation8 + $0x74] sm:$0xf0]  ;;  %v174_v16 = vld [vmem:[#allocation5 + $0x20] sm:$0xff] }
  0x4c   :  { %884 = vmatpush.bf16.msrb.mxu1 %v2795_v1  ;;  %v3130_v0 = vld [vmem:[#allocation8 + $0x1f0] sm:$0xf]  ;;  %v2939_v1 = vor.u32 %v3231_v63, %v2938_v62  ;;  %v3279_v2 = vld [vmem:[#allocation8 + $0x1f4] sm:$0xf0]  ;;  %v175_v28 = vld [vmem:[#allocation5 + $0x28] sm:$0xff] }
  0x4d   :  { %933 = vmatpush.bf16.msrb.mxu2 %v2671_v57  ;;  %v3576_v57 = vor.u32 %v3150_v54, %v2620_v55  ;;  %v3002_v3 = vld [vmem:[#allocation8 + $0xf0] sm:$0xf]  ;;  %v3247_v4 = vld [vmem:[#allocation8 + $0xf4] sm:$0xf0]  ;;  %v3131_v5 = vor.u32 %v3279_v2, %v3130_v0  ;;  %v3058_v29 = vld [vmem:[#allocation8 + $0x160] sm:$0xf] }
  0x4e   :  { %982 = vmatpush.bf16.msrb.mxu3 %v2799_v61  ;;  %v3067_v61 = vor.u32 %v3263_v60, %v3066_v59  ;;  %v3003_v8 = vor.u32 %v3247_v4, %v3002_v3  ;;  %v3229_v35 = vld [vmem:[#allocation8 + $0x64] sm:$0xf0]  ;;  %v3122_v36 = vld [vmem:[#allocation8 + $0x1e0] sm:$0xf] }
  0x4f   :  { %836 = vmatpush.bf16.msrb.mxu0 %v2651_v18  ;;  %v2994_v42 = vld [vmem:[#allocation8 + $0xe0] sm:$0xf]  ;;  %v3245_v43 = vld [vmem:[#allocation8 + $0xe4] sm:$0xf0] }
  0x50   :  { %885 = vmatpush.bf16.msrb.mxu1 %v2779_v21  ;;  %v2995_v55 = vor.u32 %v3245_v43, %v2994_v42  ;;  %v179_v0 = vld [vmem:[#allocation5 + $0x48] sm:$0xff]  ;;  %v182_v3 = vld [vmem:[#allocation5 + $0x60] sm:$0xff] }
  0x51   :  { %934 = vmatpush.bf16.msrb.mxu2 %v2655_v11 }
  0x52   :  { %983 = vmatpush.bf16.msrb.mxu3 %v2783_v17 }
  0x53   :  { %837 = vmatpush.bf16.msrb.mxu0 %v2635_v38 }
  0x54   :  { %886 = vmatpush.bf16.msrb.mxu1 %v2763_v41  ;;  %v3277_v41 = vld [vmem:[#allocation8 + $0x1e4] sm:$0xf0] }
  0x55   :  { %935 = vmatpush.bf16.msrb.mxu2 %v2639_v31  ;;  %v178_v31 = vld [vmem:[#allocation5 + $0x40] sm:$0xff]  ;;  %v3123_v54 = vor.u32 %v3277_v41, %v3122_v36 }
  0x56   :  { %652 = vmatmul.bf16.gmra.mxu0 %v3534_v32  ;;  %984 = vmatpush.bf16.msrb.mxu3 %v2767_v37 }
  0x57   :  { %701 = vmatmul.bf16.gmra.mxu1 %v3536_v33  ;;  %1640 = vmatpush.bf16.msra.mxu0 %v2939_v1 }
  0x58   :  { %750 = vmatmul.bf16.gmra.mxu2 %v3534_v32  ;;  %1689 = vmatpush.bf16.msra.mxu1 %v3003_v8 }
  0x59   :  { %799 = vmatmul.bf16.gmra.mxu3 %v3536_v33  ;;  %1738 = vmatpush.bf16.msra.mxu2 %v3067_v61 }
  0x5a   :  { %1787 = vmatpush.bf16.msra.mxu3 %v3131_v5 }
  0x5c   :  { %1690 = vmatpush.bf16.msra.mxu1 %v2995_v55 }
  0x5e   :  { %1788 = vmatpush.bf16.msra.mxu3 %v3123_v54  ;;  %v190_v54 = vld [vmem:[#allocation5 + $0xa0] sm:$0xff] }
  0x66   :  { %657 = vmatmul.bf16.gmra.mxu0 %v3542_v52 }
  0x67   :  { %706 = vmatmul.bf16.gmra.mxu1 %v3544_v53 }
  0x68   :  { %755 = vmatmul.bf16.gmra.mxu2 %v3542_v52 }
  0x69   :  { %804 = vmatmul.bf16.gmra.mxu3 %v3544_v53 }
  0x76   :  { %662 = vmatmul.bf16.gmra.mxu0 %v3550_v6 }
  0x77   :  { %711 = vmatmul.bf16.gmra.mxu1 %v3552_v7 }
  0x78   :  { %760 = vmatmul.bf16.gmra.mxu2 %v3550_v6 }
  0x79   :  { %809 = vmatmul.bf16.gmra.mxu3 %v3552_v7 }
  0x86   :  { %667 = vmatmul.bf16.gmra.mxu0 %v3558_v26 }
  0x87   :  { %716 = vmatmul.bf16.gmra.mxu1 %v3560_v27 }
  0x88   :  { %765 = vmatmul.bf16.gmra.mxu2 %v3558_v26 }
  0x89   :  { %814 = vmatmul.bf16.gmra.mxu3 %v3560_v27 }
  0x96   :  { %672 = vmatmul.bf16.gmra.mxu0 %v3566_v47 }
  0x97   :  { %721 = vmatmul.bf16.gmra.mxu1 %v3568_v48 }
  0x98   :  { %770 = vmatmul.bf16.gmra.mxu2 %v3566_v47 }
  0x99   :  { %819 = vmatmul.bf16.gmra.mxu3 %v3568_v48 }
  0xa6   :  { %677 = vmatmul.bf16.gmra.mxu0 %v3574_v56 }
  0xa7   :  { %726 = vmatmul.bf16.gmra.mxu1 %v3576_v57 }
  0xa8   :  { %775 = vmatmul.bf16.gmra.mxu2 %v3574_v56 }
  0xa9   :  { %824 = vmatmul.bf16.gmra.mxu3 %v3576_v57 }
  0xb3   :  { %v643_v9 = vpop.f32.mrf.mxu0 }
  0xb4   :  { %v644_v10 = vadd.f32 %v643_v9, %v170_v58  ;;  %v692_v11 = vpop.f32.mrf.mxu1 }
  0xb6   :  { %v693_v12 = vadd.f32 %v692_v11, %v644_v10  ;;  %838 = vmatmul.bf16.vlgmr.msrb.gmra.mxu0 %v3518_v44 }
  0xb7   :  { %887 = vmatmul.bf16.vlgmr.msrb.gmra.mxu1 %v3520_v49 }
  0xb8   :  { %936 = vmatmul.bf16.vlgmr.msrb.gmra.mxu2 %v3518_v44  ;;  %v1090_v24 = vmul.f32 0.2, %v693_v12  ;;  %vm1026_vm0 = vcmp.gt.f32.partialorder %v693_v12, 0.0  ;;  %v3261_v44 = vld [vmem:[#allocation8 + $0x164] sm:$0xf0] }
  0xb9   :  { %985 = vmatmul.bf16.vlgmr.msrb.gmra.mxu3 %v3520_v49  ;;  %v3059_v34 = vor.u32 %v3261_v44, %v3058_v29  ;;  %v2930_v49 = vld [vmem:[#allocation8 + $0x60] sm:$0xf]  ;;  %v3275_v29 = vld [vmem:[#allocation8 + $0x1d4] sm:$0xf0] }
  0xba   :  { %v1154_v37 = vsel %vm1026_vm0, %v693_v12, %v1090_v24  ;;  %v2931_v40 = vor.u32 %v3229_v35, %v2930_v49  ;;  %v3114_v24 = vld [vmem:[#allocation8 + $0x1d0] sm:$0xf] }
  0xbb   :  { %v741_v17 = vpop.f32.mrf.mxu2  ;;  %v645_v20 = vpop.f32.mrf.mxu0  ;;  %1739 = vmatpush.bf16.msra.mxu2 %v3059_v34 }
  0xbc   :  { %v742_v18 = vadd.f32 %v741_v17, %v171_v13  ;;  %v790_v19 = vpop.f32.mrf.mxu3  ;;  %v646_v21 = vadd.f32 %v645_v20, %v174_v16  ;;  %v694_v22 = vpop.f32.mrf.mxu1  ;;  %1641 = vmatpush.bf16.msra.mxu0 %v2931_v40  ;;  %v3259_v20 = vld [vmem:[#allocation8 + $0x154] sm:$0xf0] }
  0xbe   :  { %v791_v23 = vadd.f32 %v790_v19, %v742_v18  ;;  %v695_v25 = vadd.f32 %v694_v22, %v646_v21  ;;  %v183_v18 = vld [vmem:[#allocation5 + $0x68] sm:$0xff]  ;;  %v186_v19 = vld [vmem:[#allocation5 + $0x80] sm:$0xff]  ;;  %v2922_v22 = vld [vmem:[#allocation8 + $0x50] sm:$0xf] }
  0xc0   :  { %vm1030_vm1 = vcmp.gt.f32.partialorder %v695_v25, 0.0  ;;  %v1094_v30 = vmul.f32 0.2, %v695_v25  ;;  %v1091_v60 = vmul.f32 0.2, %v791_v23  ;;  %vm1027_vm2 = vcmp.gt.f32.partialorder %v791_v23, 0.0 }
  0xc2   :  { %v1158_v38 = vsel %vm1030_vm1, %v695_v25, %v1094_v30  ;;  %v1155_v1 = vsel %vm1027_vm2, %v791_v23, %v1091_v60  ;;  %v3227_v23 = vld [vmem:[#allocation8 + $0x54] sm:$0xf0]  ;;  %v2986_v30 = vld [vmem:[#allocation8 + $0xd0] sm:$0xf] }
  0xc3   :  { %v743_v39 = vpop.f32.mrf.mxu2  ;;  %v3586_v45 = vpack.c.bf16 %v1158_v38, %v1154_v37  ;;  %v648_v51 = vpop.f32.mrf.mxu0  ;;  %v3115_v37 = vor.u32 %v3275_v29, %v3114_v24 }
  0xc4   :  { %v744_v46 = vadd.f32 %v743_v39, %v175_v28  ;;  %v792_v50 = vpop.f32.mrf.mxu3  ;;  %v649_v58 = vadd.f32 %v648_v51, %v178_v31  ;;  %v697_v59 = vpop.f32.mrf.mxu1  ;;  %v2923_v28 = vor.u32 %v3227_v23, %v2922_v22  ;;  %v3243_v31 = vld [vmem:[#allocation8 + $0xd4] sm:$0xf0]  ;;  %v187_v51 = vld [vmem:[#allocation5 + $0x88] sm:$0xff] }
  0xc5   :  { %v2987_v38 = vor.u32 %v3243_v31, %v2986_v30  ;;  %1789 = vmatpush.bf16.msra.mxu3 %v3115_v37  ;;  %v198_v37 = vld [vmem:[#allocation5 + $0xe0] sm:$0xff] }
  0xc6   :  { %v793_v61 = vadd.f32 %v792_v50, %v744_v46  ;;  %v698_v62 = vadd.f32 %v697_v59, %v649_v58  ;;  %843 = vmatmul.bf16.gmra.mxu0 %v3526_v14 }
  0xc7   :  { %892 = vmatmul.bf16.gmra.mxu1 %v3528_v15  ;;  %1642 = vmatpush.bf16.msra.mxu0 %v2923_v28 }
  0xc8   :  { %vm1031_vm3 = vcmp.gt.f32.partialorder %v793_v61, 0.0  ;;  %v1095_v63 = vmul.f32 0.2, %v793_v61  ;;  %941 = vmatmul.bf16.gmra.mxu2 %v3526_v14  ;;  %v1098_v16 = vmul.f32 0.2, %v698_v62  ;;  %vm1034_vm4 = vcmp.gt.f32.partialorder %v698_v62, 0.0  ;;  %1691 = vmatpush.bf16.msra.mxu1 %v2987_v38 }
  0xc9   :  { %990 = vmatmul.bf16.gmra.mxu3 %v3528_v15  ;;  %v3050_v14 = vld [vmem:[#allocation8 + $0x150] sm:$0xf] }
  0xca   :  { %v1159_v2 = vsel %vm1031_vm3, %v793_v61, %v1095_v63  ;;  %v3051_v21 = vor.u32 %v3259_v20, %v3050_v14  ;;  %v1162_v44 = vsel %vm1034_vm4, %v698_v62, %v1098_v16  ;;  %v3106_v16 = vld [vmem:[#allocation8 + $0x1c0] sm:$0xf]  ;;  %v3273_v14 = vld [vmem:[#allocation8 + $0x1c4] sm:$0xf0] }
  0xcb   :  { %v3592_v4 = vpack.c.bf16 %v1159_v2, %v1155_v1  ;;  %v746_v5 = vpop.f32.mrf.mxu2  ;;  %v650_v10 = vpop.f32.mrf.mxu0 }
  0xcc   :  { %v747_v8 = vadd.f32 %v746_v5, %v179_v0  ;;  %v795_v9 = vpop.f32.mrf.mxu3  ;;  %v651_v11 = vadd.f32 %v650_v10, %v182_v3  ;;  %v699_v12 = vpop.f32.mrf.mxu1  ;;  %1740 = vmatpush.bf16.msra.mxu2 %v3051_v21  ;;  %v3257_v10 = vld [vmem:[#allocation8 + $0x144] sm:$0xf0] }
  0xce   :  { %v796_v13 = vadd.f32 %v795_v9, %v747_v8  ;;  %v700_v17 = vadd.f32 %v699_v12, %v651_v11  ;;  %v191_v8 = vld [vmem:[#allocation5 + $0xa8] sm:$0xff]  ;;  %v194_v9 = vld [vmem:[#allocation5 + $0xc0] sm:$0xff] }
  0xcf   :  { %v2914_v12 = vld [vmem:[#allocation8 + $0x40] sm:$0xf] }
  0xd0   :  { %vm1038_vm5 = vcmp.gt.f32.partialorder %v700_v17, 0.0  ;;  %v1102_v15 = vmul.f32 0.2, %v700_v17  ;;  %v1099_v42 = vmul.f32 0.2, %v796_v13  ;;  %vm1035_vm6 = vcmp.gt.f32.partialorder %v796_v13, 0.0 }
  0xd2   :  { %v1166_v34 = vsel %vm1038_vm5, %v700_v17, %v1102_v15  ;;  %v1163_v55 = vsel %vm1035_vm6, %v796_v13, %v1099_v42  ;;  %v3225_v13 = vld [vmem:[#allocation8 + $0x44] sm:$0xf0]  ;;  %v2978_v15 = vld [vmem:[#allocation8 + $0xc0] sm:$0xf] }
  0xd3   :  { %v748_v25 = vpop.f32.mrf.mxu2  ;;  %v653_v36 = vpop.f32.mrf.mxu0  ;;  %v3595_v39 = vpack.c.bf16 %v1166_v34, %v1162_v44 }
  0xd4   :  { %v749_v49 = vadd.f32 %v748_v25, %v183_v18  ;;  %v797_v35 = vpop.f32.mrf.mxu3  ;;  %v654_v40 = vadd.f32 %v653_v36, %v186_v19  ;;  %v702_v41 = vpop.f32.mrf.mxu1  ;;  %v2915_v18 = vor.u32 %v3225_v13, %v2914_v12  ;;  %v3241_v19 = vld [vmem:[#allocation8 + $0xc4] sm:$0xf0]  ;;  %v3107_v25 = vor.u32 %v3273_v14, %v3106_v16 }
  0xd5   :  { %v2979_v28 = vor.u32 %v3241_v19, %v2978_v15  ;;  %v195_v36 = vld [vmem:[#allocation5 + $0xc8] sm:$0xff] }
  0xd6   :  { %v798_v43 = vadd.f32 %v797_v35, %v749_v49  ;;  %v703_v46 = vadd.f32 %v702_v41, %v654_v40  ;;  %848 = vmatmul.bf16.gmra.mxu0 %v3534_v32  ;;  %1790 = vmatpush.bf16.msra.mxu3 %v3107_v25  ;;  %v206_v25 = vld [vmem:[#allocation5 + $0x120] sm:$0xff] }
  0xd7   :  { %897 = vmatmul.bf16.gmra.mxu1 %v3536_v33  ;;  %1643 = vmatpush.bf16.msra.mxu0 %v2915_v18 }
  0xd8   :  { %vm1039_vm7 = vcmp.gt.f32.partialorder %v798_v43, 0.0  ;;  %v1103_v50 = vmul.f32 0.2, %v798_v43  ;;  %946 = vmatmul.bf16.gmra.mxu2 %v3534_v32  ;;  %v1106_v3 = vmul.f32 0.2, %v703_v46  ;;  %vm1042_vm8 = vcmp.gt.f32.partialorder %v703_v46, 0.0  ;;  %1692 = vmatpush.bf16.msra.mxu1 %v2979_v28 }
  0xd9   :  { %995 = vmatmul.bf16.gmra.mxu3 %v3536_v33  ;;  %v3042_v32 = vld [vmem:[#allocation8 + $0x140] sm:$0xf] }
  0xda   :  { %v1167_v58 = vsel %vm1039_vm7, %v798_v43, %v1103_v50  ;;  %v3043_v11 = vor.u32 %v3257_v10, %v3042_v32  ;;  %v1170_v20 = vsel %vm1042_vm8, %v703_v46, %v1106_v3  ;;  %v3098_v3 = vld [vmem:[#allocation8 + $0x1b0] sm:$0xf]  ;;  %v3271_v32 = vld [vmem:[#allocation8 + $0x1b4] sm:$0xf0] }
  0xdb   :  { %v751_v59 = vpop.f32.mrf.mxu2  ;;  %v3601_v60 = vpack.c.bf16 %v1167_v58, %v1163_v55  ;;  %v655_v63 = vpop.f32.mrf.mxu0 }
  0xdc   :  { %v752_v61 = vadd.f32 %v751_v59, %v187_v51  ;;  %v800_v62 = vpop.f32.mrf.mxu3  ;;  %v656_v0 = vadd.f32 %v655_v63, %v190_v54  ;;  %v704_v1 = vpop.f32.mrf.mxu1  ;;  %1741 = vmatpush.bf16.msra.mxu2 %v3043_v11  ;;  %v3255_v63 = vld [vmem:[#allocation8 + $0x134] sm:$0xf0] }
  0xde   :  { %v801_v2 = vadd.f32 %v800_v62, %v752_v61  ;;  %v705_v5 = vadd.f32 %v704_v1, %v656_v0  ;;  %v199_v61 = vld [vmem:[#allocation5 + $0xe8] sm:$0xff]  ;;  %v202_v62 = vld [vmem:[#allocation5 + $0x100] sm:$0xff]  ;;  %v2906_v1 = vld [vmem:[#allocation8 + $0x30] sm:$0xf] }
  0xe0   :  { %vm1046_vm9 = vcmp.gt.f32.partialorder %v705_v5, 0.0  ;;  %v1110_v33 = vmul.f32 0.2, %v705_v5  ;;  %v1107_v44 = vmul.f32 0.2, %v801_v2  ;;  %vm1043_vm10 = vcmp.gt.f32.partialorder %v801_v2, 0.0 }
  0xe2   :  { %v1174_v21 = vsel %vm1046_vm9, %v705_v5, %v1110_v33  ;;  %v1171_v38 = vsel %vm1043_vm10, %v801_v2, %v1107_v44  ;;  %v3223_v2 = vld [vmem:[#allocation8 + $0x34] sm:$0xf0]  ;;  %v2970_v33 = vld [vmem:[#allocation8 + $0xb0] sm:$0xf] }
  0xe3   :  { %v753_v17 = vpop.f32.mrf.mxu2  ;;  %v658_v24 = vpop.f32.mrf.mxu0  ;;  %v3604_v29 = vpack.c.bf16 %v1174_v21, %v1170_v20 }
  0xe4   :  { %v754_v22 = vadd.f32 %v753_v17, %v191_v8  ;;  %v802_v23 = vpop.f32.mrf.mxu3  ;;  %v659_v30 = vadd.f32 %v658_v24, %v194_v9  ;;  %v707_v31 = vpop.f32.mrf.mxu1  ;;  %v2907_v8 = vor.u32 %v3223_v2, %v2906_v1  ;;  %v3239_v9 = vld [vmem:[#allocation8 + $0xb4] sm:$0xf0]  ;;  %v3099_v17 = vor.u32 %v3271_v32, %v3098_v3  ;;  %v203_v24 = vld [vmem:[#allocation5 + $0x108] sm:$0xff] }
  0xe5   :  { %v2971_v18 = vor.u32 %v3239_v9, %v2970_v33  ;;  %v211_v9 = vld [vmem:[#allocation5 + $0x148] sm:$0xff] }
  0xe6   :  { %v803_v34 = vadd.f32 %v802_v23, %v754_v22  ;;  %v708_v49 = vadd.f32 %v707_v31, %v659_v30  ;;  %853 = vmatmul.bf16.gmra.mxu0 %v3542_v52  ;;  %1791 = vmatpush.bf16.msra.mxu3 %v3099_v17 }
  0xe7   :  { %902 = vmatmul.bf16.gmra.mxu1 %v3544_v53  ;;  %1644 = vmatpush.bf16.msra.mxu0 %v2907_v8 }
  0xe8   :  { %vm1047_vm11 = vcmp.gt.f32.partialorder %v803_v34, 0.0  ;;  %v1111_v35 = vmul.f32 0.2, %v803_v34  ;;  %951 = vmatmul.bf16.gmra.mxu2 %v3542_v52  ;;  %v1114_v58 = vmul.f32 0.2, %v708_v49  ;;  %vm1050_vm12 = vcmp.gt.f32.partialorder %v708_v49, 0.0  ;;  %1693 = vmatpush.bf16.msra.mxu1 %v2971_v18 }
  0xe9   :  { %1000 = vmatmul.bf16.gmra.mxu3 %v3544_v53  ;;  %v3034_v52 = vld [vmem:[#allocation8 + $0x130] sm:$0xf] }
  0xea   :  { %v1175_v40 = vsel %vm1047_vm11, %v803_v34, %v1111_v35  ;;  %v3035_v0 = vor.u32 %v3255_v63, %v3034_v52  ;;  %v1178_v10 = vsel %vm1050_vm12, %v708_v49, %v1114_v58  ;;  %v2962_v52 = vld [vmem:[#allocation8 + $0xa0] sm:$0xf] }
  0xeb   :  { %v756_v41 = vpop.f32.mrf.mxu2  ;;  %v3610_v42 = vpack.c.bf16 %v1175_v40, %v1171_v38  ;;  %v660_v50 = vpop.f32.mrf.mxu0 }
  0xec   :  { %v757_v43 = vadd.f32 %v756_v41, %v195_v36  ;;  %v805_v46 = vpop.f32.mrf.mxu3  ;;  %v661_v51 = vadd.f32 %v660_v50, %v198_v37  ;;  %v709_v54 = vpop.f32.mrf.mxu1  ;;  %1742 = vmatpush.bf16.msra.mxu2 %v3035_v0 }
  0xee   :  { %v806_v55 = vadd.f32 %v805_v46, %v757_v43  ;;  %v710_v59 = vadd.f32 %v709_v54, %v661_v51  ;;  %v210_v43 = vld [vmem:[#allocation5 + $0x140] sm:$0xff]  ;;  %v3253_v46 = vld [vmem:[#allocation8 + $0x124] sm:$0xf0] }
  0xef   :  { %v2898_v51 = vld [vmem:[#allocation8 + $0x20] sm:$0xf]  ;;  %v3221_v54 = vld [vmem:[#allocation8 + $0x24] sm:$0xf0] }
  0xf0   :  { %vm1054_vm13 = vcmp.gt.f32.partialorder %v710_v59, 0.0  ;;  %v1118_v53 = vmul.f32 0.2, %v710_v59  ;;  %v1115_v20 = vmul.f32 0.2, %v806_v55  ;;  %vm1051_vm14 = vcmp.gt.f32.partialorder %v806_v55, 0.0 }
  0xf2   :  { %v1182_v11 = vsel %vm1054_vm13, %v710_v59, %v1118_v53  ;;  %v1179_v28 = vsel %vm1051_vm14, %v806_v55, %v1115_v20  ;;  %v3090_v55 = vld [vmem:[#allocation8 + $0x1a0] sm:$0xf]  ;;  %v2899_v59 = vor.u32 %v3221_v54, %v2898_v51  ;;  %v3237_v53 = vld [vmem:[#allocation8 + $0xa4] sm:$0xf0] }
  0xf3   :  { %v758_v5 = vpop.f32.mrf.mxu2  ;;  %v663_v16 = vpop.f32.mrf.mxu0  ;;  %v3613_v14 = vpack.c.bf16 %v1182_v11, %v1178_v10  ;;  %v2963_v3 = vor.u32 %v3237_v53, %v2962_v52  ;;  %v214_v10 = vld [vmem:[#allocation5 + $0x160] sm:$0xff]  ;;  %v3233_v54 = vld [vmem:[#allocation8 + $0x84] sm:$0xf0] }
  0xf4   :  { %v759_v12 = vadd.f32 %v758_v5, %v199_v61  ;;  %v807_v13 = vpop.f32.mrf.mxu3  ;;  %v664_v15 = vadd.f32 %v663_v16, %v202_v62  ;;  %v712_v19 = vpop.f32.mrf.mxu1  ;;  %v3269_v61 = vld [vmem:[#allocation8 + $0x1a4] sm:$0xf0]  ;;  %1645 = vmatpush.bf16.msra.mxu0 %v2899_v59 }
  0xf5   :  { %v3091_v2 = vor.u32 %v3269_v61, %v3090_v55  ;;  %1694 = vmatpush.bf16.msra.mxu1 %v2963_v3 }
  0xf6   :  { %v808_v21 = vadd.f32 %v807_v13, %v759_v12  ;;  %v713_v22 = vadd.f32 %v712_v19, %v664_v15  ;;  %858 = vmatmul.bf16.gmra.mxu0 %v3550_v6 }
  0xf7   :  { %907 = vmatmul.bf16.gmra.mxu1 %v3552_v7  ;;  %1792 = vmatpush.bf16.msra.mxu3 %v3091_v2 }
  0xf8   :  { %vm1055_vm15 = vcmp.gt.f32.partialorder %v808_v21, 0.0  ;;  %v1119_v23 = vmul.f32 0.2, %v808_v21  ;;  %956 = vmatmul.bf16.gmra.mxu2 %v3550_v6  ;;  %v1122_v40 = vmul.f32 0.2, %v713_v22  ;;  %vm1058_vm0 = vcmp.gt.f32.partialorder %v713_v22, 0.0 }
  0xf9   :  { %1005 = vmatmul.bf16.gmra.mxu3 %v3552_v7  ;;  %v3026_v6 = vld [vmem:[#allocation8 + $0x120] sm:$0xf] }
  0xfa   :  { %v1183_v30 = vsel %vm1055_vm15, %v808_v21, %v1119_v23  ;;  %v3027_v50 = vor.u32 %v3253_v46, %v3026_v6  ;;  %v1186_v62 = vsel %vm1058_vm0, %v713_v22, %v1122_v40  ;;  %v2890_v21 = vld [vmem:[#allocation8 + $0x10] sm:$0xf]  ;;  %v3219_v22 = vld [vmem:[#allocation8 + $0x14] sm:$0xf0]  ;;  %v2882_v40 = vld [vmem:[#allocation8] sm:$0xf] }
  0xfb   :  { %v761_v31 = vpop.f32.mrf.mxu2  ;;  %v3619_v44 = vpack.c.bf16 %v1183_v30, %v1179_v28  ;;  %v665_v35 = vpop.f32.mrf.mxu0  ;;  %v3018_v23 = vld [vmem:[#allocation8 + $0x110] sm:$0xf]  ;;  %v3251_v28 = vld [vmem:[#allocation8 + $0x114] sm:$0xf0]  ;;  %v2946_v6 = vld [vmem:[#allocation8 + $0x80] sm:$0xf] }
  0xfc   :  { %v762_v34 = vadd.f32 %v761_v31, %v203_v24  ;;  %v810_v49 = vpop.f32.mrf.mxu3  ;;  %v666_v36 = vadd.f32 %v665_v35, %v206_v25  ;;  %v714_v37 = vpop.f32.mrf.mxu1  ;;  %1743 = vmatpush.bf16.msra.mxu2 %v3027_v50  ;;  %v2891_v24 = vor.u32 %v3219_v22, %v2890_v21  ;;  %v218_v25 = vld [vmem:[#allocation5 + $0x180] sm:$0xff]  ;;  %v3019_v30 = vor.u32 %v3251_v28, %v3018_v23  ;;  %v3082_v31 = vld [vmem:[#allocation8 + $0x190] sm:$0xf]  ;;  %v3265_v23 = vld [vmem:[#allocation8 + $0x184] sm:$0xf0] }
  0xfd   :  { %v2947_v52 = vor.u32 %v3233_v54, %v2946_v6  ;;  %v3074_v22 = vld [vmem:[#allocation8 + $0x180] sm:$0xf]  ;;  %v3068_v54 = vld [vmem:[#allocation8 + $0x178] sm:$0xf0] }
  0xfe   :  { %v3621_v38 = vadd.f32 %v810_v49, %v762_v34  ;;  %v715_v41 = vadd.f32 %v714_v37, %v666_v36  ;;  %1646 = vmatpush.bf16.msra.mxu0 %v2891_v24  ;;  %v3267_v34 = vld [vmem:[#allocation8 + $0x194] sm:$0xf0] }
  0xff   :  { %v3235_v49 = vld [vmem:[#allocation8 + $0x94] sm:$0xf0]  ;;  %v3083_v36 = vor.u32 %v3267_v34, %v3082_v31  ;;  %v230_v31 = vld [vmem:[#allocation5 + $0x1e0] sm:$0xff] }
 0x100   :  { %vm1062_vm1 = vcmp.gt.f32.partialorder %v715_v41, 0.0  ;;  %v1126_v7 = vmul.f32 0.2, %v715_v41  ;;  %1744 = vmatpush.bf16.msra.mxu2 %v3019_v30  ;;  %v227_v30 = vld [vmem:[#allocation5 + $0x1c8] sm:$0xff] }
 0x101   :  { %1793 = vmatpush.bf16.msra.mxu3 %v3083_v36 }
 0x102   :  { %v1190_v63 = vsel %vm1062_vm1, %v715_v41, %v1126_v7  ;;  %v3217_v41 = vld [vmem:[#allocation8 + $0x4] sm:$0xf0] }
 0x103   :  { %v3623_v58 = vpop.f32.mrf.mxu2  ;;  %v668_v1 = vpop.f32.mrf.mxu0  ;;  %v3627_v5 = vpack.c.bf16 %v1190_v63, %v1186_v62  ;;  %v2883_v51 = vor.u32 %v3217_v41, %v2882_v40  ;;  %v219_v62 = vld [vmem:[#allocation5 + $0x188] sm:$0xff]  ;;  %v222_v63 = vld [vmem:[#allocation5 + $0x1a0] sm:$0xff] }
 0x104   :  { %v3625_v0 = vpop.f32.mrf.mxu3  ;;  %v669_v8 = vadd.f32 %v668_v1, %v210_v43  ;;  %v717_v32 = vpop.f32.mrf.mxu1 }
 0x105   :  { %1647 = vmatpush.bf16.msra.mxu0 %v2883_v51 }
 0x106   :  { %v718_v33 = vadd.f32 %v717_v32, %v669_v8  ;;  %863 = vmatmul.bf16.gmra.mxu0 %v3558_v26 }
 0x107   :  { %912 = vmatmul.bf16.gmra.mxu1 %v3560_v27 }
 0x108   :  { %961 = vmatmul.bf16.gmra.mxu2 %v3558_v26  ;;  %v1130_v19 = vmul.f32 0.2, %v718_v33  ;;  %vm1066_vm2 = vcmp.gt.f32.partialorder %v718_v33, 0.0  ;;  %v2954_v26 = vld [vmem:[#allocation8 + $0x90] sm:$0xf] }
 0x109   :  { %1010 = vmatmul.bf16.gmra.mxu3 %v3560_v27  ;;  %v2955_v37 = vor.u32 %v3235_v49, %v2954_v26 }
 0x10a   :  { %v1194_v7 = vsel %vm1066_vm2, %v718_v33, %v1130_v19 }
 0x10b   :  { %v766_v11 = vpop.f32.mrf.mxu2  ;;  %v670_v16 = vpop.f32.mrf.mxu0  ;;  %1695 = vmatpush.bf16.msra.mxu1 %v2955_v37 }
 0x10c   :  { %v767_v12 = vadd.f32 %v766_v11, %v211_v9  ;;  %v815_v13 = vpop.f32.mrf.mxu3  ;;  %v671_v17 = vadd.f32 %v670_v16, %v214_v10  ;;  %v719_v18 = vpop.f32.mrf.mxu1  ;;  %v3249_v16 = vld [vmem:[#allocation8 + $0x104] sm:$0xf0] }
 0x10e   :  { %v3633_v15 = vadd.f32 %v815_v13, %v767_v12  ;;  %v720_v20 = vadd.f32 %v719_v18, %v671_v17  ;;  %v226_v13 = vld [vmem:[#allocation5 + $0x1c0] sm:$0xff] }
 0x10f   :  { %1696 = vmatpush.bf16.msra.mxu1 %v2947_v52 }
 0x110   :  { %vm1070_vm3 = vcmp.gt.f32.partialorder %v720_v20, 0.0  ;;  %v1134_v27 = vmul.f32 0.2, %v720_v20 }
 0x112   :  { %v1198_v43 = vsel %vm1070_vm3, %v720_v20, %v1134_v27 }
 0x113   :  { %v3635_v35 = vpop.f32.mrf.mxu2  ;;  %v673_v50 = vpop.f32.mrf.mxu0  ;;  %v3641_v55 = vpack.c.bf16 %v1198_v43, %v1194_v7 }
 0x114   :  { %v3639_v46 = vpop.f32.mrf.mxu3  ;;  %v674_v59 = vadd.f32 %v673_v50, %v218_v25  ;;  %v722_v61 = vpop.f32.mrf.mxu1  ;;  %v3075_v25 = vor.u32 %v3265_v23, %v3074_v22  ;;  %v3262_v50 = vld [vmem:[#allocation8 + $0x174] sm:$0xf] }
 0x116   :  { %v723_v53 = vadd.f32 %v722_v61, %v674_v59  ;;  %868 = vmatmul.bf16.gmra.mxu0 %v3566_v47  ;;  %1794 = vmatpush.bf16.msra.mxu3 %v3075_v25  ;;  %v3230_v59 = vld [vmem:[#allocation8 + $0x74] sm:$0xf] }
 0x117   :  { %917 = vmatmul.bf16.gmra.mxu1 %v3568_v48  ;;  %v3278_v61 = vld [vmem:[#allocation8 + $0x1f4] sm:$0xf] }
 0x118   :  { %966 = vmatmul.bf16.gmra.mxu2 %v3566_v47  ;;  %v1138_v10 = vmul.f32 0.2, %v723_v53  ;;  %vm1074_vm4 = vcmp.gt.f32.partialorder %v723_v53, 0.0  ;;  %v3010_v47 = vld [vmem:[#allocation8 + $0x100] sm:$0xf] }
 0x119   :  { %1015 = vmatmul.bf16.gmra.mxu3 %v3568_v48  ;;  %v3011_v17 = vor.u32 %v3249_v16, %v3010_v47  ;;  %v176_v16 = vld [vmem:[#allocation5 + $0x30] sm:$0xff] }
 0x11a   :  { %v1202_v18 = vsel %vm1074_vm4, %v723_v53, %v1138_v10  ;;  %vm1059_vm4 = vcmp.gt.f32.partialorder %v3621_v38, 0.0 }
 0x11b   :  { %v771_v1 = vpop.f32.mrf.mxu2  ;;  %v675_v8 = vpop.f32.mrf.mxu0  ;;  %1745 = vmatpush.bf16.msra.mxu2 %v3011_v17 }
 0x11c   :  { %v772_v2 = vadd.f32 %v771_v1, %v219_v62  ;;  %v820_v3 = vpop.f32.mrf.mxu3  ;;  %v676_v32 = vadd.f32 %v675_v8, %v222_v63  ;;  %v724_v33 = vpop.f32.mrf.mxu1  ;;  %v3132_v62 = vld [vmem:[#allocation8 + $0x1f8] sm:$0xf0]  ;;  %v3246_v63 = vld [vmem:[#allocation8 + $0xf4] sm:$0xf] }
 0x11d   :  { %v3004_v1 = vld [vmem:[#allocation8 + $0xf8] sm:$0xf0]  ;;  %v3135_v10 = vor.u32 %v3278_v61, %v3132_v62 }
 0x11e   :  { %v3647_v9 = vadd.f32 %v820_v3, %v772_v2  ;;  %v725_v11 = vadd.f32 %v724_v33, %v676_v32  ;;  %v172_v32 = vld [vmem:[#allocation5 + $0x10] sm:$0xff] }
 0x11f   :  { %1983 = vmatpush.bf16.msrb.mxu3 %v3135_v10 }
 0x120   :  { %vm1078_vm5 = vcmp.gt.f32.partialorder %v725_v11, 0.0  ;;  %v1142_v12 = vmul.f32 0.2, %v725_v11 }
 0x122   :  { %v1206_v19 = vsel %vm1078_vm5, %v725_v11, %v1142_v12  ;;  %v3007_v11 = vor.u32 %v3246_v63, %v3004_v1  ;;  %v180_v63 = vld [vmem:[#allocation5 + $0x50] sm:$0xff] }
 0x123   :  { %v3649_v48 = vpop.f32.mrf.mxu2  ;;  %v678_v21 = vpop.f32.mrf.mxu0  ;;  %v3653_v24 = vpack.c.bf16 %v1206_v19, %v1202_v18  ;;  %v173_v18 = vld [vmem:[#allocation5 + $0x18] sm:$0xff] }
 0x124   :  { %v3651_v20 = vpop.f32.mrf.mxu3  ;;  %v679_v26 = vadd.f32 %v678_v21, %v226_v13  ;;  %v727_v27 = vpop.f32.mrf.mxu1  ;;  %1885 = vmatpush.bf16.msrb.mxu1 %v3007_v11 }
 0x126   :  { %v728_v28 = vadd.f32 %v727_v27, %v679_v26  ;;  %873 = vmatmul.bf16.gmra.mxu0 %v3574_v56 }
 0x127   :  { %922 = vmatmul.bf16.gmra.mxu1 %v3576_v57 }
 0x128   :  { %971 = vmatmul.bf16.gmra.mxu2 %v3574_v56  ;;  %v1146_v7 = vmul.f32 0.2, %v728_v28  ;;  %vm1082_vm6 = vcmp.gt.f32.partialorder %v728_v28, 0.0  ;;  %v3071_v56 = vor.u32 %v3262_v50, %v3068_v54 }
 0x129   :  { %1020 = vmatmul.bf16.gmra.mxu3 %v3576_v57  ;;  %v2940_v57 = vld [vmem:[#allocation8 + $0x78] sm:$0xf0] }
 0x12a   :  { %v2943_v53 = vor.u32 %v3230_v59, %v2940_v57  ;;  %v1210_v2 = vsel %vm1082_vm6, %v728_v28, %v1146_v7  ;;  %1934 = vmatpush.bf16.msrb.mxu2 %v3071_v56  ;;  %v3276_v7 = vld [vmem:[#allocation8 + $0x1e4] sm:$0xf]  ;;  %v3124_v56 = vld [vmem:[#allocation8 + $0x1e8] sm:$0xf0] }
 0x12b   :  { %v776_v34 = vpop.f32.mrf.mxu2  ;;  %v680_v37 = vpop.f32.mrf.mxu0  ;;  %v3244_v59 = vld [vmem:[#allocation8 + $0xe4] sm:$0xf]  ;;  %v2996_v57 = vld [vmem:[#allocation8 + $0xe8] sm:$0xf0] }
 0x12c   :  { %v777_v49 = vadd.f32 %v776_v34, %v227_v30  ;;  %v825_v36 = vpop.f32.mrf.mxu3  ;;  %v681_v40 = vadd.f32 %v680_v37, %v230_v31  ;;  %v729_v41 = vpop.f32.mrf.mxu1  ;;  %1836 = vmatpush.bf16.msrb.mxu0 %v2943_v53  ;;  %v3260_v30 = vld [vmem:[#allocation8 + $0x164] sm:$0xf]  ;;  %v177_v34 = vld [vmem:[#allocation5 + $0x38] sm:$0xff] }
 0x12e   :  { %v3659_v6 = vadd.f32 %v825_v36, %v777_v49  ;;  %v730_v43 = vadd.f32 %v729_v41, %v681_v40  ;;  %v3060_v49 = vld [vmem:[#allocation8 + $0x168] sm:$0xf0]  ;;  %v3228_v40 = vld [vmem:[#allocation8 + $0x64] sm:$0xf] }
 0x12f   :  { %v3063_v37 = vor.u32 %v3260_v30, %v3060_v49  ;;  %v2932_v41 = vld [vmem:[#allocation8 + $0x68] sm:$0xf0] }
 0x130   :  { %vm1086_vm7 = vcmp.gt.f32.partialorder %v730_v43, 0.0  ;;  %v1150_v51 = vmul.f32 0.2, %v730_v43  ;;  %v2935_v54 = vor.u32 %v3228_v40, %v2932_v41 }
 0x131   :  { %1935 = vmatpush.bf16.msrb.mxu2 %v3063_v37  ;;  %v3052_v37 = vld [vmem:[#allocation8 + $0x158] sm:$0xf0] }
 0x132   :  { %v1214_v3 = vsel %vm1086_vm7, %v730_v43, %v1150_v51  ;;  %1837 = vmatpush.bf16.msrb.mxu0 %v2935_v54 }
 0x133   :  { %v3661_v52 = vpop.f32.mrf.mxu2  ;;  %v839_v33 = vpop.f32.mrf.mxu0  ;;  %v3665_v12 = vpack.c.bf16 %v1214_v3, %v1210_v2  ;;  %v3127_v2 = vor.u32 %v3276_v7, %v3124_v56  ;;  %v2999_v3 = vor.u32 %v3244_v59, %v2996_v57  ;;  %v3226_v7 = vld [vmem:[#allocation8 + $0x54] sm:$0xf]  ;;  %v3116_v57 = vld [vmem:[#allocation8 + $0x1d8] sm:$0xf0] }
 0x134   :  { %v3663_v8 = vpop.f32.mrf.mxu3  ;;  %v888_v13 = vpop.f32.mrf.mxu1  ;;  %v840_v47 = vadd.f32 %v839_v33, %v172_v32 }
 0x135   :  { %1984 = vmatpush.bf16.msrb.mxu3 %v3127_v2  ;;  %1886 = vmatpush.bf16.msrb.mxu1 %v2999_v3  ;;  %v188_v2 = vld [vmem:[#allocation5 + $0x90] sm:$0xff] }
 0x136   :  { %1648 = vmatmul.bf16.vlgmr.msra.gmra.mxu0 %v3586_v45  ;;  %v889_v17 = vadd.f32 %v888_v13, %v840_v47 }
 0x137   :  { %1697 = vmatmul.bf16.vlgmr.msra.gmra.mxu1 %v3592_v4 }
 0x138   :  { %v1092_v25 = vmul.f32 0.2, %v889_v17  ;;  %vm1028_vm8 = vcmp.gt.f32.partialorder %v889_v17, 0.0 }
 0x13a   :  { %v1156_v43 = vsel %vm1028_vm8, %v889_v17, %v1092_v25  ;;  %v184_v17 = vld [vmem:[#allocation5 + $0x70] sm:$0xff] }
 0x13b   :  { %v937_v19 = vpop.f32.mrf.mxu2  ;;  %v841_v22 = vpop.f32.mrf.mxu0 }
 0x13c   :  { %v986_v21 = vpop.f32.mrf.mxu3  ;;  %v842_v23 = vadd.f32 %v841_v22, %v176_v16  ;;  %v890_v26 = vpop.f32.mrf.mxu1  ;;  %v938_v27 = vadd.f32 %v937_v19, %v173_v18 }
 0x13e   :  { %v891_v28 = vadd.f32 %v890_v26, %v842_v23  ;;  %v987_v36 = vadd.f32 %v986_v21, %v938_v27  ;;  %v181_v21 = vld [vmem:[#allocation5 + $0x58] sm:$0xff] }
 0x140   :  { %vm1032_vm9 = vcmp.gt.f32.partialorder %v891_v28, 0.0  ;;  %v1096_v31 = vmul.f32 0.2, %v891_v28  ;;  %v1093_v33 = vmul.f32 0.2, %v987_v36  ;;  %vm1029_vm10 = vcmp.gt.f32.partialorder %v987_v36, 0.0 }
 0x142   :  { %v1160_v50 = vsel %vm1032_vm9, %v891_v28, %v1096_v31  ;;  %v1157_v47 = vsel %vm1029_vm10, %v987_v36, %v1093_v33  ;;  %v185_v36 = vld [vmem:[#allocation5 + $0x78] sm:$0xff]  ;;  %vm1067_vm10 = vcmp.gt.f32.partialorder %v3633_v15, 0.0 }
 0x143   :  { %v939_v51 = vpop.f32.mrf.mxu2  ;;  %v3669_v61 = vpack.c.bf16 %v1160_v50, %v1156_v43  ;;  %v844_v1 = vpop.f32.mrf.mxu0  ;;  %v2924_v43 = vld [vmem:[#allocation8 + $0x58] sm:$0xf0]  ;;  %v3274_v50 = vld [vmem:[#allocation8 + $0x1d4] sm:$0xf] }
 0x144   :  { %v940_v53 = vadd.f32 %v939_v51, %v177_v34  ;;  %v988_v62 = vpop.f32.mrf.mxu3  ;;  %v893_v32 = vpop.f32.mrf.mxu1  ;;  %v845_v11 = vadd.f32 %v844_v1, %v180_v63  ;;  %v3258_v34 = vld [vmem:[#allocation8 + $0x154] sm:$0xf]  ;;  %v2927_v59 = vor.u32 %v3226_v7, %v2924_v43  ;;  %v3119_v33 = vor.u32 %v3274_v50, %v3116_v57  ;;  %v3044_v43 = vld [vmem:[#allocation8 + $0x148] sm:$0xf0] }
 0x145   :  { %1746 = vmatmul.bf16.vlgmr.msra.gmra.mxu2 %v3669_v61  ;;  %v3055_v41 = vor.u32 %v3258_v34, %v3052_v37 }
 0x146   :  { %v989_v10 = vadd.f32 %v988_v62, %v940_v53  ;;  %1653 = vmatmul.bf16.gmra.mxu0 %v3595_v39  ;;  %v894_v19 = vadd.f32 %v893_v32, %v845_v11  ;;  %v3242_v53 = vld [vmem:[#allocation8 + $0xd4] sm:$0xf]  ;;  %v2988_v62 = vld [vmem:[#allocation8 + $0xd8] sm:$0xf0]  ;;  %1985 = vmatpush.bf16.msrb.mxu3 %v3119_v33  ;;  %v207_v33 = vld [vmem:[#allocation5 + $0x128] sm:$0xff] }
 0x147   :  { %1702 = vmatmul.bf16.gmra.mxu1 %v3601_v60  ;;  %1936 = vmatpush.bf16.msrb.mxu2 %v3055_v41  ;;  %v3256_v41 = vld [vmem:[#allocation8 + $0x144] sm:$0xf] }
 0x148   :  { %vm1033_vm11 = vcmp.gt.f32.partialorder %v989_v10, 0.0  ;;  %v1097_v13 = vmul.f32 0.2, %v989_v10  ;;  %v1100_v30 = vmul.f32 0.2, %v894_v19  ;;  %vm1036_vm12 = vcmp.gt.f32.partialorder %v894_v19, 0.0  ;;  %1838 = vmatpush.bf16.msrb.mxu0 %v2927_v59 }
 0x149   :  { %v3272_v59 = vld [vmem:[#allocation8 + $0x1c4] sm:$0xf] }
 0x14a   :  { %v1161_v16 = vsel %vm1033_vm11, %v989_v10, %v1097_v13  ;;  %v1164_v54 = vsel %vm1036_vm12, %v894_v19, %v1100_v30  ;;  %v2991_v10 = vor.u32 %v3242_v53, %v2988_v62  ;;  %v192_v19 = vld [vmem:[#allocation5 + $0xb0] sm:$0xff] }
 0x14b   :  { %v3674_v18 = vpack.c.bf16 %v1161_v16, %v1157_v47  ;;  %v942_v22 = vpop.f32.mrf.mxu2  ;;  %v846_v26 = vpop.f32.mrf.mxu0 }
 0x14c   :  { %v991_v23 = vpop.f32.mrf.mxu3  ;;  %v847_v27 = vadd.f32 %v846_v26, %v184_v17  ;;  %v895_v25 = vpop.f32.mrf.mxu1  ;;  %v943_v28 = vadd.f32 %v942_v22, %v181_v21  ;;  %1887 = vmatpush.bf16.msrb.mxu1 %v2991_v10  ;;  %v189_v26 = vld [vmem:[#allocation5 + $0x98] sm:$0xff] }
 0x14d   :  { %1795 = vmatmul.bf16.vlgmr.msra.gmra.mxu3 %v3674_v18 }
 0x14e   :  { %v896_v31 = vadd.f32 %v895_v25, %v847_v27  ;;  %v992_v40 = vadd.f32 %v991_v23, %v943_v28 }
 0x150   :  { %vm1040_vm13 = vcmp.gt.f32.partialorder %v896_v31, 0.0  ;;  %v1104_v49 = vmul.f32 0.2, %v896_v31  ;;  %v1101_v13 = vmul.f32 0.2, %v992_v40  ;;  %vm1037_vm14 = vcmp.gt.f32.partialorder %v992_v40, 0.0 }
 0x152   :  { %v1168_v56 = vsel %vm1040_vm13, %v896_v31, %v1104_v49  ;;  %v1165_v21 = vsel %vm1037_vm14, %v992_v40, %v1101_v13  ;;  %v193_v40 = vld [vmem:[#allocation5 + $0xb8] sm:$0xff]  ;;  %v196_v13 = vld [vmem:[#allocation5 + $0xd0] sm:$0xff] }
 0x153   :  { %v944_v51 = vpop.f32.mrf.mxu2  ;;  %v849_v3 = vpop.f32.mrf.mxu0  ;;  %v3677_v32 = vpack.c.bf16 %v1168_v56, %v1164_v54  ;;  %v3224_v54 = vld [vmem:[#allocation8 + $0x44] sm:$0xf]  ;;  %v2916_v56 = vld [vmem:[#allocation8 + $0x48] sm:$0xf0] }
 0x154   :  { %v945_v63 = vadd.f32 %v944_v51, %v185_v36  ;;  %v993_v1 = vpop.f32.mrf.mxu3  ;;  %v898_v11 = vpop.f32.mrf.mxu1  ;;  %v850_v16 = vadd.f32 %v849_v3, %v188_v2  ;;  %v3047_v51 = vor.u32 %v3256_v41, %v3044_v43  ;;  %v3240_v2 = vld [vmem:[#allocation8 + $0xc4] sm:$0xf]  ;;  %v2980_v3 = vld [vmem:[#allocation8 + $0xc8] sm:$0xf0] }
 0x155   :  { %1751 = vmatmul.bf16.gmra.mxu2 %v3677_v32 }
 0x156   :  { %v994_v47 = vadd.f32 %v993_v1, %v945_v63  ;;  %1658 = vmatmul.bf16.gmra.mxu0 %v3604_v29  ;;  %v899_v23 = vadd.f32 %v898_v11, %v850_v16  ;;  %v2919_v63 = vor.u32 %v3224_v54, %v2916_v56  ;;  %v3108_v1 = vld [vmem:[#allocation8 + $0x1c8] sm:$0xf0]  ;;  %1937 = vmatpush.bf16.msrb.mxu2 %v3047_v51 }
 0x157   :  { %1707 = vmatmul.bf16.gmra.mxu1 %v3610_v42 }
 0x158   :  { %vm1041_vm15 = vcmp.gt.f32.partialorder %v994_v47, 0.0  ;;  %v1105_v17 = vmul.f32 0.2, %v994_v47  ;;  %v1108_v36 = vmul.f32 0.2, %v899_v23  ;;  %vm1044_vm0 = vcmp.gt.f32.partialorder %v899_v23, 0.0  ;;  %1839 = vmatpush.bf16.msrb.mxu0 %v2919_v63 }
 0x159   :  { %v3036_v63 = vld [vmem:[#allocation8 + $0x138] sm:$0xf0] }
 0x15a   :  { %v1169_v22 = vsel %vm1041_vm15, %v994_v47, %v1105_v17  ;;  %v1172_v53 = vsel %vm1044_vm0, %v899_v23, %v1108_v36  ;;  %v3111_v17 = vor.u32 %v3272_v59, %v3108_v1  ;;  %v764_v23 = vadd.f32 %v3623_v58, %v207_v33  ;;  %v2908_v33 = vld [vmem:[#allocation8 + $0x38] sm:$0xf0] }
 0x15b   :  { %v947_v27 = vpop.f32.mrf.mxu2  ;;  %v3682_v25 = vpack.c.bf16 %v1169_v22, %v1165_v21  ;;  %v851_v30 = vpop.f32.mrf.mxu0 }
 0x15c   :  { %v996_v28 = vpop.f32.mrf.mxu3  ;;  %v852_v31 = vadd.f32 %v851_v30, %v192_v19  ;;  %v900_v34 = vpop.f32.mrf.mxu1  ;;  %v948_v49 = vadd.f32 %v947_v27, %v189_v26  ;;  %v2983_v19 = vor.u32 %v3240_v2, %v2980_v3  ;;  %1986 = vmatpush.bf16.msrb.mxu3 %v3111_v17  ;;  %v200_v30 = vld [vmem:[#allocation5 + $0xf0] sm:$0xff] }
 0x15d   :  { %1800 = vmatmul.bf16.gmra.mxu3 %v3682_v25  ;;  %v3222_v3 = vld [vmem:[#allocation8 + $0x34] sm:$0xf] }
 0x15e   :  { %v901_v37 = vadd.f32 %v900_v34, %v852_v31  ;;  %v997_v50 = vadd.f32 %v996_v28, %v948_v49  ;;  %1888 = vmatpush.bf16.msrb.mxu1 %v2983_v19  ;;  %v813_v49 = vadd.f32 %v3625_v0, %v764_v23  ;;  %v3254_v0 = vld [vmem:[#allocation8 + $0x134] sm:$0xf]  ;;  %v2911_v19 = vor.u32 %v3222_v3, %v2908_v33  ;;  %v215_v23 = vld [vmem:[#allocation5 + $0x168] sm:$0xff] }
 0x15f   :  { %v3039_v2 = vor.u32 %v3254_v0, %v3036_v63 }
 0x160   :  { %vm1048_vm1 = vcmp.gt.f32.partialorder %v901_v37, 0.0  ;;  %v1112_v7 = vmul.f32 0.2, %v901_v37  ;;  %v1109_v22 = vmul.f32 0.2, %v997_v50  ;;  %vm1045_vm2 = vcmp.gt.f32.partialorder %v997_v50, 0.0  ;;  %1840 = vmatpush.bf16.msrb.mxu0 %v2911_v19 }
 0x161   :  { %v1127_v56 = vmul.f32 0.2, %v813_v49  ;;  %vm1063_vm5 = vcmp.gt.f32.partialorder %v813_v49, 0.0  ;;  %1938 = vmatpush.bf16.msrb.mxu2 %v3039_v2 }
 0x162   :  { %v1176_v62 = vsel %vm1048_vm1, %v901_v37, %v1112_v7  ;;  %v1173_v31 = vsel %vm1045_vm2, %v997_v50, %v1109_v22  ;;  %v197_v37 = vld [vmem:[#allocation5 + $0xd8] sm:$0xff]  ;;  %v3238_v22 = vld [vmem:[#allocation8 + $0xb4] sm:$0xf]  ;;  %vm1075_vm1 = vcmp.gt.f32.partialorder %v3647_v9, 0.0 }
 0x163   :  { %v949_v57 = vpop.f32.mrf.mxu2  ;;  %v854_v47 = vpop.f32.mrf.mxu0  ;;  %v3685_v16 = vpack.c.bf16 %v1176_v62, %v1172_v53  ;;  %v201_v62 = vld [vmem:[#allocation5 + $0xf8] sm:$0xff]  ;;  %v1191_v17 = vsel %vm1063_vm5, %v813_v49, %v1127_v56 }
 0x164   :  { %v950_v10 = vadd.f32 %v949_v57, %v193_v40  ;;  %v998_v11 = vpop.f32.mrf.mxu3  ;;  %v903_v21 = vpop.f32.mrf.mxu1  ;;  %v855_v27 = vadd.f32 %v854_v47, %v196_v13  ;;  %v1123_v57 = vmul.f32 0.2, %v3621_v38 }
 0x165   :  { %1756 = vmatmul.bf16.gmra.mxu2 %v3685_v16 }
 0x166   :  { %v999_v26 = vadd.f32 %v998_v11, %v950_v10  ;;  %1663 = vmatmul.bf16.gmra.mxu0 %v3613_v14  ;;  %v904_v36 = vadd.f32 %v903_v21, %v855_v27  ;;  %v3270_v10 = vld [vmem:[#allocation8 + $0x1b4] sm:$0xf]  ;;  %v3100_v21 = vld [vmem:[#allocation8 + $0x1b8] sm:$0xf0] }
 0x167   :  { %1712 = vmatmul.bf16.gmra.mxu1 %v3619_v44 }
 0x168   :  { %vm1049_vm3 = vcmp.gt.f32.partialorder %v999_v26, 0.0  ;;  %v1113_v28 = vmul.f32 0.2, %v999_v26  ;;  %v1116_v59 = vmul.f32 0.2, %v904_v36  ;;  %vm1052_vm6 = vcmp.gt.f32.partialorder %v904_v36, 0.0 }
 0x16a   :  { %v1177_v34 = vsel %vm1049_vm3, %v999_v26, %v1113_v28  ;;  %v1180_v13 = vsel %vm1052_vm6, %v904_v36, %v1116_v59  ;;  %v2972_v26 = vld [vmem:[#allocation8 + $0xb8] sm:$0xf0]  ;;  %v1187_v36 = vsel %vm1059_vm4, %v3621_v38, %v1123_v57  ;;  %v208_v38 = vld [vmem:[#allocation5 + $0x130] sm:$0xff] }
 0x16b   :  { %v952_v41 = vpop.f32.mrf.mxu2  ;;  %v3692_v7 = vpack.c.bf16 %v1177_v34, %v1173_v31  ;;  %v856_v40 = vpop.f32.mrf.mxu0 }
 0x16c   :  { %v1001_v58 = vpop.f32.mrf.mxu3  ;;  %v857_v43 = vadd.f32 %v856_v40, %v200_v30  ;;  %v905_v51 = vpop.f32.mrf.mxu1  ;;  %v953_v54 = vadd.f32 %v952_v41, %v197_v37  ;;  %v204_v30 = vld [vmem:[#allocation5 + $0x110] sm:$0xff]  ;;  %v3103_v37 = vor.u32 %v3270_v10, %v3100_v21  ;;  %v2975_v41 = vor.u32 %v3238_v22, %v2972_v26  ;;  %v209_v21 = vld [vmem:[#allocation5 + $0x138] sm:$0xff]  ;;  %v3028_v22 = vld [vmem:[#allocation8 + $0x128] sm:$0xf0] }
 0x16d   :  { %1805 = vmatmul.bf16.gmra.mxu3 %v3692_v7 }
 0x16e   :  { %v906_v50 = vadd.f32 %v905_v51, %v857_v43  ;;  %v1002_v1 = vadd.f32 %v1001_v58, %v953_v54  ;;  %v3703_v43 = vpack.c.bf16 %v1191_v17, %v1187_v36  ;;  %1987 = vmatpush.bf16.msrb.mxu3 %v3103_v37  ;;  %v769_v51 = vadd.f32 %v3635_v35, %v215_v23  ;;  %v223_v17 = vld [vmem:[#allocation5 + $0x1a8] sm:$0xff] }
 0x16f   :  { %1889 = vmatpush.bf16.msrb.mxu1 %v2975_v41 }
 0x170   :  { %vm1056_vm7 = vcmp.gt.f32.partialorder %v906_v50, 0.0  ;;  %v1120_v53 = vmul.f32 0.2, %v906_v50  ;;  %v1117_v49 = vmul.f32 0.2, %v1002_v1  ;;  %vm1053_vm8 = vcmp.gt.f32.partialorder %v1002_v1, 0.0 }
 0x171   :  { %v818_v57 = vadd.f32 %v3639_v46, %v769_v51  ;;  %v3252_v46 = vld [vmem:[#allocation8 + $0x124] sm:$0xf]  ;;  %v2964_v51 = vld [vmem:[#allocation8 + $0xa8] sm:$0xf0] }
 0x172   :  { %v1184_v47 = vsel %vm1056_vm7, %v906_v50, %v1120_v53  ;;  %v1181_v59 = vsel %vm1053_vm8, %v1002_v1, %v1117_v49  ;;  %v205_v53 = vld [vmem:[#allocation5 + $0x118] sm:$0xff]  ;;  %v3031_v23 = vor.u32 %v3252_v46, %v3028_v22  ;;  %v3092_v49 = vld [vmem:[#allocation8 + $0x1a8] sm:$0xf0] }
 0x173   :  { %v954_v11 = vpop.f32.mrf.mxu2  ;;  %v859_v31 = vpop.f32.mrf.mxu0  ;;  %v3697_v34 = vpack.c.bf16 %v1184_v47, %v1180_v13  ;;  %v1131_v47 = vmul.f32 0.2, %v3633_v15  ;;  %vm1071_vm11 = vcmp.gt.f32.partialorder %v818_v57, 0.0  ;;  %v213_v46 = vld [vmem:[#allocation5 + $0x158] sm:$0xff] }
 0x174   :  { %v955_v27 = vadd.f32 %v954_v11, %v201_v62  ;;  %v1003_v28 = vpop.f32.mrf.mxu3  ;;  %v908_v58 = vpop.f32.mrf.mxu1  ;;  %v860_v54 = vadd.f32 %v859_v31, %v204_v30  ;;  %v1135_v11 = vmul.f32 0.2, %v818_v57  ;;  %v3268_v30 = vld [vmem:[#allocation8 + $0x1a4] sm:$0xf]  ;;  %1939 = vmatpush.bf16.msrb.mxu2 %v3031_v23 }
 0x175   :  { %1761 = vmatmul.bf16.gmra.mxu2 %v3697_v34 }
 0x176   :  { %v1004_v40 = vadd.f32 %v1003_v28, %v955_v27  ;;  %1668 = vmatmul.bf16.gmra.mxu0 %v3627_v5  ;;  %v909_v0 = vadd.f32 %v908_v58, %v860_v54  ;;  %v3220_v27 = vld [vmem:[#allocation8 + $0x24] sm:$0xf]  ;;  %v2900_v28 = vld [vmem:[#allocation8 + $0x28] sm:$0xf0]  ;;  %v1199_v58 = vsel %vm1071_vm11, %v818_v57, %v1135_v11  ;;  %v774_v57 = vadd.f32 %v3649_v48, %v223_v17 }
 0x177   :  { %1717 = vmatmul.bf16.gmra.mxu1 %v3703_v43  ;;  %v2903_v36 = vor.u32 %v3220_v27, %v2900_v28  ;;  %v1139_v28 = vmul.f32 0.2, %v3647_v9 }
 0x178   :  { %vm1057_vm9 = vcmp.gt.f32.partialorder %v1004_v40, 0.0  ;;  %v1121_v56 = vmul.f32 0.2, %v1004_v40  ;;  %v1124_v13 = vmul.f32 0.2, %v909_v0  ;;  %vm1060_vm12 = vcmp.gt.f32.partialorder %v909_v0, 0.0 }
 0x179   :  { %1841 = vmatpush.bf16.msrb.mxu0 %v2903_v36 }
 0x17a   :  { %v1185_v50 = vsel %vm1057_vm9, %v1004_v40, %v1121_v56  ;;  %v1188_v37 = vsel %vm1060_vm12, %v909_v0, %v1124_v13  ;;  %v3236_v40 = vld [vmem:[#allocation8 + $0xa4] sm:$0xf]  ;;  %v1195_v0 = vsel %vm1067_vm10, %v3633_v15, %v1131_v47  ;;  %v823_v15 = vadd.f32 %v3651_v20, %v774_v57  ;;  %v216_v13 = vld [vmem:[#allocation5 + $0x170] sm:$0xff] }
 0x17b   :  { %v957_v62 = vpop.f32.mrf.mxu2  ;;  %v3709_v63 = vpack.c.bf16 %v1185_v50, %v1181_v59  ;;  %v861_v2 = vpop.f32.mrf.mxu0  ;;  %vm1083_vm9 = vcmp.gt.f32.partialorder %v3659_v6, 0.0 }
 0x17c   :  { %v1006_v35 = vpop.f32.mrf.mxu3  ;;  %v862_v3 = vadd.f32 %v861_v2, %v208_v38  ;;  %v910_v33 = vpop.f32.mrf.mxu1  ;;  %v958_v10 = vadd.f32 %v957_v62, %v205_v53  ;;  %v212_v38 = vld [vmem:[#allocation5 + $0x150] sm:$0xff]  ;;  %v3095_v53 = vor.u32 %v3268_v30, %v3092_v49  ;;  %v2967_v62 = vor.u32 %v3236_v40, %v2964_v51  ;;  %v231_v40 = vld [vmem:[#allocation5 + $0x1e8] sm:$0xff] }
 0x17d   :  { %1810 = vmatmul.bf16.gmra.mxu3 %v3709_v63  ;;  %vm1079_vm0 = vcmp.gt.f32.partialorder %v823_v15, 0.0  ;;  %v1143_v30 = vmul.f32 0.2, %v823_v15  ;;  %v3234_v49 = vld [vmem:[#allocation8 + $0x94] sm:$0xf] }
 0x17e   :  { %v911_v1 = vadd.f32 %v910_v33, %v862_v3  ;;  %v1007_v26 = vadd.f32 %v1006_v35, %v958_v10  ;;  %v3722_v33 = vpack.c.bf16 %v1199_v58, %v1195_v0  ;;  %1988 = vmatpush.bf16.msrb.mxu3 %v3095_v53  ;;  %1890 = vmatpush.bf16.msrb.mxu1 %v2967_v62  ;;  %v3250_v58 = vld [vmem:[#allocation8 + $0x114] sm:$0xf]  ;;  %v2956_v0 = vld [vmem:[#allocation8 + $0x98] sm:$0xf0] }
 0x17f   :  { %v3266_v62 = vld [vmem:[#allocation8 + $0x194] sm:$0xf] }
 0x180   :  { %vm1064_vm13 = vcmp.gt.f32.partialorder %v911_v1, 0.0  ;;  %v1128_v19 = vmul.f32 0.2, %v911_v1  ;;  %v1125_v2 = vmul.f32 0.2, %v1007_v26  ;;  %vm1061_vm14 = vcmp.gt.f32.partialorder %v1007_v26, 0.0 }
 0x182   :  { %v1192_v41 = vsel %vm1064_vm13, %v911_v1, %v1128_v19  ;;  %v1189_v48 = vsel %vm1061_vm14, %v1007_v26, %v1125_v2  ;;  %v3218_v26 = vld [vmem:[#allocation8 + $0x14] sm:$0xf] }
 0x183   :  { %v959_v31 = vpop.f32.mrf.mxu2  ;;  %v864_v59 = vpop.f32.mrf.mxu0  ;;  %v3715_v50 = vpack.c.bf16 %v1192_v41, %v1188_v37  ;;  %v2892_v41 = vld [vmem:[#allocation8 + $0x18] sm:$0xf0] }
 0x184   :  { %v960_v54 = vadd.f32 %v959_v31, %v209_v21  ;;  %v1008_v56 = vpop.f32.mrf.mxu3  ;;  %v913_v35 = vpop.f32.mrf.mxu1  ;;  %v865_v10 = vadd.f32 %v864_v59, %v212_v38  ;;  %v2895_v36 = vor.u32 %v3218_v26, %v2892_v41  ;;  %v1207_v59 = vsel %vm1079_vm0, %v823_v15, %v1143_v30 }
 0x185   :  { %1766 = vmatmul.bf16.gmra.mxu2 %v3715_v50 }
 0x186   :  { %v1009_v3 = vadd.f32 %v1008_v56, %v960_v54  ;;  %1673 = vmatmul.bf16.gmra.mxu0 %v3641_v55  ;;  %v914_v47 = vadd.f32 %v913_v35, %v865_v10  ;;  %v217_v54 = vld [vmem:[#allocation5 + $0x178] sm:$0xff] }
 0x187   :  { %1722 = vmatmul.bf16.gmra.mxu1 %v3722_v33  ;;  %v3020_v56 = vld [vmem:[#allocation8 + $0x118] sm:$0xf0]  ;;  %1842 = vmatpush.bf16.msrb.mxu0 %v2895_v36 }
 0x188   :  { %vm1065_vm15 = vcmp.gt.f32.partialorder %v1009_v3, 0.0  ;;  %v1129_v11 = vmul.f32 0.2, %v1009_v3  ;;  %v1132_v20 = vmul.f32 0.2, %v914_v47  ;;  %vm1068_vm2 = vcmp.gt.f32.partialorder %v914_v47, 0.0 }
 0x189   :  { %v3023_v53 = vor.u32 %v3250_v58, %v3020_v56  ;;  %v3084_v35 = vld [vmem:[#allocation8 + $0x198] sm:$0xf0] }
 0x18a   :  { %v1193_v1 = vsel %vm1065_vm15, %v1009_v3, %v1129_v11  ;;  %v1196_v2 = vsel %vm1068_vm2, %v914_v47, %v1132_v20  ;;  %v3087_v10 = vor.u32 %v3266_v62, %v3084_v35  ;;  %v2959_v11 = vor.u32 %v3234_v49, %v2956_v0  ;;  %v224_v49 = vld [vmem:[#allocation5 + $0x1b0] sm:$0xff] }
 0x18b   :  { %v962_v17 = vpop.f32.mrf.mxu2  ;;  %v3727_v19 = vpack.c.bf16 %v1193_v1, %v1189_v48  ;;  %v866_v22 = vpop.f32.mrf.mxu0  ;;  %v2884_v48 = vld [vmem:[#allocation8 + $0x8] sm:$0xf0]  ;;  %v3232_v1 = vld [vmem:[#allocation8 + $0x84] sm:$0xf]  ;;  %1940 = vmatpush.bf16.msrb.mxu2 %v3023_v53  ;;  %v1203_v47 = vsel %vm1075_vm1, %v3647_v9, %v1139_v28  ;;  %v779_v20 = vadd.f32 %v3661_v52, %v231_v40 }
 0x18c   :  { %v1011_v21 = vpop.f32.mrf.mxu3  ;;  %v867_v23 = vadd.f32 %v866_v22, %v216_v13  ;;  %v915_v27 = vpop.f32.mrf.mxu1  ;;  %v963_v31 = vadd.f32 %v962_v17, %v213_v46  ;;  %v3216_v13 = vld [vmem:[#allocation8 + $0x4] sm:$0xf]  ;;  %v220_v22 = vld [vmem:[#allocation5 + $0x190] sm:$0xff]  ;;  %1989 = vmatpush.bf16.msrb.mxu3 %v3087_v10  ;;  %1891 = vmatpush.bf16.msrb.mxu1 %v2959_v11  ;;  %v3741_v41 = vpack.c.bf16 %v1207_v59, %v1203_v47  ;;  %v3012_v28 = vld [vmem:[#allocation8 + $0x108] sm:$0xf0] }
 0x18d   :  { %1815 = vmatmul.bf16.gmra.mxu3 %v3727_v19  ;;  %v2887_v15 = vor.u32 %v3216_v13, %v2884_v48  ;;  %v3248_v9 = vld [vmem:[#allocation8 + $0x104] sm:$0xf]  ;;  %v828_v52 = vadd.f32 %v3663_v8, %v779_v20  ;;  %v221_v59 = vld [vmem:[#allocation5 + $0x198] sm:$0xff]  ;;  %v228_v20 = vld [vmem:[#allocation5 + $0x1d0] sm:$0xff] }
 0x18e   :  { %v916_v37 = vadd.f32 %v915_v27, %v867_v23  ;;  %v1012_v38 = vadd.f32 %v1011_v21, %v963_v31  ;;  %v2948_v27 = vld [vmem:[#allocation8 + $0x88] sm:$0xf0]  ;;  %v3264_v13 = vld [vmem:[#allocation8 + $0x184] sm:$0xf] }
 0x18f   :  { %v2951_v31 = vor.u32 %v3232_v1, %v2948_v27  ;;  %1843 = vmatpush.bf16.msrb.mxu0 %v2887_v15  ;;  %vm1087_vm6 = vcmp.gt.f32.partialorder %v828_v52, 0.0  ;;  %v1147_v1 = vmul.f32 0.2, %v3659_v6 }
 0x190   :  { %vm1072_vm3 = vcmp.gt.f32.partialorder %v916_v37, 0.0  ;;  %v1136_v51 = vmul.f32 0.2, %v916_v37  ;;  %vm1069_vm4 = vcmp.gt.f32.partialorder %v1012_v38, 0.0 }
 0x191   :  { %1892 = vmatpush.bf16.msrb.mxu1 %v2951_v31 }
 0x192   :  { %v1200_v3 = vsel %vm1072_vm3, %v916_v37, %v1136_v51  ;;  %v1133_v37 = vmul.f32 0.2, %v1012_v38 }
 0x193   :  { %v964_v57 = vpop.f32.mrf.mxu2  ;;  %v869_v21 = vpop.f32.mrf.mxu0  ;;  %v3734_v23 = vpack.c.bf16 %v1200_v3, %v1196_v2  ;;  %v1151_v3 = vmul.f32 0.2, %v828_v52 }
 0x194   :  { %v965_v46 = vadd.f32 %v964_v57, %v217_v54  ;;  %v1013_v17 = vpop.f32.mrf.mxu3  ;;  %v918_v30 = vpop.f32.mrf.mxu1  ;;  %v870_v58 = vadd.f32 %v869_v21, %v220_v22  ;;  %v1197_v40 = vsel %vm1069_vm4, %v1012_v38, %v1133_v37  ;;  %v3015_v54 = vor.u32 %v3248_v9, %v3012_v28  ;;  %v3076_v38 = vld [vmem:[#allocation8 + $0x188] sm:$0xf0] }
 0x195   :  { %1771 = vmatmul.bf16.gmra.mxu2 %v3734_v23  ;;  %v3079_v48 = vor.u32 %v3264_v13, %v3076_v38 }
 0x196   :  { %v1014_v26 = vadd.f32 %v1013_v17, %v965_v46  ;;  %1678 = vmatmul.bf16.gmra.mxu0 %v3653_v24  ;;  %v919_v56 = vadd.f32 %v918_v30, %v870_v58  ;;  %1941 = vmatpush.bf16.msrb.mxu2 %v3015_v54  ;;  %v225_v17 = vld [vmem:[#allocation5 + $0x1b8] sm:$0xff]  ;;  %v1215_v30 = vsel %vm1087_vm6, %v828_v52, %v1151_v3 }
 0x197   :  { %1727 = vmatmul.bf16.gmra.mxu1 %v3741_v41  ;;  %1990 = vmatpush.bf16.msrb.mxu3 %v3079_v48  ;;  %v233_v48 = vld [vmem:[#allocation5 + $0x1f8] sm:$0xff] }
 0x198   :  { %vm1073_vm5 = vcmp.gt.f32.partialorder %v1014_v26, 0.0  ;;  %v1137_v36 = vmul.f32 0.2, %v1014_v26  ;;  %v1140_v11 = vmul.f32 0.2, %v919_v56  ;;  %vm1076_vm7 = vcmp.gt.f32.partialorder %v919_v56, 0.0 }
 0x19a   :  { %v1201_v51 = vsel %vm1073_vm5, %v1014_v26, %v1137_v36  ;;  %v1204_v15 = vsel %vm1076_vm7, %v919_v56, %v1140_v11  ;;  %v1211_v36 = vsel %vm1083_vm9, %v3659_v6, %v1147_v1  ;;  %v3765_v11 = vld [vmem:[%s4051_s4] sm:$0x3] }
 0x19b   :  { %v967_v53 = vpop.f32.mrf.mxu2  ;;  %v3746_v62 = vpack.c.bf16 %v1201_v51, %v1197_v40  ;;  %v871_v0 = vpop.f32.mrf.mxu0  ;;  %v232_v51 = vld [vmem:[#allocation5 + $0x1f0] sm:$0xff]  ;;  %v3768_v1 = vperm.slane %v3765_v11, 0 }
 0x19c   :  { %v1016_v35 = vpop.f32.mrf.mxu3  ;;  %v872_v57 = vadd.f32 %v871_v0, %v224_v49  ;;  %v920_v2 = vpop.f32.mrf.mxu1  ;;  %v968_v10 = vadd.f32 %v967_v53, %v221_v59  ;;  %v3755_v49 = vpack.c.bf16 %v1215_v30, %v1211_v36  ;;  %v229_v53 = vld [vmem:[#allocation5 + $0x1d8] sm:$0xff] }
 0x19d   :  { %1820 = vmatmul.bf16.gmra.mxu3 %v3746_v62 }
 0x19e   :  { %v921_v8 = vadd.f32 %v920_v2, %v872_v57  ;;  %v1017_v22 = vadd.f32 %v1016_v35, %v968_v10 }
 0x1a0   :  { %vm1080_vm8 = vcmp.gt.f32.partialorder %v921_v8, 0.0  ;;  %v1144_v46 = vmul.f32 0.2, %v921_v8  ;;  %v1141_v9 = vmul.f32 0.2, %v1017_v22  ;;  %vm1077_vm10 = vcmp.gt.f32.partialorder %v1017_v22, 0.0 }
 0x1a2   :  { %v1208_v27 = vsel %vm1080_vm8, %v921_v8, %v1144_v46  ;;  %v1205_v54 = vsel %vm1077_vm10, %v1017_v22, %v1141_v9 }
 0x1a3   :  { %v969_v21 = vpop.f32.mrf.mxu2  ;;  %v874_v37 = vpop.f32.mrf.mxu0  ;;  %v3751_v26 = vpack.c.bf16 %v1208_v27, %v1204_v15 }
 0x1a4   :  { %v970_v47 = vadd.f32 %v969_v21, %v225_v17  ;;  %v1018_v31 = vpop.f32.mrf.mxu3  ;;  %v923_v58 = vpop.f32.mrf.mxu1  ;;  %v875_v40 = vadd.f32 %v874_v37, %v228_v20 }
 0x1a5   :  { %1776 = vmatmul.bf16.gmra.mxu2 %v3751_v26 }
 0x1a6   :  { %v1019_v28 = vadd.f32 %v1018_v31, %v970_v47  ;;  %1683 = vmatmul.bf16.gmra.mxu0 %v3665_v12  ;;  %v924_v59 = vadd.f32 %v923_v58, %v875_v40 }
 0x1a7   :  { %1732 = vmatmul.bf16.gmra.mxu1 %v3755_v49 }
 0x1a8   :  { %vm1081_vm11 = vcmp.gt.f32.partialorder %v1019_v28, 0.0  ;;  %v1145_v52 = vmul.f32 0.2, %v1019_v28  ;;  %v1148_v8 = vmul.f32 0.2, %v924_v59  ;;  %vm1084_vm12 = vcmp.gt.f32.partialorder %v924_v59, 0.0 }
 0x1aa   :  { %v1209_v56 = vsel %vm1081_vm11, %v1019_v28, %v1145_v52  ;;  %v1212_v22 = vsel %vm1084_vm12, %v924_v59, %v1148_v8 }
 0x1ab   :  { %v972_v6 = vpop.f32.mrf.mxu2  ;;  %v3759_v35 = vpack.c.bf16 %v1209_v56, %v1205_v54  ;;  %v876_v57 = vpop.f32.mrf.mxu0 }
 0x1ac   :  { %v1021_v0 = vpop.f32.mrf.mxu3  ;;  %v877_v2 = vadd.f32 %v876_v57, %v232_v51  ;;  %v925_v3 = vpop.f32.mrf.mxu1  ;;  %v973_v10 = vadd.f32 %v972_v6, %v229_v53 }
 0x1ad   :  { %1825 = vmatmul.bf16.gmra.mxu3 %v3759_v35 }
 0x1ae   :  { %v926_v13 = vadd.f32 %v925_v3, %v877_v2  ;;  %v1022_v46 = vadd.f32 %v1021_v0, %v973_v10 }
 0x1b0   :  { %vm1088_vm13 = vcmp.gt.f32.partialorder %v926_v13, 0.0  ;;  %v1152_v38 = vmul.f32 0.2, %v926_v13  ;;  %v1149_v37 = vmul.f32 0.2, %v1022_v46  ;;  %vm1085_vm14 = vcmp.gt.f32.partialorder %v1022_v46, 0.0 }
 0x1b2   :  { %v1216_v21 = vsel %vm1088_vm13, %v926_v13, %v1152_v38  ;;  %v1213_v28 = vsel %vm1085_vm14, %v1022_v46, %v1149_v37 }
 0x1b3   :  { %v974_v17 = vpop.f32.mrf.mxu2  ;;  %v1649_v27 = vpop.f32.mrf.mxu0  ;;  %v3770_v30 = vpack.c.bf16 %v1216_v21, %v1212_v22 }
 0x1b4   :  { %v975_v15 = vadd.f32 %v974_v17, %v233_v48  ;;  %v1023_v47 = vpop.f32.mrf.mxu3  ;;  %v1650_v31 = vadd.f32 %v1649_v27, %v3768_v1  ;;  %v1698_v20 = vpop.f32.mrf.mxu1 }
 0x1b5   :  { %1781 = vmatmul.bf16.gmra.mxu2 %v3770_v30 }
 0x1b6   :  { %v1024_v58 = vadd.f32 %v1023_v47, %v975_v15  ;;  %v1699_v36 = vadd.f32 %v1698_v20, %v1650_v31  ;;  %1844 = vmatmul.bf16.vlgmr.msrb.gmra.mxu0 %v3586_v45 }
 0x1b7   :  { %1893 = vmatmul.bf16.vlgmr.msrb.gmra.mxu1 %v3592_v4 }
 0x1b8   :  { %vm1089_vm15 = vcmp.gt.f32.partialorder %v1024_v58, 0.0  ;;  %v1153_v9 = vmul.f32 0.2, %v1024_v58 }
 0x1ba   :  { %v1217_v40 = vsel %vm1089_vm15, %v1024_v58, %v1153_v9 }
 0x1bb   :  { %v3776_v52 = vpack.c.bf16 %v1217_v40, %v1213_v28  ;;  %v1651_v51 = vpop.f32.mrf.mxu0 }
 0x1bc   :  { %v1652_v54 = vadd.f32 %v1651_v51, %v3768_v1  ;;  %v1700_v56 = vpop.f32.mrf.mxu1 }
 0x1bd   :  { %1830 = vmatmul.bf16.gmra.mxu3 %v3776_v52 }
 0x1be   :  { %v1701_v59 = vadd.f32 %v1700_v56, %v1652_v54 }
 0x1c3   :  { %v1654_v53 = vpop.f32.mrf.mxu0 }
 0x1c4   :  { %v1655_v6 = vadd.f32 %v1654_v53, %v3768_v1  ;;  %v1703_v0 = vpop.f32.mrf.mxu1 }
 0x1c5   :  { %1942 = vmatmul.bf16.vlgmr.msrb.gmra.mxu2 %v3669_v61 }
 0x1c6   :  { %v1704_v45 = vadd.f32 %v1703_v0, %v1655_v6  ;;  %1849 = vmatmul.bf16.gmra.mxu0 %v3595_v39 }
 0x1c7   :  { %1898 = vmatmul.bf16.gmra.mxu1 %v3601_v60 }
 0x1c8   :  { %v1747_v4 = vpop.f32.mrf.mxu2 }
 0x1c9   :  { %v1748_v57 = vadd.f32 %v1747_v4, %v1699_v36 }
 0x1cb   :  { %v1656_v2 = vpop.f32.mrf.mxu0 }
 0x1cc   :  { %v1657_v3 = vadd.f32 %v1656_v2, %v3768_v1  ;;  %v1705_v10 = vpop.f32.mrf.mxu1 }
 0x1cd   :  { %1991 = vmatmul.bf16.vlgmr.msrb.gmra.mxu3 %v3674_v18 }
 0x1ce   :  { %v1706_v8 = vadd.f32 %v1705_v10, %v1657_v3 }
 0x1d0   :  { %v1796_v13 = vpop.f32.mrf.mxu3  ;;  %v1749_v48 = vpop.f32.mrf.mxu2 }
 0x1d1   :  { %v3786_v38 = vadd.f32 %v1796_v13, %v1748_v57  ;;  %v1750_v46 = vadd.f32 %v1749_v48, %v1701_v59 }
 0x1d3   :  { %v1659_v61 = vpop.f32.mrf.mxu0  ;;  %vm2032_vm0 = vcmp.gt.f32.partialorder %v3786_v38, 0.0 }
 0x1d4   :  { %v1660_v17 = vadd.f32 %v1659_v61, %v3768_v1  ;;  %v1708_v39 = vpop.f32.mrf.mxu1 }
 0x1d5   :  { %1947 = vmatmul.bf16.gmra.mxu2 %v3677_v32 }
 0x1d6   :  { %v1709_v60 = vadd.f32 %v1708_v39, %v1660_v17  ;;  %1854 = vmatmul.bf16.gmra.mxu0 %v3604_v29 }
 0x1d7   :  { %1903 = vmatmul.bf16.gmra.mxu1 %v3610_v42 }
 0x1d8   :  { %v1798_v22 = vpop.f32.mrf.mxu3  ;;  %v1752_v18 = vpop.f32.mrf.mxu2 }
 0x1d9   :  { %v3792_v21 = vadd.f32 %v1798_v22, %v1750_v46  ;;  %v1753_v15 = vadd.f32 %v1752_v18, %v1704_v45 }
 0x1db   :  { %v1661_v27 = vpop.f32.mrf.mxu0  ;;  %vm2034_vm2 = vcmp.gt.f32.partialorder %v3792_v21, 0.0 }
 0x1dc   :  { %v1662_v47 = vadd.f32 %v1661_v27, %v3768_v1  ;;  %v1710_v31 = vpop.f32.mrf.mxu1 }
 0x1dd   :  { %1996 = vmatmul.bf16.gmra.mxu3 %v3682_v25 }
 0x1de   :  { %v1711_v20 = vadd.f32 %v1710_v31, %v1662_v47 }
 0x1e0   :  { %v1801_v37 = vpop.f32.mrf.mxu3  ;;  %v1754_v32 = vpop.f32.mrf.mxu2 }
 0x1e1   :  { %v3796_v58 = vadd.f32 %v1801_v37, %v1753_v15  ;;  %v1755_v36 = vadd.f32 %v1754_v32, %v1706_v8 }
 0x1e3   :  { %v1664_v29 = vpop.f32.mrf.mxu0  ;;  %vm2036_vm4 = vcmp.gt.f32.partialorder %v3796_v58, 0.0 }
 0x1e4   :  { %v1665_v9 = vadd.f32 %v1664_v29, %v3768_v1  ;;  %v1713_v42 = vpop.f32.mrf.mxu1 }
 0x1e5   :  { %1952 = vmatmul.bf16.gmra.mxu2 %v3685_v16 }
 0x1e6   :  { %v1714_v28 = vadd.f32 %v1713_v42, %v1665_v9  ;;  %1859 = vmatmul.bf16.gmra.mxu0 %v3613_v14 }
 0x1e7   :  { %1908 = vmatmul.bf16.gmra.mxu1 %v3619_v44 }
 0x1e8   :  { %v1803_v40 = vpop.f32.mrf.mxu3  ;;  %v1757_v25 = vpop.f32.mrf.mxu2 }
 0x1e9   :  { %v3802_v51 = vadd.f32 %v1803_v40, %v1755_v36  ;;  %v1758_v54 = vadd.f32 %v1757_v25, %v1709_v60 }
 0x1eb   :  { %v1666_v56 = vpop.f32.mrf.mxu0  ;;  %vm2038_vm6 = vcmp.gt.f32.partialorder %v3802_v51, 0.0 }
 0x1ec   :  { %v1667_v59 = vadd.f32 %v1666_v56, %v3768_v1  ;;  %v1715_v53 = vpop.f32.mrf.mxu1 }
 0x1ed   :  { %2001 = vmatmul.bf16.gmra.mxu3 %v3692_v7 }
 0x1ee   :  { %v1716_v6 = vadd.f32 %v1715_v53, %v1667_v59 }
 0x1f0   :  { %v1806_v0 = vpop.f32.mrf.mxu3  ;;  %v1759_v16 = vpop.f32.mrf.mxu2 }
 0x1f1   :  { %v3806_v45 = vadd.f32 %v1806_v0, %v1758_v54  ;;  %v1760_v4 = vadd.f32 %v1759_v16, %v1711_v20 }
 0x1f3   :  { %v1669_v14 = vpop.f32.mrf.mxu0  ;;  %vm2040_vm8 = vcmp.gt.f32.partialorder %v3806_v45, 0.0 }
 0x1f4   :  { %v1670_v57 = vadd.f32 %v1669_v14, %v3768_v1  ;;  %v1718_v44 = vpop.f32.mrf.mxu1 }
 0x1f5   :  { %1957 = vmatmul.bf16.gmra.mxu2 %v3697_v34 }
 0x1f6   :  { %v1719_v2 = vadd.f32 %v1718_v44, %v1670_v57  ;;  %1864 = vmatmul.bf16.gmra.mxu0 %v3627_v5 }
 0x1f7   :  { %1913 = vmatmul.bf16.gmra.mxu1 %v3703_v43 }
 0x1f8   :  { %v1808_v3 = vpop.f32.mrf.mxu3  ;;  %v1762_v7 = vpop.f32.mrf.mxu2 }
 0x1f9   :  { %v3812_v10 = vadd.f32 %v1808_v3, %v1760_v4  ;;  %v1763_v8 = vadd.f32 %v1762_v7, %v1714_v28 }
 0x1fb   :  { %v1671_v13 = vpop.f32.mrf.mxu0  ;;  %vm2042_vm10 = vcmp.gt.f32.partialorder %v3812_v10, 0.0 }
 0x1fc   :  { %v1672_v48 = vadd.f32 %v1671_v13, %v3768_v1  ;;  %v1720_v46 = vpop.f32.mrf.mxu1 }
 0x1fd   :  { %2006 = vmatmul.bf16.gmra.mxu3 %v3709_v63 }
 0x1fe   :  { %v1721_v61 = vadd.f32 %v1720_v46, %v1672_v48 }
 0x200   :  { %v1811_v17 = vpop.f32.mrf.mxu3  ;;  %v1764_v34 = vpop.f32.mrf.mxu2 }
 0x201   :  { %v3816_v39 = vadd.f32 %v1811_v17, %v1763_v8  ;;  %v1765_v60 = vadd.f32 %v1764_v34, %v1716_v6 }
 0x203   :  { %v1674_v5 = vpop.f32.mrf.mxu0  ;;  %vm2044_vm12 = vcmp.gt.f32.partialorder %v3816_v39, 0.0 }
 0x204   :  { %v1675_v22 = vadd.f32 %v1674_v5, %v3768_v1  ;;  %v1723_v43 = vpop.f32.mrf.mxu1 }
 0x205   :  { %1962 = vmatmul.bf16.gmra.mxu2 %v3715_v50 }
 0x206   :  { %v1724_v18 = vadd.f32 %v1723_v43, %v1675_v22  ;;  %1869 = vmatmul.bf16.gmra.mxu0 %v3641_v55 }
 0x207   :  { %1918 = vmatmul.bf16.gmra.mxu1 %v3722_v33 }
 0x208   :  { %v1813_v15 = vpop.f32.mrf.mxu3  ;;  %v1767_v63 = vpop.f32.mrf.mxu2 }
 0x209   :  { %v3822_v27 = vadd.f32 %v1813_v15, %v1765_v60  ;;  %v1768_v47 = vadd.f32 %v1767_v63, %v1719_v2 }
 0x20b   :  { %v1676_v31 = vpop.f32.mrf.mxu0  ;;  %vm2046_vm14 = vcmp.gt.f32.partialorder %v3822_v27, 0.0 }
 0x20c   :  { %v1677_v20 = vadd.f32 %v1676_v31, %v3768_v1  ;;  %v1725_v37 = vpop.f32.mrf.mxu1  ;;  %v3855_v31 = vperm.slane %v3765_v11, 1 }
 0x20d   :  { %2011 = vmatmul.bf16.gmra.mxu3 %v3727_v19 }
 0x20e   :  { %v1726_v32 = vadd.f32 %v1725_v37, %v1677_v20 }
 0x210   :  { %v1816_v36 = vpop.f32.mrf.mxu3  ;;  %v1769_v50 = vpop.f32.mrf.mxu2 }
 0x211   :  { %v3826_v29 = vadd.f32 %v1816_v36, %v1768_v47  ;;  %v1770_v9 = vadd.f32 %v1769_v50, %v1721_v61 }
 0x213   :  { %v1679_v55 = vpop.f32.mrf.mxu0 }
 0x214   :  { %v1680_v42 = vadd.f32 %v1679_v55, %v3768_v1  ;;  %v1728_v33 = vpop.f32.mrf.mxu1 }
 0x215   :  { %1967 = vmatmul.bf16.gmra.mxu2 %v3734_v23 }
 0x216   :  { %v1729_v28 = vadd.f32 %v1728_v33, %v1680_v42  ;;  %1874 = vmatmul.bf16.gmra.mxu0 %v3653_v24  ;;  %v2128_v33 = vld [vmem:[%s4052_s5] sm:$0x3] }
 0x217   :  { %1923 = vmatmul.bf16.gmra.mxu1 %v3741_v41 }
 0x218   :  { %v1818_v40 = vpop.f32.mrf.mxu3  ;;  %v1772_v19 = vpop.f32.mrf.mxu2 }
 0x219   :  { %v3832_v25 = vadd.f32 %v1818_v40, %v1770_v9  ;;  %v1773_v54 = vadd.f32 %v1772_v19, %v1724_v18 }
 0x21b   :  { %v1681_v56 = vpop.f32.mrf.mxu0 }
 0x21c   :  { %v1682_v59 = vadd.f32 %v1681_v56, %v3768_v1  ;;  %v1730_v53 = vpop.f32.mrf.mxu1  ;;  %v3868_v56 = vperm.slane %v2128_v33, 1 }
 0x21d   :  { %2016 = vmatmul.bf16.gmra.mxu3 %v3746_v62 }
 0x21e   :  { %v1731_v6 = vadd.f32 %v1730_v53, %v1682_v59 }
 0x220   :  { %v1821_v0 = vpop.f32.mrf.mxu3  ;;  %v1774_v23 = vpop.f32.mrf.mxu2 }
 0x221   :  { %v3836_v16 = vadd.f32 %v1821_v0, %v1773_v54  ;;  %v1775_v4 = vadd.f32 %v1774_v23, %v1726_v32  ;;  %v3866_v54 = vperm.slane %v2128_v33, 0 }
 0x223   :  { %v1684_v24 = vpop.f32.mrf.mxu0 }
 0x224   :  { %v1685_v14 = vadd.f32 %v1684_v24, %v3768_v1  ;;  %v1733_v41 = vpop.f32.mrf.mxu1 }
 0x225   :  { %1972 = vmatmul.bf16.gmra.mxu2 %v3751_v26 }
 0x226   :  { %v1734_v57 = vadd.f32 %v1733_v41, %v1685_v14  ;;  %1879 = vmatmul.bf16.gmra.mxu0 %v3665_v12  ;;  %v2066_v41 = vmul.f32 0.2, %v3792_v21 }
 0x227   :  { %1928 = vmatmul.bf16.gmra.mxu1 %v3755_v49 }
 0x228   :  { %v1823_v44 = vpop.f32.mrf.mxu3  ;;  %v1777_v62 = vpop.f32.mrf.mxu2 }
 0x229   :  { %v3842_v2 = vadd.f32 %v1823_v44, %v1775_v4  ;;  %v1778_v3 = vadd.f32 %v1777_v62, %v1729_v28 }
 0x22b   :  { %v1686_v7 = vpop.f32.mrf.mxu0 }
 0x22c   :  { %v1687_v8 = vadd.f32 %v1686_v7, %v3768_v1  ;;  %v1735_v13 = vpop.f32.mrf.mxu1 }
 0x22d   :  { %2021 = vmatmul.bf16.gmra.mxu3 %v3759_v35 }
 0x22e   :  { %v1736_v48 = vadd.f32 %v1735_v13, %v1687_v8  ;;  %v2098_v13 = vsel %vm2034_vm2, %v3792_v21, %v2066_v41  ;;  %vm2050_vm2 = vcmp.gt.f32.partialorder %v3832_v25, 0.0 }
 0x230   :  { %v1826_v46 = vpop.f32.mrf.mxu3  ;;  %v1779_v26 = vpop.f32.mrf.mxu2 }
 0x231   :  { %v3846_v61 = vadd.f32 %v1826_v46, %v1778_v3  ;;  %v1780_v17 = vadd.f32 %v1779_v26, %v1731_v6 }
 0x233   :  { %v1845_v12 = vpop.f32.mrf.mxu0 }
 0x234   :  { %v1894_v34 = vpop.f32.mrf.mxu1  ;;  %v1846_v37 = vadd.f32 %v1845_v12, %v3855_v31 }
 0x235   :  { %1977 = vmatmul.bf16.gmra.mxu2 %v3770_v30 }
 0x236   :  { %v1895_v9 = vadd.f32 %v1894_v34, %v1846_v37  ;;  %v2068_v34 = vmul.f32 0.2, %v3796_v58 }
 0x238   :  { %v1828_v49 = vpop.f32.mrf.mxu3  ;;  %v1782_v5 = vpop.f32.mrf.mxu2 }
 0x239   :  { %v3849_v60 = vadd.f32 %v1828_v49, %v1780_v17  ;;  %v1783_v22 = vadd.f32 %v1782_v5, %v1734_v57  ;;  %v2136_v17 = vmul.f32 %v3866_v54, %v2098_v13 }
 0x23b   :  { %v1847_v43 = vpop.f32.mrf.mxu0 }
 0x23c   :  { %v1896_v1 = vpop.f32.mrf.mxu1  ;;  %v1848_v28 = vadd.f32 %v1847_v43, %v3855_v31 }
 0x23d   :  { %2026 = vmatmul.bf16.gmra.mxu3 %v3776_v52  ;;  %v2064_v52 = vmul.f32 0.2, %v3786_v38 }
 0x23e   :  { %v1897_v0 = vadd.f32 %v1896_v1, %v1848_v28 }
 0x23f   :  { %v2096_v53 = vsel %vm2032_vm0, %v3786_v38, %v2064_v52  ;;  %vm2048_vm0 = vcmp.gt.f32.partialorder %v3826_v29, 0.0 }
 0x240   :  { %v1831_v35 = vpop.f32.mrf.mxu3  ;;  %v1784_v15 = vpop.f32.mrf.mxu2  ;;  %v2134_v24 = vmul.f32 %v3866_v54, %v2096_v53 }
 0x241   :  { %v3852_v18 = vadd.f32 %v1831_v35, %v1783_v22  ;;  %v1785_v63 = vadd.f32 %v1784_v15, %v1736_v48 }
 0x243   :  { %v1850_v47 = vpop.f32.mrf.mxu0 }
 0x244   :  { %v1899_v20 = vpop.f32.mrf.mxu1  ;;  %v1851_v3 = vadd.f32 %v1850_v47, %v3855_v31 }
 0x246   :  { %v1900_v46 = vadd.f32 %v1899_v20, %v1851_v3 }
 0x248   :  { %v1833_v30 = vpop.f32.mrf.mxu3  ;;  %v1943_v36 = vpop.f32.mrf.mxu2 }
 0x249   :  { %v3858_v32 = vadd.f32 %v1833_v30, %v1785_v63  ;;  %v1944_v42 = vadd.f32 %v1943_v36, %v1895_v9  ;;  %v2100_v63 = vsel %vm2036_vm4, %v3796_v58, %v2068_v34  ;;  %v2070_v9 = vmul.f32 0.2, %v3802_v51 }
 0x24a   :  { %v2138_v37 = vmul.f32 %v3866_v54, %v2100_v63  ;;  %v2076_v63 = vmul.f32 0.2, %v3816_v39  ;;  %vm2052_vm4 = vcmp.gt.f32.partialorder %v3836_v16, 0.0 }
 0x24b   :  { %v1852_v50 = vpop.f32.mrf.mxu0 }
 0x24c   :  { %v1901_v55 = vpop.f32.mrf.mxu1  ;;  %v1853_v1 = vadd.f32 %v1852_v50, %v3855_v31 }
 0x24e   :  { %v1902_v20 = vadd.f32 %v1901_v55, %v1853_v1  ;;  %v2102_v55 = vsel %vm2038_vm6, %v3802_v51, %v2070_v9  ;;  %vm2054_vm6 = vcmp.gt.f32.partialorder %v3842_v2, 0.0 }
 0x250   :  { %v1992_v11 = vpop.f32.mrf.mxu3  ;;  %v1945_v19 = vpop.f32.mrf.mxu2 }
 0x251   :  { %v1993_v40 = vadd.f32 %v1992_v11, %v1944_v42  ;;  %v1946_v57 = vadd.f32 %v1945_v19, %v1897_v0  ;;  %v2140_v0 = vmul.f32 %v3866_v54, %v2102_v55 }
 0x253   :  { %vm2033_vm1 = vcmp.gt.f32.partialorder %v1993_v40, 0.0  ;;  %v2065_v59 = vmul.f32 0.2, %v1993_v40  ;;  %v1855_v6 = vpop.f32.mrf.mxu0 }
 0x254   :  { %v1904_v4 = vpop.f32.mrf.mxu1  ;;  %v1856_v33 = vadd.f32 %v1855_v6, %v3855_v31 }
 0x255   :  { %v2097_v23 = vsel %vm2033_vm1, %v1993_v40, %v2065_v59 }
 0x256   :  { %v2135_v14 = vmul.f32 %v3868_v56, %v2097_v23  ;;  %v1905_v19 = vadd.f32 %v1904_v4, %v1856_v33 }
 0x258   :  { %v1994_v44 = vpop.f32.mrf.mxu3  ;;  %v2166_v62 = vadd.f32 %v2135_v14, %v2134_v24  ;;  %v1948_v8 = vpop.f32.mrf.mxu2  ;;  %v2072_v24 = vmul.f32 0.2, %v3806_v45 }
 0x259   :  { %v1995_v7 = vadd.f32 %v1994_v44, %v1946_v57  ;;  %v1949_v49 = vadd.f32 %v1948_v8, %v1900_v46  ;;  %v2074_v46 = vmul.f32 0.2, %v3812_v10 }
 0x25a   :  { %2167 = vadd.xlane.f32.xlu0 %v2166_v62  ;;  %v2104_v4 = vsel %vm2040_vm8, %v3806_v45, %v2072_v24  ;;  %vm2056_vm8 = vcmp.gt.f32.partialorder %v3846_v61, 0.0 }
 0x25b   :  { %vm2035_vm3 = vcmp.gt.f32.partialorder %v1995_v7, 0.0  ;;  %v2067_v38 = vmul.f32 0.2, %v1995_v7  ;;  %v1857_v48 = vpop.f32.mrf.mxu0 }
 0x25c   :  { %v1906_v5 = vpop.f32.mrf.mxu1  ;;  %v1858_v57 = vadd.f32 %v1857_v48, %v3855_v31 }
 0x25d   :  { %v2099_v26 = vsel %vm2035_vm3, %v1995_v7, %v2067_v38  ;;  %v2142_v38 = vmul.f32 %v3866_v54, %v2104_v4 }
 0x25e   :  { %v2137_v12 = vmul.f32 %v3868_v56, %v2099_v26  ;;  %v1907_v7 = vadd.f32 %v1906_v5, %v1858_v57  ;;  %v2106_v5 = vsel %vm2042_vm10, %v3812_v10, %v2074_v46  ;;  %vm2058_vm10 = vcmp.gt.f32.partialorder %v3849_v60, 0.0 }
 0x260   :  { %v1997_v22 = vpop.f32.mrf.mxu3  ;;  %v2169_v43 = vadd.f32 %v2137_v12, %v2136_v17  ;;  %v1950_v15 = vpop.f32.mrf.mxu2 }
 0x261   :  { %v1998_v35 = vadd.f32 %v1997_v22, %v1949_v49  ;;  %v1951_v52 = vadd.f32 %v1950_v15, %v1902_v20  ;;  %v2144_v15 = vmul.f32 %v3866_v54, %v2106_v5 }
 0x262   :  { %2170 = vadd.xlane.f32.xlu0 %v2169_v43 }
 0x263   :  { %vm2037_vm5 = vcmp.gt.f32.partialorder %v1998_v35, 0.0  ;;  %v2069_v21 = vmul.f32 0.2, %v1998_v35  ;;  %v1860_v47 = vpop.f32.mrf.mxu0 }
 0x264   :  { %v1909_v40 = vpop.f32.mrf.mxu1  ;;  %v1861_v34 = vadd.f32 %v1860_v47, %v3855_v31 }
 0x265   :  { %v2101_v30 = vsel %vm2037_vm5, %v1998_v35, %v2069_v21 }
 0x266   :  { %v2139_v36 = vmul.f32 %v3868_v56, %v2101_v30  ;;  %v1910_v43 = vadd.f32 %v1909_v40, %v1861_v34  ;;  %v2078_v40 = vmul.f32 0.2, %v3822_v27 }
 0x268   :  { %v1999_v50 = vpop.f32.mrf.mxu3  ;;  %v2172_v42 = vadd.f32 %v2139_v36, %v2138_v37  ;;  %v1953_v28 = vpop.f32.mrf.mxu2  ;;  %v2110_v24 = vsel %vm2046_vm14, %v3822_v27, %v2078_v40  ;;  %vm2062_vm14 = vcmp.gt.f32.partialorder %v3858_v32, 0.0 }
 0x269   :  { %v2000_v11 = vadd.f32 %v1999_v50, %v1951_v52  ;;  %v1954_v14 = vadd.f32 %v1953_v28, %v1905_v19  ;;  %v2108_v50 = vsel %vm2044_vm12, %v3816_v39, %v2076_v63  ;;  %v2148_v57 = vmul.f32 %v3866_v54, %v2110_v24 }
 0x26a   :  { %2173 = vadd.xlane.f32.xlu1 %v2172_v42  ;;  %vm2060_vm12 = vcmp.gt.f32.partialorder %v3852_v18, 0.0 }
 0x26b   :  { %vm2039_vm7 = vcmp.gt.f32.partialorder %v2000_v11, 0.0  ;;  %v2071_v58 = vmul.f32 0.2, %v2000_v11  ;;  %v1862_v53 = vpop.f32.mrf.mxu0 }
 0x26c   :  { %v1911_v3 = vpop.f32.mrf.mxu1  ;;  %v1863_v37 = vadd.f32 %v1862_v53, %v3855_v31 }
 0x26d   :  { %v2103_v59 = vsel %vm2039_vm7, %v2000_v11, %v2071_v58  ;;  %v2146_v11 = vmul.f32 %v3866_v54, %v2108_v50 }
 0x26e   :  { %v2141_v23 = vmul.f32 %v3868_v56, %v2103_v59  ;;  %v1912_v42 = vadd.f32 %v1911_v3, %v1863_v37  ;;  %v2084_v37 = vmul.f32 0.2, %v3836_v16 }
 0x270   :  { %v2002_v6 = vpop.f32.mrf.mxu3  ;;  %v2175_v41 = vadd.f32 %v2141_v23, %v2140_v0  ;;  %v1955_v62 = vpop.f32.mrf.mxu2 }
 0x271   :  { %v2003_v44 = vadd.f32 %v2002_v6, %v1954_v14  ;;  %v1956_v26 = vadd.f32 %v1955_v62, %v1907_v7  ;;  %v2080_v62 = vmul.f32 0.2, %v3826_v29 }
 0x272   :  { %2176 = vadd.xlane.f32.xlu1 %v2175_v41 }
 0x273   :  { %vm2041_vm9 = vcmp.gt.f32.partialorder %v2003_v44, 0.0  ;;  %v2073_v51 = vmul.f32 0.2, %v2003_v44  ;;  %v1865_v48 = vpop.f32.mrf.mxu0  ;;  %v2112_v46 = vsel %vm2048_vm0, %v3826_v29, %v2080_v62 }
 0x274   :  { %v1914_v35 = vpop.f32.mrf.mxu1  ;;  %v1866_v53 = vadd.f32 %v1865_v48, %v3855_v31 }
 0x275   :  { %v2105_v8 = vsel %vm2041_vm9, %v2003_v44, %v2073_v51 }
 0x276   :  { %v2143_v13 = vmul.f32 %v3868_v56, %v2105_v8  ;;  %v1915_v6 = vadd.f32 %v1914_v35, %v1866_v53 }
 0x278   :  { %v2004_v17 = vpop.f32.mrf.mxu3  ;;  %v2178_v12 = vadd.f32 %v2143_v13, %v2142_v38  ;;  %v1958_v22 = vpop.f32.mrf.mxu2 }
 0x279   :  { %v2005_v49 = vadd.f32 %v2004_v17, %v1956_v26  ;;  %v1959_v20 = vadd.f32 %v1958_v22, %v1910_v43 }
 0x27a   :  { %2179 = vadd.xlane.f32.xlu2 %v2178_v12  ;;  %v2150_v12 = vmul.f32 %v3866_v54, %v2112_v46 }
 0x27b   :  { %vm2043_vm11 = vcmp.gt.f32.partialorder %v2005_v49, 0.0  ;;  %v2075_v45 = vmul.f32 0.2, %v2005_v49  ;;  %v1867_v52 = vpop.f32.mrf.mxu0 }
 0x27c   :  { %v1916_v55 = vpop.f32.mrf.mxu1  ;;  %v1868_v7 = vadd.f32 %v1867_v52, %v3855_v31 }
 0x27d   :  { %v2107_v1 = vsel %vm2043_vm11, %v2005_v49, %v2075_v45  ;;  %v2082_v49 = vmul.f32 0.2, %v3832_v25 }
 0x27e   :  { %v2145_v21 = vmul.f32 %v3868_v56, %v2107_v1  ;;  %v1917_v26 = vadd.f32 %v1916_v55, %v1868_v7 }
 0x280   :  { %v2007_v47 = vpop.f32.mrf.mxu3  ;;  %v2181_v30 = vadd.f32 %v2145_v21, %v2144_v15  ;;  %v1960_v9 = vpop.f32.mrf.mxu2  ;;  %v2114_v15 = vsel %vm2050_vm2, %v3832_v25, %v2082_v49  ;;  %vm2536_vm2 = vcmask 7168  }
 0x281   :  { %v2008_v36 = vadd.f32 %v2007_v47, %v1959_v20  ;;  %v1961_v58 = vadd.f32 %v1960_v9, %v1912_v42  ;;  %v2152_v47 = vmul.f32 %v3866_v54, %v2114_v15 }
 0x282   :  { %2182 = vadd.xlane.f32.xlu2 %v2181_v30 }
 0x283   :  { %vm2045_vm13 = vcmp.gt.f32.partialorder %v2008_v36, 0.0  ;;  %v2077_v10 = vmul.f32 0.2, %v2008_v36  ;;  %v1870_v14 = vpop.f32.mrf.mxu0 }
 0x284   :  { %v1919_v13 = vpop.f32.mrf.mxu1  ;;  %v1871_v43 = vadd.f32 %v1870_v14, %v3855_v31 }
 0x285   :  { %v2109_v33 = vsel %vm2045_vm13, %v2008_v36, %v2077_v10 }
 0x286   :  { %v2147_v28 = vmul.f32 %v3868_v56, %v2109_v33  ;;  %v1920_v63 = vadd.f32 %v1919_v13, %v1871_v43 }
 0x288   :  { %v2009_v19 = vpop.f32.mrf.mxu3  ;;  %v2184_v59 = vadd.f32 %v2147_v28, %v2146_v11  ;;  %v1963_v23 = vpop.f32.mrf.mxu2  ;;  %v2116_v11 = vsel %vm2052_vm4, %v3836_v16, %v2084_v37 }
 0x289   :  { %v2010_v0 = vadd.f32 %v2009_v19, %v1961_v58  ;;  %v1964_v51 = vadd.f32 %v1963_v23, %v1915_v6  ;;  %v2154_v55 = vmul.f32 %v3866_v54, %v2116_v11 }
 0x28a   :  { %2185 = vadd.xlane.f32.xlu0 %v2184_v59  ;;  %v2086_v59 = vmul.f32 0.2, %v3842_v2 }
 0x28b   :  { %vm2047_vm15 = vcmp.gt.f32.partialorder %v2010_v0, 0.0  ;;  %v2079_v39 = vmul.f32 0.2, %v2010_v0  ;;  %v1872_v17 = vpop.f32.mrf.mxu0 }
 0x28c   :  { %v1921_v21 = vpop.f32.mrf.mxu1  ;;  %v1873_v50 = vadd.f32 %v1872_v17, %v3855_v31 }
 0x28d   :  { %v2111_v41 = vsel %vm2047_vm15, %v2010_v0, %v2079_v39 }
 0x28e   :  { %v2149_v44 = vmul.f32 %v3868_v56, %v2111_v41  ;;  %v1922_v28 = vadd.f32 %v1921_v21, %v1873_v50  ;;  %v2118_v41 = vsel %vm2054_vm6, %v3842_v2, %v2086_v59 }
 0x28f   :  { %v2156_v62 = vmul.f32 %v3866_v54, %v2118_v41 }
 0x290   :  { %v2012_v4 = vpop.f32.mrf.mxu3  ;;  %v2187_v3 = vadd.f32 %v2149_v44, %v2148_v57  ;;  %v1965_v38 = vpop.f32.mrf.mxu2 }
 0x291   :  { %v2013_v8 = vadd.f32 %v2012_v4, %v1964_v51  ;;  %v1966_v22 = vadd.f32 %v1965_v38, %v1917_v26  ;;  %v2088_v4 = vmul.f32 0.2, %v3846_v61 }
 0x292   :  { %2188 = vadd.xlane.f32.xlu1 %v2187_v3 }
 0x293   :  { %vm2049_vm1 = vcmp.gt.f32.partialorder %v2013_v8, 0.0  ;;  %v2081_v27 = vmul.f32 0.2, %v2013_v8  ;;  %v1875_v9 = vpop.f32.mrf.mxu0  ;;  %v2120_v26 = vsel %vm2056_vm8, %v3846_v61, %v2088_v4 }
 0x294   :  { %v1924_v58 = vpop.f32.mrf.mxu1  ;;  %v1876_v39 = vadd.f32 %v1875_v9, %v3855_v31 }
 0x295   :  { %v2113_v48 = vsel %vm2049_vm1, %v2013_v8, %v2081_v27 }
 0x296   :  { %v2151_v34 = vmul.f32 %v3868_v56, %v2113_v48  ;;  %v1925_v57 = vadd.f32 %v1924_v58, %v1876_v39 }
 0x298   :  { %v2014_v45 = vpop.f32.mrf.mxu3  ;;  %v2190_v5 = vadd.f32 %v2151_v34, %v2150_v12  ;;  %v1968_v35 = vpop.f32.mrf.mxu2  ;;  %v2158_v34 = vmul.f32 %v3866_v54, %v2120_v26 }
 0x299   :  { %v2015_v1 = vadd.f32 %v2014_v45, %v1966_v22  ;;  %v1969_v36 = vadd.f32 %v1968_v35, %v1920_v63  ;;  %v2090_v22 = vmul.f32 0.2, %v3849_v60 }
 0x29a   :  { %2191 = vadd.xlane.f32.xlu2 %v2190_v5 }
 0x29b   :  { %vm2051_vm3 = vcmp.gt.f32.partialorder %v2015_v1, 0.0  ;;  %v2083_v29 = vmul.f32 0.2, %v2015_v1  ;;  %v1877_v6 = vpop.f32.mrf.mxu0  ;;  %v2122_v21 = vsel %vm2058_vm10, %v3849_v60, %v2090_v22 }
 0x29c   :  { %v1926_v7 = vpop.f32.mrf.mxu1  ;;  %v1878_v13 = vadd.f32 %v1877_v6, %v3855_v31 }
 0x29d   :  { %v2115_v20 = vsel %vm2051_vm3, %v2015_v1, %v2083_v29 }
 0x29e   :  { %v2153_v30 = vmul.f32 %v3868_v56, %v2115_v20  ;;  %v1927_v17 = vadd.f32 %v1926_v7, %v1878_v13 }
 0x2a0   :  { %v2017_v52 = vpop.f32.mrf.mxu3  ;;  %v2193_v10 = vadd.f32 %v2153_v30, %v2152_v47  ;;  %v1970_v33 = vpop.f32.mrf.mxu2  ;;  %v2160_v30 = vmul.f32 %v3866_v54, %v2122_v21 }
 0x2a1   :  { %v2018_v42 = vadd.f32 %v2017_v52, %v1969_v36  ;;  %v1971_v53 = vadd.f32 %v1970_v33, %v1922_v28  ;;  %v2092_v36 = vmul.f32 0.2, %v3852_v18 }
 0x2a2   :  { %2194 = vadd.xlane.f32.xlu0 %v2193_v10 }
 0x2a3   :  { %vm2053_vm5 = vcmp.gt.f32.partialorder %v2018_v42, 0.0  ;;  %v2085_v25 = vmul.f32 0.2, %v2018_v42  ;;  %v1880_v48 = vpop.f32.mrf.mxu0  ;;  %v2124_v33 = vsel %vm2060_vm12, %v3852_v18, %v2092_v36  ;;  %v3962_v18 = vstv %s4053_s6 }
 0x2a4   :  { %v1881_v1 = vadd.f32 %v1880_v48, %v3855_v31  ;;  %v1929_v29 = vpop.f32.mrf.mxu1  ;;  %v2162_v58 = vmul.f32 %v3866_v54, %v2124_v33 }
 0x2a5   :  { %v2117_v40 = vsel %vm2053_vm5, %v2018_v42, %v2085_v25 }
 0x2a6   :  { %v2155_v19 = vmul.f32 %v3868_v56, %v2117_v40  ;;  %v1930_v63 = vadd.f32 %v1929_v29, %v1881_v1 }
 0x2a8   :  { %v2019_v0 = vpop.f32.mrf.mxu3  ;;  %v2196_v23 = vadd.f32 %v2155_v19, %v2154_v55  ;;  %v1973_v14 = vpop.f32.mrf.mxu2  ;;  %v2094_v19 = vmul.f32 0.2, %v3858_v32 }
 0x2a9   :  { %v2020_v24 = vadd.f32 %v2019_v0, %v1971_v53  ;;  %v1974_v3 = vadd.f32 %v1973_v14, %v1925_v57 }
 0x2aa   :  { %2197 = vadd.xlane.f32.xlu1 %v2196_v23  ;;  %v2126_v39 = vsel %vm2062_vm14, %v3858_v32, %v2094_v19 }
 0x2ab   :  { %vm2055_vm7 = vcmp.gt.f32.partialorder %v2020_v24, 0.0  ;;  %v2087_v16 = vmul.f32 0.2, %v2020_v24  ;;  %v1882_v47 = vpop.f32.mrf.mxu0 }
 0x2ac   :  { %v1883_v50 = vadd.f32 %v1882_v47, %v3855_v31  ;;  %v1931_v25 = vpop.f32.mrf.mxu1 }
 0x2ad   :  { %v2119_v44 = vsel %vm2055_vm7, %v2020_v24, %v2087_v16  ;;  %v2164_v16 = vmul.f32 %v3866_v54, %v2126_v39 }
 0x2ae   :  { %v2157_v51 = vmul.f32 %v3868_v56, %v2119_v44  ;;  %v1932_v28 = vadd.f32 %v1931_v25, %v1883_v50 }
 0x2b0   :  { %v2022_v8 = vpop.f32.mrf.mxu3  ;;  %v2199_v38 = vadd.f32 %v2157_v51, %v2156_v62  ;;  %v1975_v46 = vpop.f32.mrf.mxu2 }
 0x2b1   :  { %v2023_v27 = vadd.f32 %v2022_v8, %v1974_v3  ;;  %v1976_v45 = vadd.f32 %v1975_v46, %v1927_v17 }
 0x2b2   :  { %2200 = vadd.xlane.f32.xlu2 %v2199_v38 }
 0x2b3   :  { %vm2057_vm9 = vcmp.gt.f32.partialorder %v2023_v27, 0.0  ;;  %v2089_v2 = vmul.f32 0.2, %v2023_v27 }
 0x2b5   :  { %v2121_v12 = vsel %vm2057_vm9, %v2023_v27, %v2089_v2 }
 0x2b6   :  { %v2159_v49 = vmul.f32 %v3868_v56, %v2121_v12 }
 0x2b8   :  { %v2024_v5 = vpop.f32.mrf.mxu3  ;;  %v2202_v43 = vadd.f32 %v2159_v49, %v2158_v34  ;;  %v1978_v15 = vpop.f32.mrf.mxu2 }
 0x2b9   :  { %v2025_v35 = vadd.f32 %v2024_v5, %v1976_v45  ;;  %v1979_v9 = vadd.f32 %v1978_v15, %v1930_v63 }
 0x2ba   :  { %2203 = vadd.xlane.f32.xlu0 %v2202_v43 }
 0x2bb   :  { %vm2059_vm11 = vcmp.gt.f32.partialorder %v2025_v35, 0.0  ;;  %v2091_v61 = vmul.f32 0.2, %v2025_v35 }
 0x2bd   :  { %v2123_v20 = vsel %vm2059_vm11, %v2025_v35, %v2091_v61 }
 0x2be   :  { %v2161_v37 = vmul.f32 %v3868_v56, %v2123_v20 }
 0x2c0   :  { %v2027_v52 = vpop.f32.mrf.mxu3  ;;  %v2205_v10 = vadd.f32 %v2161_v37, %v2160_v30  ;;  %v1980_v11 = vpop.f32.mrf.mxu2 }
 0x2c1   :  { %v2028_v42 = vadd.f32 %v2027_v52, %v1979_v9  ;;  %v1981_v59 = vadd.f32 %v1980_v11, %v1932_v28 }
 0x2c2   :  { %2206 = vadd.xlane.f32.xlu1 %v2205_v10 }
 0x2c3   :  { %vm2061_vm13 = vcmp.gt.f32.partialorder %v2028_v42, 0.0  ;;  %v2093_v60 = vmul.f32 0.2, %v2028_v42 }
 0x2c5   :  { %v2125_v40 = vsel %vm2061_vm13, %v2028_v42, %v2093_v60 }
 0x2c6   :  { %v2163_v55 = vmul.f32 %v3868_v56, %v2125_v40 }
 0x2c8   :  { %v2029_v31 = vpop.f32.mrf.mxu3  ;;  %v2208_v53 = vadd.f32 %v2163_v55, %v2162_v58 }
 0x2c9   :  { %v2030_v0 = vadd.f32 %v2029_v31, %v1981_v59 }
 0x2ca   :  { %2209 = vadd.xlane.f32.xlu2 %v2208_v53 }
 0x2cb   :  { %vm2063_vm15 = vcmp.gt.f32.partialorder %v2030_v0, 0.0  ;;  %v2095_v23 = vmul.f32 0.2, %v2030_v0 }
 0x2cd   :  { %v2168_v24 = vpop.xlane.xlu0 %2167  ;;  %v2127_v14 = vsel %vm2063_vm15, %v2030_v0, %v2095_v23 }
 0x2ce   :  { %v2216_v6 = vadd.f32 %v3962_v18, %v2168_v24  ;;  %v2165_v41 = vmul.f32 %v3868_v56, %v2127_v14 }
 0x2d0   :  { %v2232_v57 = vsub.f32 0.0, %v2216_v6  ;;  %v2211_v44 = vadd.f32 %v2165_v41, %v2164_v16 }
 0x2d2   :  { %v2248_v62 = vmul.f32 1.442695, %v2232_v57  ;;  %2212 = vadd.xlane.f32.xlu0 %v2211_v44 }
 0x2d4   :  { %3290 = vpow2.f32 %v2248_v62 }
 0x2d5   :  { %v2171_v51 = vpop.xlane.xlu0 %2170 }
 0x2d6   :  { %v2217_v4 = vadd.f32 %v3962_v18, %v2171_v51 }
 0x2d8   :  { %v2233_v3 = vsub.f32 0.0, %v2217_v4 }
 0x2da   :  { %v3291_v7 = vpop.eup %3290  ;;  %v2250_v8 = vmul.f32 1.442695, %v2233_v3 }
 0x2db   :  { %v2280_v32 = vadd.f32 1.0, %v3291_v7 }
 0x2dc   :  { %3292 = vpow2.f32 %v2250_v8 }
 0x2dd   :  { %3294 = vrcp.f32 %v2280_v32  ;;  %v2174_v38 = vpop.xlane.xlu1 %2173  ;;  %v2307_v34 = vand.u32 2147483648, %v2280_v32  ;;  %v2305_v22 = vand.u32 2147483647, %v2280_v32  ;;  %vm2301_vm1 = vweird.f32 %v2280_v32 }
 0x2de   :  { %v2218_v13 = vadd.f32 %v3962_v18, %v2174_v38 }
 0x2df   :  { %v2308_v29 = vor.u32 1.1754944e-38, %v2307_v34  ;;  %vm2306_vm4 = vcmp.eq.f32.partialorder %v2305_v22, 8.507059e+37 }
 0x2e0   :  { %v2234_v54 = vsub.f32 0.0, %v2218_v13 }
 0x2e2   :  { %v3293_v27 = vpop.eup %3292  ;;  %v2252_v56 = vmul.f32 1.442695, %v2234_v54 }
 0x2e3   :  { %v3295_v46 = vpop.eup %3294  ;;  %v2281_v2 = vadd.f32 1.0, %v3293_v27 }
 0x2e4   :  { %v2297_v26 = vmul.f32 %v3295_v46, %v2280_v32  ;;  %3296 = vpow2.f32 %v2252_v56  ;;  %vm2302_vm0 = vweird.f32 %v3295_v46 }
 0x2e5   :  { %3298 = vrcp.f32 %v2281_v2  ;;  %v2177_v48 = vpop.xlane.xlu1 %2176  ;;  %vm2303_vm3 = vmor %vm2301_vm1, %vm2302_vm0  ;;  %v2322_v37 = vand.u32 2147483648, %v2281_v2  ;;  %v2320_v9 = vand.u32 2147483647, %v2281_v2  ;;  %vm2316_vm6 = vweird.f32 %v2281_v2 }
 0x2e6   :  { %v2298_v17 = vsub.f32 1.0, %v2297_v26  ;;  %v2219_v12 = vadd.f32 %v3962_v18, %v2177_v48 }
 0x2e7   :  { %v2323_v33 = vor.u32 1.1754944e-38, %v2322_v37  ;;  %vm2321_vm8 = vcmp.eq.f32.partialorder %v2320_v9, 8.507059e+37 }
 0x2e8   :  { %v2299_v49 = vmul.f32 %v3295_v46, %v2298_v17  ;;  %v2235_v45 = vsub.f32 0.0, %v2219_v12 }
 0x2ea   :  { %v3297_v5 = vpop.eup %3296  ;;  %v2300_v43 = vadd.f32 %v3295_v46, %v2299_v49  ;;  %v2254_v1 = vmul.f32 1.442695, %v2235_v45 }
 0x2eb   :  { %v3299_v35 = vpop.eup %3298  ;;  %v2282_v15 = vadd.f32 1.0, %v3297_v5 }
 0x2ec   :  { %v2304_v61 = vsel %vm2303_vm3, %v3295_v46, %v2300_v43  ;;  %v2312_v21 = vmul.f32 %v3299_v35, %v2281_v2  ;;  %3300 = vpow2.f32 %v2254_v1  ;;  %vm2317_vm5 = vweird.f32 %v3299_v35 }
 0x2ed   :  { %v2309_v63 = vsel %vm2306_vm4, %v2308_v29, %v2304_v61  ;;  %3302 = vrcp.f32 %v2282_v15  ;;  %v2180_v20 = vpop.xlane.xlu2 %2179  ;;  %vm2318_vm7 = vmor %vm2316_vm6, %vm2317_vm5  ;;  %v2337_v59 = vand.u32 2147483648, %v2282_v15  ;;  %v2335_v53 = vand.u32 2147483647, %v2282_v15 }
 0x2ee   :  { %2537 = vst.msk [vmem:[%s4054_s7] sm:$0xff] %vm2536_vm2, %v2309_v63  ;;  %v2313_v47 = vsub.f32 1.0, %v2312_v21  ;;  %v2220_v30 = vadd.f32 %v3962_v18, %v2180_v20  ;;  %vm2331_vm10 = vweird.f32 %v2282_v15 }
 0x2ef   :  { %v2338_v6 = vor.u32 1.1754944e-38, %v2337_v59  ;;  %vm2336_vm12 = vcmp.eq.f32.partialorder %v2335_v53, 8.507059e+37 }
 0x2f0   :  { %v2314_v36 = vmul.f32 %v3299_v35, %v2313_v47  ;;  %v2236_v52 = vsub.f32 0.0, %v2220_v30 }
 0x2f2   :  { %v3301_v10 = vpop.eup %3300  ;;  %v2315_v50 = vadd.f32 %v3299_v35, %v2314_v36  ;;  %v2256_v42 = vmul.f32 1.442695, %v2236_v52 }
 0x2f3   :  { %v3303_v60 = vpop.eup %3302  ;;  %v2283_v25 = vadd.f32 1.0, %v3301_v10 }
 0x2f4   :  { %v2319_v11 = vsel %vm2318_vm7, %v3299_v35, %v2315_v50  ;;  %v2327_v28 = vmul.f32 %v3303_v60, %v2282_v15  ;;  %3304 = vpow2.f32 %v2256_v42  ;;  %vm2332_vm9 = vweird.f32 %v3303_v60 }
 0x2f5   :  { %v2324_v40 = vsel %vm2321_vm8, %v2323_v33, %v2319_v11  ;;  %3306 = vrcp.f32 %v2283_v25  ;;  %v2183_v58 = vpop.xlane.xlu2 %2182  ;;  %vm2333_vm11 = vmor %vm2331_vm10, %vm2332_vm9  ;;  %v2352_v3 = vand.u32 2147483648, %v2283_v25  ;;  %v2350_v8 = vand.u32 2147483647, %v2283_v25 }
 0x2f6   :  { %2538 = vst.msk [vmem:[%s4054_s7 + $0x8] sm:$0xff] %vm2536_vm2, %v2324_v40  ;;  %v2328_v55 = vsub.f32 1.0, %v2327_v28  ;;  %v2221_v19 = vadd.f32 %v3962_v18, %v2183_v58  ;;  %vm2346_vm14 = vweird.f32 %v2283_v25 }
 0x2f7   :  { %v2353_v56 = vor.u32 1.1754944e-38, %v2352_v3  ;;  %vm2351_vm0 = vcmp.eq.f32.partialorder %v2350_v8, 8.507059e+37 }
 0x2f8   :  { %v2329_v31 = vmul.f32 %v3303_v60, %v2328_v55  ;;  %v2237_v0 = vsub.f32 0.0, %v2221_v19 }
 0x2fa   :  { %v3305_v23 = vpop.eup %3304  ;;  %v2330_v39 = vadd.f32 %v3303_v60, %v2329_v31  ;;  %v2258_v24 = vmul.f32 1.442695, %v2237_v0 }
 0x2fb   :  { %v3307_v14 = vpop.eup %3306  ;;  %v2284_v16 = vadd.f32 1.0, %v3305_v23 }
 0x2fc   :  { %v2334_v41 = vsel %vm2333_vm11, %v3303_v60, %v2330_v39  ;;  %v2342_v57 = vmul.f32 %v3307_v14, %v2283_v25  ;;  %3308 = vpow2.f32 %v2258_v24  ;;  %vm2347_vm13 = vweird.f32 %v3307_v14 }
 0x2fd   :  { %v2339_v44 = vsel %vm2336_vm12, %v2338_v6, %v2334_v41  ;;  %3310 = vrcp.f32 %v2284_v16  ;;  %v2186_v62 = vpop.xlane.xlu0 %2185  ;;  %vm2348_vm15 = vmor %vm2346_vm14, %vm2347_vm13  ;;  %v2367_v49 = vand.u32 2147483648, %v2284_v16  ;;  %v2365_v45 = vand.u32 2147483647, %v2284_v16 }
 0x2fe   :  { %2539 = vst.msk [vmem:[%s4054_s7 + $0x10] sm:$0xff] %vm2536_vm2, %v2339_v44  ;;  %v2343_v51 = vsub.f32 1.0, %v2342_v57  ;;  %v2222_v4 = vadd.f32 %v3962_v18, %v2186_v62  ;;  %vm2361_vm3 = vweird.f32 %v2284_v16 }
 0x2ff   :  { %v2368_v15 = vor.u32 1.1754944e-38, %v2367_v49  ;;  %vm2366_vm5 = vcmp.eq.f32.partialorder %v2365_v45, 8.507059e+37 }
 0x300   :  { %v2344_v7 = vmul.f32 %v3307_v14, %v2343_v51  ;;  %v2238_v32 = vsub.f32 0.0, %v2222_v4 }
 0x302   :  { %v3309_v38 = vpop.eup %3308  ;;  %v2345_v13 = vadd.f32 %v3307_v14, %v2344_v7  ;;  %v2260_v54 = vmul.f32 1.442695, %v2238_v32 }
 0x303   :  { %v3311_v27 = vpop.eup %3310  ;;  %v2285_v46 = vadd.f32 1.0, %v3309_v38 }
 0x304   :  { %v2349_v2 = vsel %vm2348_vm15, %v3307_v14, %v2345_v13  ;;  %v2357_v26 = vmul.f32 %v3311_v27, %v2284_v16  ;;  %3312 = vpow2.f32 %v2260_v54  ;;  %vm2362_vm1 = vweird.f32 %v3311_v27 }
 0x305   :  { %v2354_v48 = vsel %vm2351_vm0, %v2353_v56, %v2349_v2  ;;  %3314 = vrcp.f32 %v2285_v46  ;;  %v2189_v17 = vpop.xlane.xlu1 %2188  ;;  %vm2363_vm4 = vmor %vm2361_vm3, %vm2362_vm1  ;;  %v2382_v36 = vand.u32 2147483648, %v2285_v46  ;;  %v2380_v52 = vand.u32 2147483647, %v2285_v46 }
 0x306   :  { %2540 = vst.msk [vmem:[%s4054_s7 + $0x18] sm:$0xff] %vm2536_vm2, %v2354_v48  ;;  %v2358_v12 = vsub.f32 1.0, %v2357_v26  ;;  %v2223_v34 = vadd.f32 %v3962_v18, %v2189_v17  ;;  %vm2376_vm7 = vweird.f32 %v2285_v46 }
 0x307   :  { %v2383_v25 = vor.u32 1.1754944e-38, %v2382_v36  ;;  %vm2381_vm9 = vcmp.eq.f32.partialorder %v2380_v52, 8.507059e+37 }
 0x308   :  { %v2359_v22 = vmul.f32 %v3311_v27, %v2358_v12  ;;  %v2239_v5 = vsub.f32 0.0, %v2223_v34 }
 0x30a   :  { %v3313_v43 = vpop.eup %3312  ;;  %v2360_v1 = vadd.f32 %v3311_v27, %v2359_v22  ;;  %v2262_v35 = vmul.f32 1.442695, %v2239_v5 }
 0x30b   :  { %v3315_v29 = vpop.eup %3314  ;;  %v2286_v61 = vadd.f32 1.0, %v3313_v43 }
 0x30c   :  { %v2364_v21 = vsel %vm2363_vm4, %v3311_v27, %v2360_v1  ;;  %v2372_v63 = vmul.f32 %v3315_v29, %v2285_v46  ;;  %3316 = vpow2.f32 %v2262_v35  ;;  %vm2377_vm6 = vweird.f32 %v3315_v29 }
 0x30d   :  { %v2369_v20 = vsel %vm2366_vm5, %v2368_v15, %v2364_v21  ;;  %3318 = vrcp.f32 %v2286_v61  ;;  %v2192_v47 = vpop.xlane.xlu2 %2191  ;;  %vm2378_vm8 = vmor %vm2376_vm7, %vm2377_vm6  ;;  %v2397_v31 = vand.u32 2147483648, %v2286_v61  ;;  %v2395_v0 = vand.u32 2147483647, %v2286_v61 }
 0x30e   :  { %2541 = vst.msk [vmem:[%s4054_s7 + $0x20] sm:$0xff] %vm2536_vm2, %v2369_v20  ;;  %v2373_v30 = vsub.f32 1.0, %v2372_v63  ;;  %v2224_v37 = vadd.f32 %v3962_v18, %v2192_v47  ;;  %vm2391_vm11 = vweird.f32 %v2286_v61 }
 0x30f   :  { %v2398_v16 = vor.u32 1.1754944e-38, %v2397_v31  ;;  %vm2396_vm13 = vcmp.eq.f32.partialorder %v2395_v0, 8.507059e+37 }
 0x310   :  { %v2374_v9 = vmul.f32 %v3315_v29, %v2373_v30  ;;  %v2240_v10 = vsub.f32 0.0, %v2224_v37 }
 0x312   :  { %v3317_v50 = vpop.eup %3316  ;;  %v2375_v42 = vadd.f32 %v3315_v29, %v2374_v9  ;;  %v2264_v60 = vmul.f32 1.442695, %v2240_v10 }
 0x313   :  { %v3319_v33 = vpop.eup %3318  ;;  %v2287_v11 = vadd.f32 1.0, %v3317_v50 }
 0x314   :  { %v2379_v28 = vsel %vm2378_vm8, %v3315_v29, %v2375_v42  ;;  %v2387_v40 = vmul.f32 %v3319_v33, %v2286_v61  ;;  %3320 = vpow2.f32 %v2264_v60  ;;  %vm2392_vm10 = vweird.f32 %v3319_v33 }
 0x315   :  { %v2384_v58 = vsel %vm2381_vm9, %v2383_v25, %v2379_v28  ;;  %3322 = vrcp.f32 %v2287_v11  ;;  %v2195_v55 = vpop.xlane.xlu0 %2194  ;;  %vm2393_vm12 = vmor %vm2391_vm11, %vm2392_vm10  ;;  %v2412_v7 = vand.u32 2147483648, %v2287_v11  ;;  %v2410_v32 = vand.u32 2147483647, %v2287_v11 }
 0x316   :  { %2542 = vst.msk [vmem:[%s4054_s7 + $0x28] sm:$0xff] %vm2536_vm2, %v2384_v58  ;;  %v2388_v19 = vsub.f32 1.0, %v2387_v40  ;;  %v2225_v59 = vadd.f32 %v3962_v18, %v2195_v55  ;;  %vm2406_vm15 = vweird.f32 %v2287_v11 }
 0x317   :  { %v2413_v46 = vor.u32 1.1754944e-38, %v2412_v7  ;;  %vm2411_vm1 = vcmp.eq.f32.partialorder %v2410_v32, 8.507059e+37 }
 0x318   :  { %v2389_v53 = vmul.f32 %v3319_v33, %v2388_v19  ;;  %v2241_v23 = vsub.f32 0.0, %v2225_v59 }
 0x31a   :  { %v3321_v39 = vpop.eup %3320  ;;  %v2390_v24 = vadd.f32 %v3319_v33, %v2389_v53  ;;  %v2266_v14 = vmul.f32 1.442695, %v2241_v23 }
 0x31b   :  { %v3323_v6 = vpop.eup %3322  ;;  %v2288_v41 = vadd.f32 1.0, %v3321_v39 }
 0x31c   :  { %v2394_v57 = vsel %vm2393_vm12, %v3319_v33, %v2390_v24  ;;  %v2402_v44 = vmul.f32 %v3323_v6, %v2287_v11  ;;  %3324 = vpow2.f32 %v2266_v14  ;;  %vm2407_vm14 = vweird.f32 %v3323_v6 }
 0x31d   :  { %v2399_v62 = vsel %vm2396_vm13, %v2398_v16, %v2394_v57  ;;  %3326 = vrcp.f32 %v2288_v41  ;;  %v2198_v51 = vpop.xlane.xlu1 %2197  ;;  %vm2408_vm0 = vmor %vm2406_vm15, %vm2407_vm14  ;;  %v2427_v22 = vand.u32 2147483648, %v2288_v41  ;;  %v2425_v5 = vand.u32 2147483647, %v2288_v41 }
 0x31e   :  { %2543 = vst.msk [vmem:[%s4054_s7 + $0x30] sm:$0xff] %vm2536_vm2, %v2399_v62  ;;  %v2403_v4 = vsub.f32 1.0, %v2402_v44  ;;  %v2226_v3 = vadd.f32 %v3962_v18, %v2198_v51  ;;  %vm2421_vm4 = vweird.f32 %v2288_v41 }
 0x31f   :  { %v2428_v61 = vor.u32 1.1754944e-38, %v2427_v22  ;;  %vm2426_vm6 = vcmp.eq.f32.partialorder %v2425_v5, 8.507059e+37 }
 0x320   :  { %v2404_v8 = vmul.f32 %v3323_v6, %v2403_v4  ;;  %v2242_v38 = vsub.f32 0.0, %v2226_v3 }
 0x322   :  { %v3325_v13 = vpop.eup %3324  ;;  %v2405_v54 = vadd.f32 %v3323_v6, %v2404_v8  ;;  %v2268_v27 = vmul.f32 1.442695, %v2242_v38 }
 0x323   :  { %v3327_v56 = vpop.eup %3326  ;;  %v2289_v2 = vadd.f32 1.0, %v3325_v13 }
 0x324   :  { %v2409_v26 = vsel %vm2408_vm0, %v3323_v6, %v2405_v54  ;;  %v2417_v48 = vmul.f32 %v3327_v56, %v2288_v41  ;;  %3328 = vpow2.f32 %v2268_v27  ;;  %vm2422_vm3 = vweird.f32 %v3327_v56 }
 0x325   :  { %v2414_v17 = vsel %vm2411_vm1, %v2413_v46, %v2409_v26  ;;  %3330 = vrcp.f32 %v2289_v2  ;;  %v2201_v12 = vpop.xlane.xlu2 %2200  ;;  %vm2423_vm5 = vmor %vm2421_vm4, %vm2422_vm3  ;;  %v2442_v9 = vand.u32 2147483648, %v2289_v2  ;;  %v2440_v10 = vand.u32 2147483647, %v2289_v2 }
 0x326   :  { %2544 = vst.msk [vmem:[%s4054_s7 + $0x38] sm:$0xff] %vm2536_vm2, %v2414_v17  ;;  %v2418_v34 = vsub.f32 1.0, %v2417_v48  ;;  %v2227_v49 = vadd.f32 %v3962_v18, %v2201_v12  ;;  %vm2436_vm8 = vweird.f32 %v2289_v2 }
 0x327   :  { %v2443_v11 = vor.u32 1.1754944e-38, %v2442_v9  ;;  %vm2441_vm10 = vcmp.eq.f32.partialorder %v2440_v10, 8.507059e+37 }
 0x328   :  { %v2419_v45 = vmul.f32 %v3327_v56, %v2418_v34  ;;  %v2243_v43 = vsub.f32 0.0, %v2227_v49 }
 0x32a   :  { %v3329_v1 = vpop.eup %3328  ;;  %v2420_v35 = vadd.f32 %v3327_v56, %v2419_v45  ;;  %v2270_v29 = vmul.f32 1.442695, %v2243_v43 }
 0x32b   :  { %v3331_v15 = vpop.eup %3330  ;;  %v2290_v21 = vadd.f32 1.0, %v3329_v1 }
 0x32c   :  { %v2424_v63 = vsel %vm2423_vm5, %v3327_v56, %v2420_v35  ;;  %v2432_v20 = vmul.f32 %v3331_v15, %v2289_v2  ;;  %3332 = vpow2.f32 %v2270_v29  ;;  %vm2437_vm7 = vweird.f32 %v3331_v15 }
 0x32d   :  { %v2429_v47 = vsel %vm2426_vm6, %v2428_v61, %v2424_v63  ;;  %3334 = vrcp.f32 %v2290_v21  ;;  %v2204_v30 = vpop.xlane.xlu0 %2203  ;;  %vm2438_vm9 = vmor %vm2436_vm8, %vm2437_vm7  ;;  %v2457_v53 = vand.u32 2147483648, %v2290_v21  ;;  %v2455_v23 = vand.u32 2147483647, %v2290_v21 }
 0x32e   :  { %2545 = vst.msk [vmem:[%s4054_s7 + $0x40] sm:$0xff] %vm2536_vm2, %v2429_v47  ;;  %v2433_v37 = vsub.f32 1.0, %v2432_v20  ;;  %v2228_v36 = vadd.f32 %v3962_v18, %v2204_v30  ;;  %vm2451_vm12 = vweird.f32 %v2290_v21 }
 0x32f   :  { %v2458_v41 = vor.u32 1.1754944e-38, %v2457_v53  ;;  %vm2456_vm14 = vcmp.eq.f32.partialorder %v2455_v23, 8.507059e+37 }
 0x330   :  { %v2434_v52 = vmul.f32 %v3331_v15, %v2433_v37  ;;  %v2244_v50 = vsub.f32 0.0, %v2228_v36 }
 0x332   :  { %v3333_v42 = vpop.eup %3332  ;;  %v2435_v60 = vadd.f32 %v3331_v15, %v2434_v52  ;;  %v2272_v33 = vmul.f32 1.442695, %v2244_v50 }
 0x333   :  { %v3335_v25 = vpop.eup %3334  ;;  %v2291_v28 = vadd.f32 1.0, %v3333_v42 }
 0x334   :  { %v2439_v40 = vsel %vm2438_vm9, %v3331_v15, %v2435_v60  ;;  %v2447_v58 = vmul.f32 %v3335_v25, %v2290_v21  ;;  %3336 = vpow2.f32 %v2272_v33  ;;  %vm2452_vm11 = vweird.f32 %v3335_v25 }
 0x335   :  { %v2444_v55 = vsel %vm2441_vm10, %v2443_v11, %v2439_v40  ;;  %3338 = vrcp.f32 %v2291_v28  ;;  %v2207_v19 = vpop.xlane.xlu1 %2206  ;;  %vm2453_vm13 = vmor %vm2451_vm12, %vm2452_vm11  ;;  %v2472_v8 = vand.u32 2147483648, %v2291_v28  ;;  %v2470_v38 = vand.u32 2147483647, %v2291_v28 }
 0x336   :  { %2546 = vst.msk [vmem:[%s4054_s7 + $0x48] sm:$0xff] %vm2536_vm2, %v2444_v55  ;;  %v2448_v59 = vsub.f32 1.0, %v2447_v58  ;;  %v2229_v31 = vadd.f32 %v3962_v18, %v2207_v19  ;;  %vm2466_vm0 = vweird.f32 %v2291_v28 }
 0x337   :  { %v2473_v2 = vor.u32 1.1754944e-38, %v2472_v8  ;;  %vm2471_vm3 = vcmp.eq.f32.partialorder %v2470_v38, 8.507059e+37 }
 0x338   :  { %v2449_v0 = vmul.f32 %v3335_v25, %v2448_v59  ;;  %v2245_v39 = vsub.f32 0.0, %v2229_v31 }
 0x33a   :  { %v3337_v24 = vpop.eup %3336  ;;  %v2450_v14 = vadd.f32 %v3335_v25, %v2449_v0  ;;  %v2274_v6 = vmul.f32 1.442695, %v2245_v39 }
 0x33b   :  { %v3339_v16 = vpop.eup %3338  ;;  %v2292_v57 = vadd.f32 1.0, %v3337_v24 }
 0x33c   :  { %v2454_v44 = vsel %vm2453_vm13, %v3335_v25, %v2450_v14  ;;  %v2462_v62 = vmul.f32 %v3339_v16, %v2291_v28  ;;  %3340 = vpow2.f32 %v2274_v6  ;;  %vm2467_vm15 = vweird.f32 %v3339_v16 }
 0x33d   :  { %v2459_v51 = vsel %vm2456_vm14, %v2458_v41, %v2454_v44  ;;  %3342 = vrcp.f32 %v2292_v57  ;;  %v2210_v4 = vpop.xlane.xlu2 %2209  ;;  %vm2468_vm1 = vmor %vm2466_vm0, %vm2467_vm15  ;;  %v2487_v45 = vand.u32 2147483648, %v2292_v57  ;;  %v2485_v43 = vand.u32 2147483647, %v2292_v57 }
 0x33e   :  { %2547 = vst.msk [vmem:[%s4054_s7 + $0x50] sm:$0xff] %vm2536_vm2, %v2459_v51  ;;  %v2463_v3 = vsub.f32 1.0, %v2462_v62  ;;  %v2230_v7 = vadd.f32 %v3962_v18, %v2210_v4  ;;  %vm2481_vm5 = vweird.f32 %v2292_v57 }
 0x33f   :  { %v2488_v21 = vor.u32 1.1754944e-38, %v2487_v45  ;;  %vm2486_vm7 = vcmp.eq.f32.partialorder %v2485_v43, 8.507059e+37 }
 0x340   :  { %v2464_v32 = vmul.f32 %v3339_v16, %v2463_v3  ;;  %v2246_v13 = vsub.f32 0.0, %v2230_v7 }
 0x342   :  { %v3341_v54 = vpop.eup %3340  ;;  %v2465_v27 = vadd.f32 %v3339_v16, %v2464_v32  ;;  %v2276_v56 = vmul.f32 1.442695, %v2246_v13 }
 0x343   :  { %v3343_v46 = vpop.eup %3342  ;;  %v2293_v26 = vadd.f32 1.0, %v3341_v54 }
 0x344   :  { %v2469_v48 = vsel %vm2468_vm1, %v3339_v16, %v2465_v27  ;;  %v2477_v17 = vmul.f32 %v3343_v46, %v2292_v57  ;;  %3344 = vpow2.f32 %v2276_v56  ;;  %vm2482_vm4 = vweird.f32 %v3343_v46 }
 0x345   :  { %v2474_v12 = vsel %vm2471_vm3, %v2473_v2, %v2469_v48  ;;  %3346 = vrcp.f32 %v2293_v26  ;;  %v2213_v34 = vpop.xlane.xlu0 %2212  ;;  %vm2483_vm6 = vmor %vm2481_vm5, %vm2482_vm4  ;;  %v2502_v37 = vand.u32 2147483648, %v2293_v26  ;;  %v2500_v9 = vand.u32 2147483647, %v2293_v26 }
 0x346   :  { %2548 = vst.msk [vmem:[%s4054_s7 + $0x58] sm:$0xff] %vm2536_vm2, %v2474_v12  ;;  %v2478_v49 = vsub.f32 1.0, %v2477_v17  ;;  %v2231_v22 = vadd.f32 %v3962_v18, %v2213_v34  ;;  %vm2496_vm9 = vweird.f32 %v2293_v26 }
 0x347   :  { %v2503_v42 = vor.u32 1.1754944e-38, %v2502_v37  ;;  %vm2501_vm11 = vcmp.eq.f32.partialorder %v2500_v9, 8.507059e+37 }
 0x348   :  { %v2479_v5 = vmul.f32 %v3343_v46, %v2478_v49  ;;  %v2247_v1 = vsub.f32 0.0, %v2231_v22 }
 0x34a   :  { %v3345_v35 = vpop.eup %3344  ;;  %v2480_v29 = vadd.f32 %v3343_v46, %v2479_v5  ;;  %v2278_v15 = vmul.f32 1.442695, %v2247_v1 }
 0x34b   :  { %v3347_v61 = vpop.eup %3346  ;;  %v2294_v63 = vadd.f32 1.0, %v3345_v35 }
 0x34c   :  { %v2484_v20 = vsel %vm2483_vm6, %v3343_v46, %v2480_v29  ;;  %v2492_v47 = vmul.f32 %v3347_v61, %v2293_v26  ;;  %3348 = vpow2.f32 %v2278_v15  ;;  %vm2497_vm8 = vweird.f32 %v3347_v61 }
 0x34d   :  { %v2489_v30 = vsel %vm2486_vm7, %v2488_v21, %v2484_v20  ;;  %3350 = vrcp.f32 %v2294_v63  ;;  %vm2498_vm10 = vmor %vm2496_vm9, %vm2497_vm8  ;;  %v2517_v40 = vand.u32 2147483648, %v2294_v63  ;;  %v2515_v55 = vand.u32 2147483647, %v2294_v63 }
 0x34e   :  { %2549 = vst.msk [vmem:[%s4054_s7 + $0x60] sm:$0xff] %vm2536_vm2, %v2489_v30  ;;  %v2493_v18 = vsub.f32 1.0, %v2492_v47  ;;  %vm2511_vm13 = vweird.f32 %v2294_v63 }
 0x34f   :  { %v2518_v31 = vor.u32 1.1754944e-38, %v2517_v40  ;;  %vm2516_vm15 = vcmp.eq.f32.partialorder %v2515_v55, 8.507059e+37 }
 0x350   :  { %v2494_v36 = vmul.f32 %v3347_v61, %v2493_v18 }
 0x352   :  { %v3349_v52 = vpop.eup %3348  ;;  %v2495_v10 = vadd.f32 %v3347_v61, %v2494_v36 }
 0x353   :  { %v3351_v50 = vpop.eup %3350  ;;  %v2295_v60 = vadd.f32 1.0, %v3349_v52 }
 0x354   :  { %v2499_v33 = vsel %vm2498_vm10, %v3347_v61, %v2495_v10  ;;  %v2507_v25 = vmul.f32 %v3351_v50, %v2294_v63  ;;  %vm2512_vm12 = vweird.f32 %v3351_v50 }
 0x355   :  { %v2504_v11 = vsel %vm2501_vm11, %v2503_v42, %v2499_v33  ;;  %3352 = vrcp.f32 %v2295_v60  ;;  %vm2513_vm14 = vmor %vm2511_vm13, %vm2512_vm12  ;;  %v2532_v24 = vand.u32 2147483648, %v2295_v60  ;;  %v2530_v6 = vand.u32 2147483647, %v2295_v60 }
 0x356   :  { %2550 = vst.msk [vmem:[%s4054_s7 + $0x68] sm:$0xff] %vm2536_vm2, %v2504_v11  ;;  %v2508_v28 = vsub.f32 1.0, %v2507_v25  ;;  %vm2526_vm1 = vweird.f32 %v2295_v60 }
 0x357   :  { %v2533_v41 = vor.u32 1.1754944e-38, %v2532_v24  ;;  %vm2531_vm4 = vcmp.eq.f32.partialorder %v2530_v6, 8.507059e+37 }
 0x358   :  { %v2509_v58 = vmul.f32 %v3351_v50, %v2508_v28 }
 0x35a   :  { %v2510_v19 = vadd.f32 %v3351_v50, %v2509_v58 }
 0x35b   :  { %v3353_v59 = vpop.eup %3352 }
 0x35c   :  { %v2514_v53 = vsel %vm2513_vm14, %v3351_v50, %v2510_v19  ;;  %v2522_v0 = vmul.f32 %v3353_v59, %v2295_v60  ;;  %vm2527_vm0 = vweird.f32 %v3353_v59 }
 0x35d   :  { %v2519_v23 = vsel %vm2516_vm15, %v2518_v31, %v2514_v53  ;;  %vm2528_vm3 = vmor %vm2526_vm1, %vm2527_vm0 }
 0x35e   :  { %2551 = vst.msk [vmem:[%s4054_s7 + $0x70] sm:$0xff] %vm2536_vm2, %v2519_v23  ;;  %v2523_v39 = vsub.f32 1.0, %v2522_v0 }
 0x360   :  { %v2524_v14 = vmul.f32 %v3353_v59, %v2523_v39 }
 0x362   :  { %v2525_v16 = vadd.f32 %v3353_v59, %v2524_v14 }
 0x364   :  { %v2529_v57 = vsel %vm2528_vm3, %v3353_v59, %v2525_v16 }
 0x365   :  { %v2534_v44 = vsel %vm2531_vm4, %v2533_v41, %v2529_v57 }
 0x366   :  { %2552 = vst.msk [vmem:[%s4054_s7 + $0x78] sm:$0xff] %vm2536_vm2, %v2534_v44 }
 0x367   :  { %2557 = vsyncpa [#allocation4], 1 }
 0x368   :  { %2558 = vsyncpa [#allocation6], 1 }
 0x369   :  { %2559 = vsyncpa [#allocation9], 1 }

</bundles_post_ra>
